<compile_context>
chip_gen: v7x
topology: tpu7x:2x2x1
jax: 0.10.0
libtpu: 0.0.40
codegen_flags: <defaults>
</compile_context>

<pallas_src>
import functools

import jax
import jax.numpy as jnp
from jax import lax
from jax.experimental import pallas as pl
from jax.experimental.pallas import tpu as pltpu


# ---------------------------------------------------------------------------
# Fused Pallas kernel: convs + GRU + final projection for one batch element
# ---------------------------------------------------------------------------

def _cpc_fused_kernel(wave_ref, w1_ref, b1_ref, w2_ref, b2_ref, w3_ref, b3_ref,
                      wih_ref, bx_ref, whh_ref, bhn_ref, ww_ref, bw_ref,
                      out_ref, o_scr, *, l1, l2):
    """One grid step == one batch element.

    wave_ref: (1, G, s1*Cin)  stride-3 phase-grouped, channel-last raw input
    w1_ref  : (Q1, s1*Cin, E) grouped conv1 taps      b1_ref: (1, E)
    w2_ref  : (K2, E, E)      conv2 taps              b2_ref: (1, E)
    w3_ref  : (K3, E, E)      conv3 taps              b3_ref: (1, E)
    wih_ref : (3, E, H)       GRU input weights per gate (r, z, n)
    bx_ref  : (3, 1, H)       b_ih with b_hh folded in for r/z gates
    whh_ref : (3, H, H)       GRU recurrent weights per gate
    bhn_ref : (1, H)          b_hh of the n gate (must stay inside r * (.))
    ww_ref  : (H, E)          final Linear weight (transposed)  bw_ref: (1, E)
    out_ref : (1, T, E)
    o_scr   : (T, H) VMEM scratch holding the hidden-state sequence
    """
    f32 = jnp.float32
    q1 = w1_ref.shape[0]
    k2 = w2_ref.shape[0]
    k3 = w3_ref.shape[0]
    t_len = out_ref.shape[1]
    p2 = l1 // 2                       # phase length for the stride-2 conv

    dot = functools.partial(jnp.dot, preferred_element_type=jnp.float32)

    # ---- hoist all weights / biases once ----
    w1 = w1_ref[...]; b1 = b1_ref[...]
    w2 = w2_ref[...]; b2 = b2_ref[...]
    w3 = w3_ref[...]; b3 = b3_ref[...]
    wih_r = wih_ref[0]; wih_z = wih_ref[1]; wih_n = wih_ref[2]
    bx_r = bx_ref[0]; bx_z = bx_ref[1]; bx_n = bx_ref[2]
    whh_r = whh_ref[0]; whh_z = whh_ref[1]; whh_n = whh_ref[2]
    bhn = bhn_ref[...]
    ww = ww_ref[...]; bw = bw_ref[...]

    x_g = wave_ref[0]                                   # (G, s1*Cin)

    # ---- conv1 (kernel 10, stride 3): 4 contiguous grouped taps + ReLU ----
    acc1 = dot(x_g[0:l1, :], w1[0])
    for q in range(1, q1):
        acc1 += dot(x_g[q:q + l1, :], w1[q])
    y1 = jnp.maximum(acc1 + b1, 0.0)                    # (l1, E)

    # ---- conv2 (kernel 8, stride 2) ----
    # stride-2 subsampling as two tiny selection matmuls (MXU, no gather/strided load),
    # then 8 contiguous taps.
    rows = lax.broadcasted_iota(jnp.int32, (p2, l1), 0)
    cols = lax.broadcasted_iota(jnp.int32, (p2, l1), 1)
    sel0 = jnp.where(cols == 2 * rows, 1.0, 0.0).astype(f32)
    sel1 = jnp.where(cols == 2 * rows + 1, 1.0, 0.0).astype(f32)
    ph = (dot(sel0, y1), dot(sel1, y1))                 # each (p2, E)
    acc2 = dot(ph[0][0:l2, :], w2[0])
    for k in range(1, k2):
        q, r = divmod(k, 2)
        acc2 += dot(ph[r][q:q + l2, :], w2[k])
    y2 = jnp.maximum(acc2 + b2, 0.0)                    # (l2, E)

    # ---- conv3 (kernel 4, stride 1): 4 contiguous taps + ReLU ----
    acc3 = dot(y2[0:t_len, :], w3[0])
    for k in range(1, k3):
        acc3 += dot(y2[k:k + t_len, :], w3[k])
    z = jnp.maximum(acc3 + b3, 0.0)                     # (T, E)  == encoder output

    # ---- GRU input projections (per gate; r/z parts of b_hh already folded in) ----
    xr = dot(z, wih_r) + bx_r                           # (T, H)
    xz = dot(z, wih_z) + bx_z
    xn = dot(z, wih_n) + bx_n

    # ---- GRU recurrence: h in registers, fully unrolled over T ----
    h = jnp.zeros((1, whh_r.shape[0]), f32)
    for t in range(t_len):
        gr = dot(h, whh_r)
        gz = dot(h, whh_z)
        gn = dot(h, whh_n) + bhn
        r_g = jax.nn.sigmoid(xr[t:t + 1, :] + gr)
        z_g = jax.nn.sigmoid(xz[t:t + 1, :] + gz)
        n_g = jnp.tanh(xn[t:t + 1, :] + r_g * gn)
        h = (1.0 - z_g) * n_g + z_g * h
        o_scr[t:t + 1, :] = h

    # ---- final projection W: Linear(d_ffn -> emb_dim) ----
    out_ref[0] = (dot(o_scr[...], ww) + bw).astype(out_ref.dtype)


# ---------------------------------------------------------------------------
# Wrapper: tiny weight re-layout + one fused pallas_call
# ---------------------------------------------------------------------------

def cpc_forward_inference(params, wave):
    """wave: (B, 3, L) float32 (NCL, as in the PyTorch module)."""
    B, c_in, L = wave.shape
    k1, s1 = params["conv1_w"].shape[2], 3
    k2, s2 = params["conv2_w"].shape[2], 2
    k3, s3 = params["conv3_w"].shape[2], 1
    l1 = (L - k1) // s1 + 1
    l2 = (l1 - k2) // s2 + 1
    t_len = (l2 - k3) // s3 + 1
    emb = params["conv1_w"].shape[0]
    H = params["gru_w_hh"].shape[1]

    # --- input prep: channel-last + stride-3 phase grouping (transpose/pad/reshape,
    #     no gather HLO) ---
    q1 = -(-k1 // s1)                                   # ceil(k1 / s1) grouped taps
    g_len = l1 + q1 - 1
    wave_cl = jnp.transpose(wave, (0, 2, 1))            # (B, L, Cin)
    pad = g_len * s1 - L
    wave_cl = jnp.pad(wave_cl, ((0, 0), (0, pad), (0, 0)))
    wave_g = wave_cl.reshape(B, g_len, s1 * c_in)       # (B, 43, 9)

    # --- weight re-layout (tiny, runs once per call on parameters only) ---
    w1 = params["conv1_w"]                              # (E, Cin, k1)
    w1p = jnp.pad(w1, ((0, 0), (0, 0), (0, q1 * s1 - k1)))
    w1g = (w1p.reshape(emb, c_in, q1, s1)               # [co, ci, q, r]
              .transpose(2, 3, 1, 0)                    # [q, r, ci, co]
              .reshape(q1, s1 * c_in, emb))             # (4, 9, E)
    b1 = params["conv1_b"].reshape(1, emb)
    w2t = params["conv2_w"].transpose(2, 1, 0)          # (k2, E, E) = [k, ci, co]
    b2 = params["conv2_b"].reshape(1, emb)
    w3t = params["conv3_w"].transpose(2, 1, 0)          # (k3, E, E)
    b3 = params["conv3_b"].reshape(1, emb)

    wihT = params["gru_w_ih"].reshape(3, H, emb).transpose(0, 2, 1)   # (3, E, H)
    whhT = params["gru_w_hh"].reshape(3, H, H).transpose(0, 2, 1)     # (3, H, H)
    b_ih = params["gru_b_ih"].reshape(3, 1, H)
    b_hh = params["gru_b_hh"].reshape(3, 1, H)
    # Fold b_hh of the r/z gates into the input-projection bias (exact for GRU);
    # the n-gate b_hh must remain inside the r * (.) term.
    bx = b_ih + b_hh.at[2].set(0.0)                     # (3, 1, H)
    bhn = b_hh[2]                                       # (1, H)
    wwT = params["W_w"].T                               # (H, E)
    bw = params["W_b"].reshape(1, emb)

    weights = (w1g, b1, w2t, b2, w3t, b3, wihT, bx, whhT, bhn, wwT, bw)

    def _full_spec(x):
        zeros = (0,) * x.ndim
        return pl.BlockSpec(x.shape, lambda b, _z=zeros: _z)

    kernel = functools.partial(_cpc_fused_kernel, l1=l1, l2=l2)
    out = pl.pallas_call(
        kernel,
        out_shape=jax.ShapeDtypeStruct((B, t_len, emb), jnp.float32),
        grid_spec=pltpu.PrefetchScalarGridSpec(
            num_scalar_prefetch=0,
            grid=(B,),
            in_specs=[pl.BlockSpec((1, g_len, s1 * c_in), lambda b: (b, 0, 0))]
                     + [_full_spec(w) for w in weights],
            out_specs=pl.BlockSpec((1, t_len, emb), lambda b: (b, 0, 0)),
            scratch_shapes=[pltpu.VMEM((t_len, H), jnp.float32)],
        ),
        compiler_params=pltpu.CompilerParams(dimension_semantics=("parallel",)),
        cost_estimate=pl.CostEstimate(flops=900_000, transcendentals=2_700,
                                      bytes_accessed=50_000),
    )(wave_g, *weights)
    return out


# ---------------------------------------------------------------------------
# Parameter init (deterministic, PyTorch-like uniform(-1/sqrt(fan), 1/sqrt(fan)))
# ---------------------------------------------------------------------------

def init_params(key, emb_dim=16, d_ffn=32):
    ks = jax.random.split(key, 12)

    def u(k, shape, fan_in):
        bound = 1.0 / jnp.sqrt(jnp.float32(fan_in))
        return jax.random.uniform(k, shape, jnp.float32, -bound, bound)

    return {
        # encoder: Conv1d(3, emb, 10, s=3) / Conv1d(emb, emb, 8, s=2) / Conv1d(emb, emb, 4, s=1)
        "conv1_w": u(ks[0], (emb_dim, 3, 10), 3 * 10),
        "conv1_b": u(ks[1], (emb_dim,), 3 * 10),
        "conv2_w": u(ks[2], (emb_dim, emb_dim, 8), emb_dim * 8),
        "conv2_b": u(ks[3], (emb_dim,), emb_dim * 8),
        "conv3_w": u(ks[4], (emb_dim, emb_dim, 4), emb_dim * 4),
        "conv3_b": u(ks[5], (emb_dim,), emb_dim * 4),
        # GRU(emb_dim, d_ffn, batch_first=True)
        "gru_w_ih": u(ks[6], (3 * d_ffn, emb_dim), d_ffn),
        "gru_w_hh": u(ks[7], (3 * d_ffn, d_ffn), d_ffn),
        "gru_b_ih": u(ks[8], (3 * d_ffn,), d_ffn),
        "gru_b_hh": u(ks[9], (3 * d_ffn,), d_ffn),
        # W = Linear(d_ffn, emb_dim)  (inference branch)
        "W_w": u(ks[10], (emb_dim, d_ffn), d_ffn),
        "W_b": u(ks[11], (emb_dim,), d_ffn),
    }


# ---------------------------------------------------------------------------
# Plain-JAX reference (mirrors the PyTorch math) for a correctness check
# ---------------------------------------------------------------------------

def _reference_forward(params, wave):
    def conv1d_relu_ref(x, w, b, stride):
        B, C_in, L = x.shape
        C_out, _, K = w.shape
        L_out = (L - K) // stride + 1
        idx = jnp.arange(L_out)[:, None] * stride + jnp.arange(K)[None, :]
        patches = x[:, :, idx].transpose(0, 2, 1, 3).reshape(B * L_out, C_in * K)
        y = patches @ w.reshape(C_out, C_in * K).T + b
        y = jnp.maximum(y, 0.0)
        return y.reshape(B, L_out, C_out).transpose(0, 2, 1)

    z = conv1d_relu_ref(wave, params["conv1_w"], params["conv1_b"], 3)
    z = conv1d_relu_ref(z, params["conv2_w"], params["conv2_b"], 2)
    z = conv1d_relu_ref(z, params["conv3_w"], params["conv3_b"], 1)
    z = z.transpose(0, 2, 1)                             # (B, T, E)
    B, T, E = z.shape
    H = params["gru_w_hh"].shape[1]
    w_ih, w_hh = params["gru_w_ih"], params["gru_w_hh"]
    b_ih, b_hh = params["gru_b_ih"], params["gru_b_hh"]

    def step(h, x_t):
        gi = x_t @ w_ih.T + b_ih
        gh = h @ w_hh.T + b_hh
        r = jax.nn.sigmoid(gi[:, :H] + gh[:, :H])
        zz = jax.nn.sigmoid(gi[:, H:2 * H] + gh[:, H:2 * H])
        n = jnp.tanh(gi[:, 2 * H:] + r * gh[:, 2 * H:])
        h = (1.0 - zz) * n + zz * h
        return h, h

    _, o = lax.scan(step, jnp.zeros((B, H), jnp.float32), z.transpose(1, 0, 2))
    o = o.transpose(1, 0, 2)                             # (B, T, H)
    return o @ params["W_w"].T + params["W_b"]


if __name__ == "__main__":
    key = jax.random.PRNGKey(0)
    pkey, xkey = jax.random.split(key)

    emb_dim, d_ffn = 16, 32
    params = init_params(pkey, emb_dim=emb_dim, d_ffn=d_ffn)

    B, L = 2, 128                       # encoder: 128 -> 40 -> 17 -> 14 timesteps
    wave = jax.random.normal(xkey, (B, 3, L), jnp.float32)

    out = jax.jit(cpc_forward_inference)(params, wave)
    out = jax.block_until_ready(out)
    assert out.shape == (B, 14, emb_dim), out.shape
    assert bool(jnp.all(jnp.isfinite(out)))

    # Correctness check against the plain-JAX reference of the same forward
    # (loose tolerance to absorb MXU vs. XLA matmul precision-mode differences).
    ref = _reference_forward(params, wave)
    assert jnp.allclose(out, ref, atol=2e-2, rtol=2e-2), \
        float(jnp.max(jnp.abs(out - ref)))

    print("KERNEL_OK")
</pallas_src>

<mosaic_0001>
module attributes {stable_mosaic.version = 11 : i64} {
  func.func @_cpc_fused_kernel(%arg0: i32, %arg1: memref<1x43x9xf32, #tpu.memory_space<vmem>>, %arg2: memref<4x9x16xf32, #tpu.memory_space<vmem>>, %arg3: memref<1x16xf32, #tpu.memory_space<vmem>>, %arg4: memref<8x16x16xf32, #tpu.memory_space<vmem>>, %arg5: memref<1x16xf32, #tpu.memory_space<vmem>>, %arg6: memref<4x16x16xf32, #tpu.memory_space<vmem>>, %arg7: memref<1x16xf32, #tpu.memory_space<vmem>>, %arg8: memref<3x16x32xf32, #tpu.memory_space<vmem>>, %arg9: memref<3x1x32xf32, #tpu.memory_space<vmem>>, %arg10: memref<3x32x32xf32, #tpu.memory_space<vmem>>, %arg11: memref<1x32xf32, #tpu.memory_space<vmem>>, %arg12: memref<32x16xf32, #tpu.memory_space<vmem>>, %arg13: memref<1x16xf32, #tpu.memory_space<vmem>>, %arg14: memref<1x14x16xf32, #tpu.memory_space<vmem>>, %arg15: memref<14x32xf32, #tpu.memory_space<vmem>>) attributes {dimension_semantics = [#tpu.dimension_semantics<parallel>], iteration_bounds = array<i64: 2>, scalar_prefetch = 0 : i64, scratch_operands = 1 : i64, tpu.core_type = #tpu.core_type<tc>, window_params = [{transform_indices = @transform_0, window_bounds = array<i64: 1, 43, 9>}, {pipeline_mode = #tpu.pipeline_mode<synchronous>, transform_indices = @transform_1, window_bounds = array<i64: 4, 9, 16>}, {pipeline_mode = #tpu.pipeline_mode<synchronous>, transform_indices = @transform_2, window_bounds = array<i64: 1, 16>}, {pipeline_mode = #tpu.pipeline_mode<synchronous>, transform_indices = @transform_3, window_bounds = array<i64: 8, 16, 16>}, {pipeline_mode = #tpu.pipeline_mode<synchronous>, transform_indices = @transform_4, window_bounds = array<i64: 1, 16>}, {pipeline_mode = #tpu.pipeline_mode<synchronous>, transform_indices = @transform_5, window_bounds = array<i64: 4, 16, 16>}, {pipeline_mode = #tpu.pipeline_mode<synchronous>, transform_indices = @transform_6, window_bounds = array<i64: 1, 16>}, {pipeline_mode = #tpu.pipeline_mode<synchronous>, transform_indices = @transform_7, window_bounds = array<i64: 3, 16, 32>}, {pipeline_mode = #tpu.pipeline_mode<synchronous>, transform_indices = @transform_8, window_bounds = array<i64: 3, 1, 32>}, {pipeline_mode = #tpu.pipeline_mode<synchronous>, transform_indices = @transform_9, window_bounds = array<i64: 3, 32, 32>}, {pipeline_mode = #tpu.pipeline_mode<synchronous>, transform_indices = @transform_10, window_bounds = array<i64: 1, 32>}, {pipeline_mode = #tpu.pipeline_mode<synchronous>, transform_indices = @transform_11, window_bounds = array<i64: 32, 16>}, {pipeline_mode = #tpu.pipeline_mode<synchronous>, transform_indices = @transform_12, window_bounds = array<i64: 1, 16>}, {transform_indices = @transform_13, window_bounds = array<i64: 1, 14, 16>}]} {
    %c0 = arith.constant 0 : index
    %c0_0 = arith.constant 0 : index
    %c0_1 = arith.constant 0 : index
    %0 = vector.load %arg2[%c0, %c0_0, %c0_1] : memref<4x9x16xf32, #tpu.memory_space<vmem>>, vector<4x9x16xf32>
    %c0_2 = arith.constant 0 : index
    %c0_3 = arith.constant 0 : index
    %1 = vector.load %arg3[%c0_2, %c0_3] : memref<1x16xf32, #tpu.memory_space<vmem>>, vector<1x16xf32>
    %c0_4 = arith.constant 0 : index
    %c0_5 = arith.constant 0 : index
    %c0_6 = arith.constant 0 : index
    %2 = vector.load %arg4[%c0_4, %c0_5, %c0_6] : memref<8x16x16xf32, #tpu.memory_space<vmem>>, vector<8x16x16xf32>
    %c0_7 = arith.constant 0 : index
    %c0_8 = arith.constant 0 : index
    %3 = vector.load %arg5[%c0_7, %c0_8] : memref<1x16xf32, #tpu.memory_space<vmem>>, vector<1x16xf32>
    %c0_9 = arith.constant 0 : index
    %c0_10 = arith.constant 0 : index
    %c0_11 = arith.constant 0 : index
    %4 = vector.load %arg6[%c0_9, %c0_10, %c0_11] : memref<4x16x16xf32, #tpu.memory_space<vmem>>, vector<4x16x16xf32>
    %c0_12 = arith.constant 0 : index
    %c0_13 = arith.constant 0 : index
    %5 = vector.load %arg7[%c0_12, %c0_13] : memref<1x16xf32, #tpu.memory_space<vmem>>, vector<1x16xf32>
    %c0_14 = arith.constant 0 : index
    %c0_15 = arith.constant 0 : index
    %c0_16 = arith.constant 0 : index
    %6 = vector.load %arg8[%c0_14, %c0_15, %c0_16] : memref<3x16x32xf32, #tpu.memory_space<vmem>>, vector<1x16x32xf32>
    %7 = vector.shape_cast %6 : vector<1x16x32xf32> to vector<16x32xf32>
    %c1 = arith.constant 1 : index
    %c0_17 = arith.constant 0 : index
    %c0_18 = arith.constant 0 : index
    %8 = vector.load %arg8[%c1, %c0_17, %c0_18] : memref<3x16x32xf32, #tpu.memory_space<vmem>>, vector<1x16x32xf32>
    %9 = vector.shape_cast %8 : vector<1x16x32xf32> to vector<16x32xf32>
    %c2 = arith.constant 2 : index
    %c0_19 = arith.constant 0 : index
    %c0_20 = arith.constant 0 : index
    %10 = vector.load %arg8[%c2, %c0_19, %c0_20] : memref<3x16x32xf32, #tpu.memory_space<vmem>>, vector<1x16x32xf32>
    %11 = vector.shape_cast %10 : vector<1x16x32xf32> to vector<16x32xf32>
    %c0_21 = arith.constant 0 : index
    %c0_22 = arith.constant 0 : index
    %c0_23 = arith.constant 0 : index
    %12 = vector.load %arg9[%c0_21, %c0_22, %c0_23] : memref<3x1x32xf32, #tpu.memory_space<vmem>>, vector<1x1x32xf32>
    %13 = vector.shape_cast %12 : vector<1x1x32xf32> to vector<1x32xf32>
    %c1_24 = arith.constant 1 : index
    %c0_25 = arith.constant 0 : index
    %c0_26 = arith.constant 0 : index
    %14 = vector.load %arg9[%c1_24, %c0_25, %c0_26] : memref<3x1x32xf32, #tpu.memory_space<vmem>>, vector<1x1x32xf32>
    %15 = vector.shape_cast %14 : vector<1x1x32xf32> to vector<1x32xf32>
    %c2_27 = arith.constant 2 : index
    %c0_28 = arith.constant 0 : index
    %c0_29 = arith.constant 0 : index
    %16 = vector.load %arg9[%c2_27, %c0_28, %c0_29] : memref<3x1x32xf32, #tpu.memory_space<vmem>>, vector<1x1x32xf32>
    %17 = vector.shape_cast %16 : vector<1x1x32xf32> to vector<1x32xf32>
    %c0_30 = arith.constant 0 : index
    %c0_31 = arith.constant 0 : index
    %c0_32 = arith.constant 0 : index
    %18 = vector.load %arg10[%c0_30, %c0_31, %c0_32] : memref<3x32x32xf32, #tpu.memory_space<vmem>>, vector<1x32x32xf32>
    %19 = vector.shape_cast %18 : vector<1x32x32xf32> to vector<32x32xf32>
    %c1_33 = arith.constant 1 : index
    %c0_34 = arith.constant 0 : index
    %c0_35 = arith.constant 0 : index
    %20 = vector.load %arg10[%c1_33, %c0_34, %c0_35] : memref<3x32x32xf32, #tpu.memory_space<vmem>>, vector<1x32x32xf32>
    %21 = vector.shape_cast %20 : vector<1x32x32xf32> to vector<32x32xf32>
    %c2_36 = arith.constant 2 : index
    %c0_37 = arith.constant 0 : index
    %c0_38 = arith.constant 0 : index
    %22 = vector.load %arg10[%c2_36, %c0_37, %c0_38] : memref<3x32x32xf32, #tpu.memory_space<vmem>>, vector<1x32x32xf32>
    %23 = vector.shape_cast %22 : vector<1x32x32xf32> to vector<32x32xf32>
    %c0_39 = arith.constant 0 : index
    %c0_40 = arith.constant 0 : index
    %24 = vector.load %arg11[%c0_39, %c0_40] : memref<1x32xf32, #tpu.memory_space<vmem>>, vector<1x32xf32>
    %c0_41 = arith.constant 0 : index
    %c0_42 = arith.constant 0 : index
    %25 = vector.load %arg12[%c0_41, %c0_42] : memref<32x16xf32, #tpu.memory_space<vmem>>, vector<32x16xf32>
    %c0_43 = arith.constant 0 : index
    %c0_44 = arith.constant 0 : index
    %26 = vector.load %arg13[%c0_43, %c0_44] : memref<1x16xf32, #tpu.memory_space<vmem>>, vector<1x16xf32>
    %c0_45 = arith.constant 0 : index
    %c0_46 = arith.constant 0 : index
    %c0_47 = arith.constant 0 : index
    %27 = vector.load %arg1[%c0_45, %c0_46, %c0_47] : memref<1x43x9xf32, #tpu.memory_space<vmem>>, vector<1x43x9xf32>
    %28 = vector.shape_cast %27 : vector<1x43x9xf32> to vector<43x9xf32>
    %29 = vector.extract_strided_slice %28 {offsets = [0, 0], sizes = [40, 9], strides = [1, 1]} : vector<43x9xf32> to vector<40x9xf32>
    %30 = vector.extract_strided_slice %0 {offsets = [0, 0, 0], sizes = [1, 9, 16], strides = [1, 1, 1]} : vector<4x9x16xf32> to vector<1x9x16xf32>
    %31 = vector.shape_cast %30 : vector<1x9x16xf32> to vector<9x16xf32>
    %cst = arith.constant dense<0.000000e+00> : vector<40x16xf32>
    %32 = tpu.matmul %29, %31, %cst {dimension_numbers = #tpu.dot_dimension_numbers<[1], [0], [0], [1], [0, 0, 1, 1], [], []>} : vector<40x9xf32>, vector<9x16xf32>, vector<40x16xf32> -> vector<40x16xf32>
    %33 = vector.extract_strided_slice %28 {offsets = [1, 0], sizes = [40, 9], strides = [1, 1]} : vector<43x9xf32> to vector<40x9xf32>
    %34 = vector.extract_strided_slice %0 {offsets = [1, 0, 0], sizes = [1, 9, 16], strides = [1, 1, 1]} : vector<4x9x16xf32> to vector<1x9x16xf32>
    %35 = vector.shape_cast %34 : vector<1x9x16xf32> to vector<9x16xf32>
    %cst_48 = arith.constant dense<0.000000e+00> : vector<40x16xf32>
    %36 = tpu.matmul %33, %35, %cst_48 {dimension_numbers = #tpu.dot_dimension_numbers<[1], [0], [0], [1], [0, 0, 1, 1], [], []>} : vector<40x9xf32>, vector<9x16xf32>, vector<40x16xf32> -> vector<40x16xf32>
    %37 = arith.addf %32, %36 : vector<40x16xf32>
    %38 = vector.extract_strided_slice %28 {offsets = [2, 0], sizes = [40, 9], strides = [1, 1]} : vector<43x9xf32> to vector<40x9xf32>
    %39 = vector.extract_strided_slice %0 {offsets = [2, 0, 0], sizes = [1, 9, 16], strides = [1, 1, 1]} : vector<4x9x16xf32> to vector<1x9x16xf32>
    %40 = vector.shape_cast %39 : vector<1x9x16xf32> to vector<9x16xf32>
    %cst_49 = arith.constant dense<0.000000e+00> : vector<40x16xf32>
    %41 = tpu.matmul %38, %40, %cst_49 {dimension_numbers = #tpu.dot_dimension_numbers<[1], [0], [0], [1], [0, 0, 1, 1], [], []>} : vector<40x9xf32>, vector<9x16xf32>, vector<40x16xf32> -> vector<40x16xf32>
    %42 = arith.addf %37, %41 : vector<40x16xf32>
    %43 = vector.extract_strided_slice %28 {offsets = [3, 0], sizes = [40, 9], strides = [1, 1]} : vector<43x9xf32> to vector<40x9xf32>
    %44 = vector.extract_strided_slice %0 {offsets = [3, 0, 0], sizes = [1, 9, 16], strides = [1, 1, 1]} : vector<4x9x16xf32> to vector<1x9x16xf32>
    %45 = vector.shape_cast %44 : vector<1x9x16xf32> to vector<9x16xf32>
    %cst_50 = arith.constant dense<0.000000e+00> : vector<40x16xf32>
    %46 = tpu.matmul %43, %45, %cst_50 {dimension_numbers = #tpu.dot_dimension_numbers<[1], [0], [0], [1], [0, 0, 1, 1], [], []>} : vector<40x9xf32>, vector<9x16xf32>, vector<40x16xf32> -> vector<40x16xf32>
    %47 = arith.addf %42, %46 : vector<40x16xf32>
    %48 = vector.broadcast %1 : vector<1x16xf32> to vector<40x16xf32>
    %49 = arith.addf %47, %48 : vector<40x16xf32>
    %cst_51 = arith.constant 0.000000e+00 : f32
    %50 = vector.broadcast %cst_51 : f32 to vector<40x16xf32>
    %51 = arith.maximumf %49, %50 : vector<40x16xf32>
    %52 = tpu.iota {dimensions = array<i32: 0>} : vector<20x40xi32>
    %53 = tpu.iota {dimensions = array<i32: 1>} : vector<20x40xi32>
    %c2_i32 = arith.constant 2 : i32
    %54 = vector.broadcast %c2_i32 : i32 to vector<20x40xi32>
    %55 = arith.muli %54, %52 : vector<20x40xi32>
    %56 = arith.cmpi eq, %53, %55 : vector<20x40xi32>
    %cst_52 = arith.constant 1.000000e+00 : f32
    %cst_53 = arith.constant 0.000000e+00 : f32
    %57 = vector.broadcast %cst_52 : f32 to vector<20x40xf32>
    %58 = vector.broadcast %cst_53 : f32 to vector<20x40xf32>
    %59 = arith.select %56, %57, %58 : vector<20x40xi1>, vector<20x40xf32>
    %c2_i32_54 = arith.constant 2 : i32
    %60 = vector.broadcast %c2_i32_54 : i32 to vector<20x40xi32>
    %61 = arith.muli %60, %52 : vector<20x40xi32>
    %c1_i32 = arith.constant 1 : i32
    %62 = vector.broadcast %c1_i32 : i32 to vector<20x40xi32>
    %63 = arith.addi %61, %62 : vector<20x40xi32>
    %64 = arith.cmpi eq, %53, %63 : vector<20x40xi32>
    %cst_55 = arith.constant 1.000000e+00 : f32
    %cst_56 = arith.constant 0.000000e+00 : f32
    %65 = vector.broadcast %cst_55 : f32 to vector<20x40xf32>
    %66 = vector.broadcast %cst_56 : f32 to vector<20x40xf32>
    %67 = arith.select %64, %65, %66 : vector<20x40xi1>, vector<20x40xf32>
    %cst_57 = arith.constant dense<0.000000e+00> : vector<20x16xf32>
    %68 = tpu.matmul %59, %51, %cst_57 {dimension_numbers = #tpu.dot_dimension_numbers<[1], [0], [0], [1], [0, 0, 1, 1], [], []>} : vector<20x40xf32>, vector<40x16xf32>, vector<20x16xf32> -> vector<20x16xf32>
    %cst_58 = arith.constant dense<0.000000e+00> : vector<20x16xf32>
    %69 = tpu.matmul %67, %51, %cst_58 {dimension_numbers = #tpu.dot_dimension_numbers<[1], [0], [0], [1], [0, 0, 1, 1], [], []>} : vector<20x40xf32>, vector<40x16xf32>, vector<20x16xf32> -> vector<20x16xf32>
    %70 = vector.extract_strided_slice %68 {offsets = [0, 0], sizes = [17, 16], strides = [1, 1]} : vector<20x16xf32> to vector<17x16xf32>
    %71 = vector.extract_strided_slice %2 {offsets = [0, 0, 0], sizes = [1, 16, 16], strides = [1, 1, 1]} : vector<8x16x16xf32> to vector<1x16x16xf32>
    %72 = vector.shape_cast %71 : vector<1x16x16xf32> to vector<16x16xf32>
    %cst_59 = arith.constant dense<0.000000e+00> : vector<17x16xf32>
    %73 = tpu.matmul %70, %72, %cst_59 {dimension_numbers = #tpu.dot_dimension_numbers<[1], [0], [0], [1], [0, 0, 1, 1], [], []>} : vector<17x16xf32>, vector<16x16xf32>, vector<17x16xf32> -> vector<17x16xf32>
    %74 = vector.extract_strided_slice %69 {offsets = [0, 0], sizes = [17, 16], strides = [1, 1]} : vector<20x16xf32> to vector<17x16xf32>
    %75 = vector.extract_strided_slice %2 {offsets = [1, 0, 0], sizes = [1, 16, 16], strides = [1, 1, 1]} : vector<8x16x16xf32> to vector<1x16x16xf32>
    %76 = vector.shape_cast %75 : vector<1x16x16xf32> to vector<16x16xf32>
    %cst_60 = arith.constant dense<0.000000e+00> : vector<17x16xf32>
    %77 = tpu.matmul %74, %76, %cst_60 {dimension_numbers = #tpu.dot_dimension_numbers<[1], [0], [0], [1], [0, 0, 1, 1], [], []>} : vector<17x16xf32>, vector<16x16xf32>, vector<17x16xf32> -> vector<17x16xf32>
    %78 = arith.addf %73, %77 : vector<17x16xf32>
    %79 = vector.extract_strided_slice %68 {offsets = [1, 0], sizes = [17, 16], strides = [1, 1]} : vector<20x16xf32> to vector<17x16xf32>
    %80 = vector.extract_strided_slice %2 {offsets = [2, 0, 0], sizes = [1, 16, 16], strides = [1, 1, 1]} : vector<8x16x16xf32> to vector<1x16x16xf32>
    %81 = vector.shape_cast %80 : vector<1x16x16xf32> to vector<16x16xf32>
    %cst_61 = arith.constant dense<0.000000e+00> : vector<17x16xf32>
    %82 = tpu.matmul %79, %81, %cst_61 {dimension_numbers = #tpu.dot_dimension_numbers<[1], [0], [0], [1], [0, 0, 1, 1], [], []>} : vector<17x16xf32>, vector<16x16xf32>, vector<17x16xf32> -> vector<17x16xf32>
    %83 = arith.addf %78, %82 : vector<17x16xf32>
    %84 = vector.extract_strided_slice %69 {offsets = [1, 0], sizes = [17, 16], strides = [1, 1]} : vector<20x16xf32> to vector<17x16xf32>
    %85 = vector.extract_strided_slice %2 {offsets = [3, 0, 0], sizes = [1, 16, 16], strides = [1, 1, 1]} : vector<8x16x16xf32> to vector<1x16x16xf32>
    %86 = vector.shape_cast %85 : vector<1x16x16xf32> to vector<16x16xf32>
    %cst_62 = arith.constant dense<0.000000e+00> : vector<17x16xf32>
    %87 = tpu.matmul %84, %86, %cst_62 {dimension_numbers = #tpu.dot_dimension_numbers<[1], [0], [0], [1], [0, 0, 1, 1], [], []>} : vector<17x16xf32>, vector<16x16xf32>, vector<17x16xf32> -> vector<17x16xf32>
    %88 = arith.addf %83, %87 : vector<17x16xf32>
    %89 = vector.extract_strided_slice %68 {offsets = [2, 0], sizes = [17, 16], strides = [1, 1]} : vector<20x16xf32> to vector<17x16xf32>
    %90 = vector.extract_strided_slice %2 {offsets = [4, 0, 0], sizes = [1, 16, 16], strides = [1, 1, 1]} : vector<8x16x16xf32> to vector<1x16x16xf32>
    %91 = vector.shape_cast %90 : vector<1x16x16xf32> to vector<16x16xf32>
    %cst_63 = arith.constant dense<0.000000e+00> : vector<17x16xf32>
    %92 = tpu.matmul %89, %91, %cst_63 {dimension_numbers = #tpu.dot_dimension_numbers<[1], [0], [0], [1], [0, 0, 1, 1], [], []>} : vector<17x16xf32>, vector<16x16xf32>, vector<17x16xf32> -> vector<17x16xf32>
    %93 = arith.addf %88, %92 : vector<17x16xf32>
    %94 = vector.extract_strided_slice %69 {offsets = [2, 0], sizes = [17, 16], strides = [1, 1]} : vector<20x16xf32> to vector<17x16xf32>
    %95 = vector.extract_strided_slice %2 {offsets = [5, 0, 0], sizes = [1, 16, 16], strides = [1, 1, 1]} : vector<8x16x16xf32> to vector<1x16x16xf32>
    %96 = vector.shape_cast %95 : vector<1x16x16xf32> to vector<16x16xf32>
    %cst_64 = arith.constant dense<0.000000e+00> : vector<17x16xf32>
    %97 = tpu.matmul %94, %96, %cst_64 {dimension_numbers = #tpu.dot_dimension_numbers<[1], [0], [0], [1], [0, 0, 1, 1], [], []>} : vector<17x16xf32>, vector<16x16xf32>, vector<17x16xf32> -> vector<17x16xf32>
    %98 = arith.addf %93, %97 : vector<17x16xf32>
    %99 = vector.extract_strided_slice %68 {offsets = [3, 0], sizes = [17, 16], strides = [1, 1]} : vector<20x16xf32> to vector<17x16xf32>
    %100 = vector.extract_strided_slice %2 {offsets = [6, 0, 0], sizes = [1, 16, 16], strides = [1, 1, 1]} : vector<8x16x16xf32> to vector<1x16x16xf32>
    %101 = vector.shape_cast %100 : vector<1x16x16xf32> to vector<16x16xf32>
    %cst_65 = arith.constant dense<0.000000e+00> : vector<17x16xf32>
    %102 = tpu.matmul %99, %101, %cst_65 {dimension_numbers = #tpu.dot_dimension_numbers<[1], [0], [0], [1], [0, 0, 1, 1], [], []>} : vector<17x16xf32>, vector<16x16xf32>, vector<17x16xf32> -> vector<17x16xf32>
    %103 = arith.addf %98, %102 : vector<17x16xf32>
    %104 = vector.extract_strided_slice %69 {offsets = [3, 0], sizes = [17, 16], strides = [1, 1]} : vector<20x16xf32> to vector<17x16xf32>
    %105 = vector.extract_strided_slice %2 {offsets = [7, 0, 0], sizes = [1, 16, 16], strides = [1, 1, 1]} : vector<8x16x16xf32> to vector<1x16x16xf32>
    %106 = vector.shape_cast %105 : vector<1x16x16xf32> to vector<16x16xf32>
    %cst_66 = arith.constant dense<0.000000e+00> : vector<17x16xf32>
    %107 = tpu.matmul %104, %106, %cst_66 {dimension_numbers = #tpu.dot_dimension_numbers<[1], [0], [0], [1], [0, 0, 1, 1], [], []>} : vector<17x16xf32>, vector<16x16xf32>, vector<17x16xf32> -> vector<17x16xf32>
    %108 = arith.addf %103, %107 : vector<17x16xf32>
    %109 = vector.broadcast %3 : vector<1x16xf32> to vector<17x16xf32>
    %110 = arith.addf %108, %109 : vector<17x16xf32>
    %cst_67 = arith.constant 0.000000e+00 : f32
    %111 = vector.broadcast %cst_67 : f32 to vector<17x16xf32>
    %112 = arith.maximumf %110, %111 : vector<17x16xf32>
    %113 = vector.extract_strided_slice %112 {offsets = [0, 0], sizes = [14, 16], strides = [1, 1]} : vector<17x16xf32> to vector<14x16xf32>
    %114 = vector.extract_strided_slice %4 {offsets = [0, 0, 0], sizes = [1, 16, 16], strides = [1, 1, 1]} : vector<4x16x16xf32> to vector<1x16x16xf32>
    %115 = vector.shape_cast %114 : vector<1x16x16xf32> to vector<16x16xf32>
    %cst_68 = arith.constant dense<0.000000e+00> : vector<14x16xf32>
    %116 = tpu.matmul %113, %115, %cst_68 {dimension_numbers = #tpu.dot_dimension_numbers<[1], [0], [0], [1], [0, 0, 1, 1], [], []>} : vector<14x16xf32>, vector<16x16xf32>, vector<14x16xf32> -> vector<14x16xf32>
    %117 = vector.extract_strided_slice %112 {offsets = [1, 0], sizes = [14, 16], strides = [1, 1]} : vector<17x16xf32> to vector<14x16xf32>
    %118 = vector.extract_strided_slice %4 {offsets = [1, 0, 0], sizes = [1, 16, 16], strides = [1, 1, 1]} : vector<4x16x16xf32> to vector<1x16x16xf32>
    %119 = vector.shape_cast %118 : vector<1x16x16xf32> to vector<16x16xf32>
    %cst_69 = arith.constant dense<0.000000e+00> : vector<14x16xf32>
    %120 = tpu.matmul %117, %119, %cst_69 {dimension_numbers = #tpu.dot_dimension_numbers<[1], [0], [0], [1], [0, 0, 1, 1], [], []>} : vector<14x16xf32>, vector<16x16xf32>, vector<14x16xf32> -> vector<14x16xf32>
    %121 = arith.addf %116, %120 : vector<14x16xf32>
    %122 = vector.extract_strided_slice %112 {offsets = [2, 0], sizes = [14, 16], strides = [1, 1]} : vector<17x16xf32> to vector<14x16xf32>
    %123 = vector.extract_strided_slice %4 {offsets = [2, 0, 0], sizes = [1, 16, 16], strides = [1, 1, 1]} : vector<4x16x16xf32> to vector<1x16x16xf32>
    %124 = vector.shape_cast %123 : vector<1x16x16xf32> to vector<16x16xf32>
    %cst_70 = arith.constant dense<0.000000e+00> : vector<14x16xf32>
    %125 = tpu.matmul %122, %124, %cst_70 {dimension_numbers = #tpu.dot_dimension_numbers<[1], [0], [0], [1], [0, 0, 1, 1], [], []>} : vector<14x16xf32>, vector<16x16xf32>, vector<14x16xf32> -> vector<14x16xf32>
    %126 = arith.addf %121, %125 : vector<14x16xf32>
    %127 = vector.extract_strided_slice %112 {offsets = [3, 0], sizes = [14, 16], strides = [1, 1]} : vector<17x16xf32> to vector<14x16xf32>
    %128 = vector.extract_strided_slice %4 {offsets = [3, 0, 0], sizes = [1, 16, 16], strides = [1, 1, 1]} : vector<4x16x16xf32> to vector<1x16x16xf32>
    %129 = vector.shape_cast %128 : vector<1x16x16xf32> to vector<16x16xf32>
    %cst_71 = arith.constant dense<0.000000e+00> : vector<14x16xf32>
    %130 = tpu.matmul %127, %129, %cst_71 {dimension_numbers = #tpu.dot_dimension_numbers<[1], [0], [0], [1], [0, 0, 1, 1], [], []>} : vector<14x16xf32>, vector<16x16xf32>, vector<14x16xf32> -> vector<14x16xf32>
    %131 = arith.addf %126, %130 : vector<14x16xf32>
    %132 = vector.broadcast %5 : vector<1x16xf32> to vector<14x16xf32>
    %133 = arith.addf %131, %132 : vector<14x16xf32>
    %cst_72 = arith.constant 0.000000e+00 : f32
    %134 = vector.broadcast %cst_72 : f32 to vector<14x16xf32>
    %135 = arith.maximumf %133, %134 : vector<14x16xf32>
    %cst_73 = arith.constant dense<0.000000e+00> : vector<14x32xf32>
    %136 = tpu.matmul %135, %7, %cst_73 {dimension_numbers = #tpu.dot_dimension_numbers<[1], [0], [0], [1], [0, 0, 1, 1], [], []>} : vector<14x16xf32>, vector<16x32xf32>, vector<14x32xf32> -> vector<14x32xf32>
    %137 = vector.broadcast %13 : vector<1x32xf32> to vector<14x32xf32>
    %138 = arith.addf %136, %137 : vector<14x32xf32>
    %cst_74 = arith.constant dense<0.000000e+00> : vector<14x32xf32>
    %139 = tpu.matmul %135, %9, %cst_74 {dimension_numbers = #tpu.dot_dimension_numbers<[1], [0], [0], [1], [0, 0, 1, 1], [], []>} : vector<14x16xf32>, vector<16x32xf32>, vector<14x32xf32> -> vector<14x32xf32>
    %140 = vector.broadcast %15 : vector<1x32xf32> to vector<14x32xf32>
    %141 = arith.addf %139, %140 : vector<14x32xf32>
    %cst_75 = arith.constant dense<0.000000e+00> : vector<14x32xf32>
    %142 = tpu.matmul %135, %11, %cst_75 {dimension_numbers = #tpu.dot_dimension_numbers<[1], [0], [0], [1], [0, 0, 1, 1], [], []>} : vector<14x16xf32>, vector<16x32xf32>, vector<14x32xf32> -> vector<14x32xf32>
    %143 = vector.broadcast %17 : vector<1x32xf32> to vector<14x32xf32>
    %144 = arith.addf %142, %143 : vector<14x32xf32>
    %cst_76 = arith.constant 0.000000e+00 : f32
    %145 = vector.broadcast %cst_76 : f32 to vector<1x32xf32>
    %cst_77 = arith.constant dense<0.000000e+00> : vector<1x32xf32>
    %146 = tpu.matmul %145, %19, %cst_77 {dimension_numbers = #tpu.dot_dimension_numbers<[1], [0], [0], [1], [0, 0, 1, 1], [], []>} : vector<1x32xf32>, vector<32x32xf32>, vector<1x32xf32> -> vector<1x32xf32>
    %cst_78 = arith.constant dense<0.000000e+00> : vector<1x32xf32>
    %147 = tpu.matmul %145, %21, %cst_78 {dimension_numbers = #tpu.dot_dimension_numbers<[1], [0], [0], [1], [0, 0, 1, 1], [], []>} : vector<1x32xf32>, vector<32x32xf32>, vector<1x32xf32> -> vector<1x32xf32>
    %cst_79 = arith.constant dense<0.000000e+00> : vector<1x32xf32>
    %148 = tpu.matmul %145, %23, %cst_79 {dimension_numbers = #tpu.dot_dimension_numbers<[1], [0], [0], [1], [0, 0, 1, 1], [], []>} : vector<1x32xf32>, vector<32x32xf32>, vector<1x32xf32> -> vector<1x32xf32>
    %149 = arith.addf %148, %24 : vector<1x32xf32>
    %150 = vector.extract_strided_slice %138 {offsets = [0, 0], sizes = [1, 32], strides = [1, 1]} : vector<14x32xf32> to vector<1x32xf32>
    %151 = arith.addf %150, %146 : vector<1x32xf32>
    %152 = arith.negf %151 : vector<1x32xf32>
    %153 = math.exp %152 : vector<1x32xf32>
    %cst_80 = arith.constant 1.000000e+00 : f32
    %154 = vector.broadcast %cst_80 : f32 to vector<1x32xf32>
    %155 = arith.addf %154, %153 : vector<1x32xf32>
    %156 = arith.divf %154, %155 : vector<1x32xf32>
    %157 = vector.extract_strided_slice %141 {offsets = [0, 0], sizes = [1, 32], strides = [1, 1]} : vector<14x32xf32> to vector<1x32xf32>
    %158 = arith.addf %157, %147 : vector<1x32xf32>
    %159 = arith.negf %158 : vector<1x32xf32>
    %160 = math.exp %159 : vector<1x32xf32>
    %cst_81 = arith.constant 1.000000e+00 : f32
    %161 = vector.broadcast %cst_81 : f32 to vector<1x32xf32>
    %162 = arith.addf %161, %160 : vector<1x32xf32>
    %163 = arith.divf %161, %162 : vector<1x32xf32>
    %164 = vector.extract_strided_slice %144 {offsets = [0, 0], sizes = [1, 32], strides = [1, 1]} : vector<14x32xf32> to vector<1x32xf32>
    %165 = arith.mulf %156, %149 : vector<1x32xf32>
    %166 = arith.addf %164, %165 : vector<1x32xf32>
    %167 = math.tanh %166 : vector<1x32xf32>
    %cst_82 = arith.constant 1.000000e+00 : f32
    %168 = vector.broadcast %cst_82 : f32 to vector<1x32xf32>
    %169 = arith.subf %168, %163 : vector<1x32xf32>
    %170 = arith.mulf %169, %167 : vector<1x32xf32>
    %171 = arith.mulf %163, %145 : vector<1x32xf32>
    %172 = arith.addf %170, %171 : vector<1x32xf32>
    %c0_83 = arith.constant 0 : index
    %c0_84 = arith.constant 0 : index
    %173 = vector.load %arg15[%c0_83, %c0_84] : memref<14x32xf32, #tpu.memory_space<vmem>>, vector<1x32xf32>
    tpu.vector_store %arg15[%c0_83, %c0_84], %172 {strides = array<i32>} : memref<14x32xf32, #tpu.memory_space<vmem>>, vector<1x32xf32>,
    %cst_85 = arith.constant dense<0.000000e+00> : vector<1x32xf32>
    %174 = tpu.matmul %172, %19, %cst_85 {dimension_numbers = #tpu.dot_dimension_numbers<[1], [0], [0], [1], [0, 0, 1, 1], [], []>} : vector<1x32xf32>, vector<32x32xf32>, vector<1x32xf32> -> vector<1x32xf32>
    %cst_86 = arith.constant dense<0.000000e+00> : vector<1x32xf32>
    %175 = tpu.matmul %172, %21, %cst_86 {dimension_numbers = #tpu.dot_dimension_numbers<[1], [0], [0], [1], [0, 0, 1, 1], [], []>} : vector<1x32xf32>, vector<32x32xf32>, vector<1x32xf32> -> vector<1x32xf32>
    %cst_87 = arith.constant dense<0.000000e+00> : vector<1x32xf32>
    %176 = tpu.matmul %172, %23, %cst_87 {dimension_numbers = #tpu.dot_dimension_numbers<[1], [0], [0], [1], [0, 0, 1, 1], [], []>} : vector<1x32xf32>, vector<32x32xf32>, vector<1x32xf32> -> vector<1x32xf32>
    %177 = arith.addf %176, %24 : vector<1x32xf32>
    %178 = vector.extract_strided_slice %138 {offsets = [1, 0], sizes = [1, 32], strides = [1, 1]} : vector<14x32xf32> to vector<1x32xf32>
    %179 = arith.addf %178, %174 : vector<1x32xf32>
    %180 = arith.negf %179 : vector<1x32xf32>
    %181 = math.exp %180 : vector<1x32xf32>
    %cst_88 = arith.constant 1.000000e+00 : f32
    %182 = vector.broadcast %cst_88 : f32 to vector<1x32xf32>
    %183 = arith.addf %182, %181 : vector<1x32xf32>
    %184 = arith.divf %182, %183 : vector<1x32xf32>
    %185 = vector.extract_strided_slice %141 {offsets = [1, 0], sizes = [1, 32], strides = [1, 1]} : vector<14x32xf32> to vector<1x32xf32>
    %186 = arith.addf %185, %175 : vector<1x32xf32>
    %187 = arith.negf %186 : vector<1x32xf32>
    %188 = math.exp %187 : vector<1x32xf32>
    %cst_89 = arith.constant 1.000000e+00 : f32
    %189 = vector.broadcast %cst_89 : f32 to vector<1x32xf32>
    %190 = arith.addf %189, %188 : vector<1x32xf32>
    %191 = arith.divf %189, %190 : vector<1x32xf32>
    %192 = vector.extract_strided_slice %144 {offsets = [1, 0], sizes = [1, 32], strides = [1, 1]} : vector<14x32xf32> to vector<1x32xf32>
    %193 = arith.mulf %184, %177 : vector<1x32xf32>
    %194 = arith.addf %192, %193 : vector<1x32xf32>
    %195 = math.tanh %194 : vector<1x32xf32>
    %cst_90 = arith.constant 1.000000e+00 : f32
    %196 = vector.broadcast %cst_90 : f32 to vector<1x32xf32>
    %197 = arith.subf %196, %191 : vector<1x32xf32>
    %198 = arith.mulf %197, %195 : vector<1x32xf32>
    %199 = arith.mulf %191, %172 : vector<1x32xf32>
    %200 = arith.addf %198, %199 : vector<1x32xf32>
    %c1_91 = arith.constant 1 : index
    %c0_92 = arith.constant 0 : index
    %201 = vector.load %arg15[%c1_91, %c0_92] : memref<14x32xf32, #tpu.memory_space<vmem>>, vector<1x32xf32>
    tpu.vector_store %arg15[%c1_91, %c0_92], %200 {strides = array<i32>} : memref<14x32xf32, #tpu.memory_space<vmem>>, vector<1x32xf32>,
    %cst_93 = arith.constant dense<0.000000e+00> : vector<1x32xf32>
    %202 = tpu.matmul %200, %19, %cst_93 {dimension_numbers = #tpu.dot_dimension_numbers<[1], [0], [0], [1], [0, 0, 1, 1], [], []>} : vector<1x32xf32>, vector<32x32xf32>, vector<1x32xf32> -> vector<1x32xf32>
    %cst_94 = arith.constant dense<0.000000e+00> : vector<1x32xf32>
    %203 = tpu.matmul %200, %21, %cst_94 {dimension_numbers = #tpu.dot_dimension_numbers<[1], [0], [0], [1], [0, 0, 1, 1], [], []>} : vector<1x32xf32>, vector<32x32xf32>, vector<1x32xf32> -> vector<1x32xf32>
    %cst_95 = arith.constant dense<0.000000e+00> : vector<1x32xf32>
    %204 = tpu.matmul %200, %23, %cst_95 {dimension_numbers = #tpu.dot_dimension_numbers<[1], [0], [0], [1], [0, 0, 1, 1], [], []>} : vector<1x32xf32>, vector<32x32xf32>, vector<1x32xf32> -> vector<1x32xf32>
    %205 = arith.addf %204, %24 : vector<1x32xf32>
    %206 = vector.extract_strided_slice %138 {offsets = [2, 0], sizes = [1, 32], strides = [1, 1]} : vector<14x32xf32> to vector<1x32xf32>
    %207 = arith.addf %206, %202 : vector<1x32xf32>
    %208 = arith.negf %207 : vector<1x32xf32>
    %209 = math.exp %208 : vector<1x32xf32>
    %cst_96 = arith.constant 1.000000e+00 : f32
    %210 = vector.broadcast %cst_96 : f32 to vector<1x32xf32>
    %211 = arith.addf %210, %209 : vector<1x32xf32>
    %212 = arith.divf %210, %211 : vector<1x32xf32>
    %213 = vector.extract_strided_slice %141 {offsets = [2, 0], sizes = [1, 32], strides = [1, 1]} : vector<14x32xf32> to vector<1x32xf32>
    %214 = arith.addf %213, %203 : vector<1x32xf32>
    %215 = arith.negf %214 : vector<1x32xf32>
    %216 = math.exp %215 : vector<1x32xf32>
    %cst_97 = arith.constant 1.000000e+00 : f32
    %217 = vector.broadcast %cst_97 : f32 to vector<1x32xf32>
    %218 = arith.addf %217, %216 : vector<1x32xf32>
    %219 = arith.divf %217, %218 : vector<1x32xf32>
    %220 = vector.extract_strided_slice %144 {offsets = [2, 0], sizes = [1, 32], strides = [1, 1]} : vector<14x32xf32> to vector<1x32xf32>
    %221 = arith.mulf %212, %205 : vector<1x32xf32>
    %222 = arith.addf %220, %221 : vector<1x32xf32>
    %223 = math.tanh %222 : vector<1x32xf32>
    %cst_98 = arith.constant 1.000000e+00 : f32
    %224 = vector.broadcast %cst_98 : f32 to vector<1x32xf32>
    %225 = arith.subf %224, %219 : vector<1x32xf32>
    %226 = arith.mulf %225, %223 : vector<1x32xf32>
    %227 = arith.mulf %219, %200 : vector<1x32xf32>
    %228 = arith.addf %226, %227 : vector<1x32xf32>
    %c2_99 = arith.constant 2 : index
    %c0_100 = arith.constant 0 : index
    %229 = vector.load %arg15[%c2_99, %c0_100] : memref<14x32xf32, #tpu.memory_space<vmem>>, vector<1x32xf32>
    tpu.vector_store %arg15[%c2_99, %c0_100], %228 {strides = array<i32>} : memref<14x32xf32, #tpu.memory_space<vmem>>, vector<1x32xf32>,
    %cst_101 = arith.constant dense<0.000000e+00> : vector<1x32xf32>
    %230 = tpu.matmul %228, %19, %cst_101 {dimension_numbers = #tpu.dot_dimension_numbers<[1], [0], [0], [1], [0, 0, 1, 1], [], []>} : vector<1x32xf32>, vector<32x32xf32>, vector<1x32xf32> -> vector<1x32xf32>
    %cst_102 = arith.constant dense<0.000000e+00> : vector<1x32xf32>
    %231 = tpu.matmul %228, %21, %cst_102 {dimension_numbers = #tpu.dot_dimension_numbers<[1], [0], [0], [1], [0, 0, 1, 1], [], []>} : vector<1x32xf32>, vector<32x32xf32>, vector<1x32xf32> -> vector<1x32xf32>
    %cst_103 = arith.constant dense<0.000000e+00> : vector<1x32xf32>
    %232 = tpu.matmul %228, %23, %cst_103 {dimension_numbers = #tpu.dot_dimension_numbers<[1], [0], [0], [1], [0, 0, 1, 1], [], []>} : vector<1x32xf32>, vector<32x32xf32>, vector<1x32xf32> -> vector<1x32xf32>
    %233 = arith.addf %232, %24 : vector<1x32xf32>
    %234 = vector.extract_strided_slice %138 {offsets = [3, 0], sizes = [1, 32], strides = [1, 1]} : vector<14x32xf32> to vector<1x32xf32>
    %235 = arith.addf %234, %230 : vector<1x32xf32>
    %236 = arith.negf %235 : vector<1x32xf32>
    %237 = math.exp %236 : vector<1x32xf32>
    %cst_104 = arith.constant 1.000000e+00 : f32
    %238 = vector.broadcast %cst_104 : f32 to vector<1x32xf32>
    %239 = arith.addf %238, %237 : vector<1x32xf32>
    %240 = arith.divf %238, %239 : vector<1x32xf32>
    %241 = vector.extract_strided_slice %141 {offsets = [3, 0], sizes = [1, 32], strides = [1, 1]} : vector<14x32xf32> to vector<1x32xf32>
    %242 = arith.addf %241, %231 : vector<1x32xf32>
    %243 = arith.negf %242 : vector<1x32xf32>
    %244 = math.exp %243 : vector<1x32xf32>
    %cst_105 = arith.constant 1.000000e+00 : f32
    %245 = vector.broadcast %cst_105 : f32 to vector<1x32xf32>
    %246 = arith.addf %245, %244 : vector<1x32xf32>
    %247 = arith.divf %245, %246 : vector<1x32xf32>
    %248 = vector.extract_strided_slice %144 {offsets = [3, 0], sizes = [1, 32], strides = [1, 1]} : vector<14x32xf32> to vector<1x32xf32>
    %249 = arith.mulf %240, %233 : vector<1x32xf32>
    %250 = arith.addf %248, %249 : vector<1x32xf32>
    %251 = math.tanh %250 : vector<1x32xf32>
    %cst_106 = arith.constant 1.000000e+00 : f32
    %252 = vector.broadcast %cst_106 : f32 to vector<1x32xf32>
    %253 = arith.subf %252, %247 : vector<1x32xf32>
    %254 = arith.mulf %253, %251 : vector<1x32xf32>
    %255 = arith.mulf %247, %228 : vector<1x32xf32>
    %256 = arith.addf %254, %255 : vector<1x32xf32>
    %c3 = arith.constant 3 : index
    %c0_107 = arith.constant 0 : index
    %257 = vector.load %arg15[%c3, %c0_107] : memref<14x32xf32, #tpu.memory_space<vmem>>, vector<1x32xf32>
    tpu.vector_store %arg15[%c3, %c0_107], %256 {strides = array<i32>} : memref<14x32xf32, #tpu.memory_space<vmem>>, vector<1x32xf32>,
    %cst_108 = arith.constant dense<0.000000e+00> : vector<1x32xf32>
    %258 = tpu.matmul %256, %19, %cst_108 {dimension_numbers = #tpu.dot_dimension_numbers<[1], [0], [0], [1], [0, 0, 1, 1], [], []>} : vector<1x32xf32>, vector<32x32xf32>, vector<1x32xf32> -> vector<1x32xf32>
    %cst_109 = arith.constant dense<0.000000e+00> : vector<1x32xf32>
    %259 = tpu.matmul %256, %21, %cst_109 {dimension_numbers = #tpu.dot_dimension_numbers<[1], [0], [0], [1], [0, 0, 1, 1], [], []>} : vector<1x32xf32>, vector<32x32xf32>, vector<1x32xf32> -> vector<1x32xf32>
    %cst_110 = arith.constant dense<0.000000e+00> : vector<1x32xf32>
    %260 = tpu.matmul %256, %23, %cst_110 {dimension_numbers = #tpu.dot_dimension_numbers<[1], [0], [0], [1], [0, 0, 1, 1], [], []>} : vector<1x32xf32>, vector<32x32xf32>, vector<1x32xf32> -> vector<1x32xf32>
    %261 = arith.addf %260, %24 : vector<1x32xf32>
    %262 = vector.extract_strided_slice %138 {offsets = [4, 0], sizes = [1, 32], strides = [1, 1]} : vector<14x32xf32> to vector<1x32xf32>
    %263 = arith.addf %262, %258 : vector<1x32xf32>
    %264 = arith.negf %263 : vector<1x32xf32>
    %265 = math.exp %264 : vector<1x32xf32>
    %cst_111 = arith.constant 1.000000e+00 : f32
    %266 = vector.broadcast %cst_111 : f32 to vector<1x32xf32>
    %267 = arith.addf %266, %265 : vector<1x32xf32>
    %268 = arith.divf %266, %267 : vector<1x32xf32>
    %269 = vector.extract_strided_slice %141 {offsets = [4, 0], sizes = [1, 32], strides = [1, 1]} : vector<14x32xf32> to vector<1x32xf32>
    %270 = arith.addf %269, %259 : vector<1x32xf32>
    %271 = arith.negf %270 : vector<1x32xf32>
    %272 = math.exp %271 : vector<1x32xf32>
    %cst_112 = arith.constant 1.000000e+00 : f32
    %273 = vector.broadcast %cst_112 : f32 to vector<1x32xf32>
    %274 = arith.addf %273, %272 : vector<1x32xf32>
    %275 = arith.divf %273, %274 : vector<1x32xf32>
    %276 = vector.extract_strided_slice %144 {offsets = [4, 0], sizes = [1, 32], strides = [1, 1]} : vector<14x32xf32> to vector<1x32xf32>
    %277 = arith.mulf %268, %261 : vector<1x32xf32>
    %278 = arith.addf %276, %277 : vector<1x32xf32>
    %279 = math.tanh %278 : vector<1x32xf32>
    %cst_113 = arith.constant 1.000000e+00 : f32
    %280 = vector.broadcast %cst_113 : f32 to vector<1x32xf32>
    %281 = arith.subf %280, %275 : vector<1x32xf32>
    %282 = arith.mulf %281, %279 : vector<1x32xf32>
    %283 = arith.mulf %275, %256 : vector<1x32xf32>
    %284 = arith.addf %282, %283 : vector<1x32xf32>
    %c4 = arith.constant 4 : index
    %c0_114 = arith.constant 0 : index
    %285 = vector.load %arg15[%c4, %c0_114] : memref<14x32xf32, #tpu.memory_space<vmem>>, vector<1x32xf32>
    tpu.vector_store %arg15[%c4, %c0_114], %284 {strides = array<i32>} : memref<14x32xf32, #tpu.memory_space<vmem>>, vector<1x32xf32>,
    %cst_115 = arith.constant dense<0.000000e+00> : vector<1x32xf32>
    %286 = tpu.matmul %284, %19, %cst_115 {dimension_numbers = #tpu.dot_dimension_numbers<[1], [0], [0], [1], [0, 0, 1, 1], [], []>} : vector<1x32xf32>, vector<32x32xf32>, vector<1x32xf32> -> vector<1x32xf32>
    %cst_116 = arith.constant dense<0.000000e+00> : vector<1x32xf32>
    %287 = tpu.matmul %284, %21, %cst_116 {dimension_numbers = #tpu.dot_dimension_numbers<[1], [0], [0], [1], [0, 0, 1, 1], [], []>} : vector<1x32xf32>, vector<32x32xf32>, vector<1x32xf32> -> vector<1x32xf32>
    %cst_117 = arith.constant dense<0.000000e+00> : vector<1x32xf32>
    %288 = tpu.matmul %284, %23, %cst_117 {dimension_numbers = #tpu.dot_dimension_numbers<[1], [0], [0], [1], [0, 0, 1, 1], [], []>} : vector<1x32xf32>, vector<32x32xf32>, vector<1x32xf32> -> vector<1x32xf32>
    %289 = arith.addf %288, %24 : vector<1x32xf32>
    %290 = vector.extract_strided_slice %138 {offsets = [5, 0], sizes = [1, 32], strides = [1, 1]} : vector<14x32xf32> to vector<1x32xf32>
    %291 = arith.addf %290, %286 : vector<1x32xf32>
    %292 = arith.negf %291 : vector<1x32xf32>
    %293 = math.exp %292 : vector<1x32xf32>
    %cst_118 = arith.constant 1.000000e+00 : f32
    %294 = vector.broadcast %cst_118 : f32 to vector<1x32xf32>
    %295 = arith.addf %294, %293 : vector<1x32xf32>
    %296 = arith.divf %294, %295 : vector<1x32xf32>
    %297 = vector.extract_strided_slice %141 {offsets = [5, 0], sizes = [1, 32], strides = [1, 1]} : vector<14x32xf32> to vector<1x32xf32>
    %298 = arith.addf %297, %287 : vector<1x32xf32>
    %299 = arith.negf %298 : vector<1x32xf32>
    %300 = math.exp %299 : vector<1x32xf32>
    %cst_119 = arith.constant 1.000000e+00 : f32
    %301 = vector.broadcast %cst_119 : f32 to vector<1x32xf32>
    %302 = arith.addf %301, %300 : vector<1x32xf32>
    %303 = arith.divf %301, %302 : vector<1x32xf32>
    %304 = vector.extract_strided_slice %144 {offsets = [5, 0], sizes = [1, 32], strides = [1, 1]} : vector<14x32xf32> to vector<1x32xf32>
    %305 = arith.mulf %296, %289 : vector<1x32xf32>
    %306 = arith.addf %304, %305 : vector<1x32xf32>
    %307 = math.tanh %306 : vector<1x32xf32>
    %cst_120 = arith.constant 1.000000e+00 : f32
    %308 = vector.broadcast %cst_120 : f32 to vector<1x32xf32>
    %309 = arith.subf %308, %303 : vector<1x32xf32>
    %310 = arith.mulf %309, %307 : vector<1x32xf32>
    %311 = arith.mulf %303, %284 : vector<1x32xf32>
    %312 = arith.addf %310, %311 : vector<1x32xf32>
    %c5 = arith.constant 5 : index
    %c0_121 = arith.constant 0 : index
    %313 = vector.load %arg15[%c5, %c0_121] : memref<14x32xf32, #tpu.memory_space<vmem>>, vector<1x32xf32>
    tpu.vector_store %arg15[%c5, %c0_121], %312 {strides = array<i32>} : memref<14x32xf32, #tpu.memory_space<vmem>>, vector<1x32xf32>,
    %cst_122 = arith.constant dense<0.000000e+00> : vector<1x32xf32>
    %314 = tpu.matmul %312, %19, %cst_122 {dimension_numbers = #tpu.dot_dimension_numbers<[1], [0], [0], [1], [0, 0, 1, 1], [], []>} : vector<1x32xf32>, vector<32x32xf32>, vector<1x32xf32> -> vector<1x32xf32>
    %cst_123 = arith.constant dense<0.000000e+00> : vector<1x32xf32>
    %315 = tpu.matmul %312, %21, %cst_123 {dimension_numbers = #tpu.dot_dimension_numbers<[1], [0], [0], [1], [0, 0, 1, 1], [], []>} : vector<1x32xf32>, vector<32x32xf32>, vector<1x32xf32> -> vector<1x32xf32>
    %cst_124 = arith.constant dense<0.000000e+00> : vector<1x32xf32>
    %316 = tpu.matmul %312, %23, %cst_124 {dimension_numbers = #tpu.dot_dimension_numbers<[1], [0], [0], [1], [0, 0, 1, 1], [], []>} : vector<1x32xf32>, vector<32x32xf32>, vector<1x32xf32> -> vector<1x32xf32>
    %317 = arith.addf %316, %24 : vector<1x32xf32>
    %318 = vector.extract_strided_slice %138 {offsets = [6, 0], sizes = [1, 32], strides = [1, 1]} : vector<14x32xf32> to vector<1x32xf32>
    %319 = arith.addf %318, %314 : vector<1x32xf32>
    %320 = arith.negf %319 : vector<1x32xf32>
    %321 = math.exp %320 : vector<1x32xf32>
    %cst_125 = arith.constant 1.000000e+00 : f32
    %322 = vector.broadcast %cst_125 : f32 to vector<1x32xf32>
    %323 = arith.addf %322, %321 : vector<1x32xf32>
    %324 = arith.divf %322, %323 : vector<1x32xf32>
    %325 = vector.extract_strided_slice %141 {offsets = [6, 0], sizes = [1, 32], strides = [1, 1]} : vector<14x32xf32> to vector<1x32xf32>
    %326 = arith.addf %325, %315 : vector<1x32xf32>
    %327 = arith.negf %326 : vector<1x32xf32>
    %328 = math.exp %327 : vector<1x32xf32>
    %cst_126 = arith.constant 1.000000e+00 : f32
    %329 = vector.broadcast %cst_126 : f32 to vector<1x32xf32>
    %330 = arith.addf %329, %328 : vector<1x32xf32>
    %331 = arith.divf %329, %330 : vector<1x32xf32>
    %332 = vector.extract_strided_slice %144 {offsets = [6, 0], sizes = [1, 32], strides = [1, 1]} : vector<14x32xf32> to vector<1x32xf32>
    %333 = arith.mulf %324, %317 : vector<1x32xf32>
    %334 = arith.addf %332, %333 : vector<1x32xf32>
    %335 = math.tanh %334 : vector<1x32xf32>
    %cst_127 = arith.constant 1.000000e+00 : f32
    %336 = vector.broadcast %cst_127 : f32 to vector<1x32xf32>
    %337 = arith.subf %336, %331 : vector<1x32xf32>
    %338 = arith.mulf %337, %335 : vector<1x32xf32>
    %339 = arith.mulf %331, %312 : vector<1x32xf32>
    %340 = arith.addf %338, %339 : vector<1x32xf32>
    %c6 = arith.constant 6 : index
    %c0_128 = arith.constant 0 : index
    %341 = vector.load %arg15[%c6, %c0_128] : memref<14x32xf32, #tpu.memory_space<vmem>>, vector<1x32xf32>
    tpu.vector_store %arg15[%c6, %c0_128], %340 {strides = array<i32>} : memref<14x32xf32, #tpu.memory_space<vmem>>, vector<1x32xf32>,
    %cst_129 = arith.constant dense<0.000000e+00> : vector<1x32xf32>
    %342 = tpu.matmul %340, %19, %cst_129 {dimension_numbers = #tpu.dot_dimension_numbers<[1], [0], [0], [1], [0, 0, 1, 1], [], []>} : vector<1x32xf32>, vector<32x32xf32>, vector<1x32xf32> -> vector<1x32xf32>
    %cst_130 = arith.constant dense<0.000000e+00> : vector<1x32xf32>
    %343 = tpu.matmul %340, %21, %cst_130 {dimension_numbers = #tpu.dot_dimension_numbers<[1], [0], [0], [1], [0, 0, 1, 1], [], []>} : vector<1x32xf32>, vector<32x32xf32>, vector<1x32xf32> -> vector<1x32xf32>
    %cst_131 = arith.constant dense<0.000000e+00> : vector<1x32xf32>
    %344 = tpu.matmul %340, %23, %cst_131 {dimension_numbers = #tpu.dot_dimension_numbers<[1], [0], [0], [1], [0, 0, 1, 1], [], []>} : vector<1x32xf32>, vector<32x32xf32>, vector<1x32xf32> -> vector<1x32xf32>
    %345 = arith.addf %344, %24 : vector<1x32xf32>
    %346 = vector.extract_strided_slice %138 {offsets = [7, 0], sizes = [1, 32], strides = [1, 1]} : vector<14x32xf32> to vector<1x32xf32>
    %347 = arith.addf %346, %342 : vector<1x32xf32>
    %348 = arith.negf %347 : vector<1x32xf32>
    %349 = math.exp %348 : vector<1x32xf32>
    %cst_132 = arith.constant 1.000000e+00 : f32
    %350 = vector.broadcast %cst_132 : f32 to vector<1x32xf32>
    %351 = arith.addf %350, %349 : vector<1x32xf32>
    %352 = arith.divf %350, %351 : vector<1x32xf32>
    %353 = vector.extract_strided_slice %141 {offsets = [7, 0], sizes = [1, 32], strides = [1, 1]} : vector<14x32xf32> to vector<1x32xf32>
    %354 = arith.addf %353, %343 : vector<1x32xf32>
    %355 = arith.negf %354 : vector<1x32xf32>
    %356 = math.exp %355 : vector<1x32xf32>
    %cst_133 = arith.constant 1.000000e+00 : f32
    %357 = vector.broadcast %cst_133 : f32 to vector<1x32xf32>
    %358 = arith.addf %357, %356 : vector<1x32xf32>
    %359 = arith.divf %357, %358 : vector<1x32xf32>
    %360 = vector.extract_strided_slice %144 {offsets = [7, 0], sizes = [1, 32], strides = [1, 1]} : vector<14x32xf32> to vector<1x32xf32>
    %361 = arith.mulf %352, %345 : vector<1x32xf32>
    %362 = arith.addf %360, %361 : vector<1x32xf32>
    %363 = math.tanh %362 : vector<1x32xf32>
    %cst_134 = arith.constant 1.000000e+00 : f32
    %364 = vector.broadcast %cst_134 : f32 to vector<1x32xf32>
    %365 = arith.subf %364, %359 : vector<1x32xf32>
    %366 = arith.mulf %365, %363 : vector<1x32xf32>
    %367 = arith.mulf %359, %340 : vector<1x32xf32>
    %368 = arith.addf %366, %367 : vector<1x32xf32>
    %c7 = arith.constant 7 : index
    %c0_135 = arith.constant 0 : index
    %369 = vector.load %arg15[%c7, %c0_135] : memref<14x32xf32, #tpu.memory_space<vmem>>, vector<1x32xf32>
    tpu.vector_store %arg15[%c7, %c0_135], %368 {strides = array<i32>} : memref<14x32xf32, #tpu.memory_space<vmem>>, vector<1x32xf32>,
    %cst_136 = arith.constant dense<0.000000e+00> : vector<1x32xf32>
    %370 = tpu.matmul %368, %19, %cst_136 {dimension_numbers = #tpu.dot_dimension_numbers<[1], [0], [0], [1], [0, 0, 1, 1], [], []>} : vector<1x32xf32>, vector<32x32xf32>, vector<1x32xf32> -> vector<1x32xf32>
    %cst_137 = arith.constant dense<0.000000e+00> : vector<1x32xf32>
    %371 = tpu.matmul %368, %21, %cst_137 {dimension_numbers = #tpu.dot_dimension_numbers<[1], [0], [0], [1], [0, 0, 1, 1], [], []>} : vector<1x32xf32>, vector<32x32xf32>, vector<1x32xf32> -> vector<1x32xf32>
    %cst_138 = arith.constant dense<0.000000e+00> : vector<1x32xf32>
    %372 = tpu.matmul %368, %23, %cst_138 {dimension_numbers = #tpu.dot_dimension_numbers<[1], [0], [0], [1], [0, 0, 1, 1], [], []>} : vector<1x32xf32>, vector<32x32xf32>, vector<1x32xf32> -> vector<1x32xf32>
    %373 = arith.addf %372, %24 : vector<1x32xf32>
    %374 = vector.extract_strided_slice %138 {offsets = [8, 0], sizes = [1, 32], strides = [1, 1]} : vector<14x32xf32> to vector<1x32xf32>
    %375 = arith.addf %374, %370 : vector<1x32xf32>
    %376 = arith.negf %375 : vector<1x32xf32>
    %377 = math.exp %376 : vector<1x32xf32>
    %cst_139 = arith.constant 1.000000e+00 : f32
    %378 = vector.broadcast %cst_139 : f32 to vector<1x32xf32>
    %379 = arith.addf %378, %377 : vector<1x32xf32>
    %380 = arith.divf %378, %379 : vector<1x32xf32>
    %381 = vector.extract_strided_slice %141 {offsets = [8, 0], sizes = [1, 32], strides = [1, 1]} : vector<14x32xf32> to vector<1x32xf32>
    %382 = arith.addf %381, %371 : vector<1x32xf32>
    %383 = arith.negf %382 : vector<1x32xf32>
    %384 = math.exp %383 : vector<1x32xf32>
    %cst_140 = arith.constant 1.000000e+00 : f32
    %385 = vector.broadcast %cst_140 : f32 to vector<1x32xf32>
    %386 = arith.addf %385, %384 : vector<1x32xf32>
    %387 = arith.divf %385, %386 : vector<1x32xf32>
    %388 = vector.extract_strided_slice %144 {offsets = [8, 0], sizes = [1, 32], strides = [1, 1]} : vector<14x32xf32> to vector<1x32xf32>
    %389 = arith.mulf %380, %373 : vector<1x32xf32>
    %390 = arith.addf %388, %389 : vector<1x32xf32>
    %391 = math.tanh %390 : vector<1x32xf32>
    %cst_141 = arith.constant 1.000000e+00 : f32
    %392 = vector.broadcast %cst_141 : f32 to vector<1x32xf32>
    %393 = arith.subf %392, %387 : vector<1x32xf32>
    %394 = arith.mulf %393, %391 : vector<1x32xf32>
    %395 = arith.mulf %387, %368 : vector<1x32xf32>
    %396 = arith.addf %394, %395 : vector<1x32xf32>
    %c8 = arith.constant 8 : index
    %c0_142 = arith.constant 0 : index
    %397 = vector.load %arg15[%c8, %c0_142] : memref<14x32xf32, #tpu.memory_space<vmem>>, vector<1x32xf32>
    tpu.vector_store %arg15[%c8, %c0_142], %396 {strides = array<i32>} : memref<14x32xf32, #tpu.memory_space<vmem>>, vector<1x32xf32>,
    %cst_143 = arith.constant dense<0.000000e+00> : vector<1x32xf32>
    %398 = tpu.matmul %396, %19, %cst_143 {dimension_numbers = #tpu.dot_dimension_numbers<[1], [0], [0], [1], [0, 0, 1, 1], [], []>} : vector<1x32xf32>, vector<32x32xf32>, vector<1x32xf32> -> vector<1x32xf32>
    %cst_144 = arith.constant dense<0.000000e+00> : vector<1x32xf32>
    %399 = tpu.matmul %396, %21, %cst_144 {dimension_numbers = #tpu.dot_dimension_numbers<[1], [0], [0], [1], [0, 0, 1, 1], [], []>} : vector<1x32xf32>, vector<32x32xf32>, vector<1x32xf32> -> vector<1x32xf32>
    %cst_145 = arith.constant dense<0.000000e+00> : vector<1x32xf32>
    %400 = tpu.matmul %396, %23, %cst_145 {dimension_numbers = #tpu.dot_dimension_numbers<[1], [0], [0], [1], [0, 0, 1, 1], [], []>} : vector<1x32xf32>, vector<32x32xf32>, vector<1x32xf32> -> vector<1x32xf32>
    %401 = arith.addf %400, %24 : vector<1x32xf32>
    %402 = vector.extract_strided_slice %138 {offsets = [9, 0], sizes = [1, 32], strides = [1, 1]} : vector<14x32xf32> to vector<1x32xf32>
    %403 = arith.addf %402, %398 : vector<1x32xf32>
    %404 = arith.negf %403 : vector<1x32xf32>
    %405 = math.exp %404 : vector<1x32xf32>
    %cst_146 = arith.constant 1.000000e+00 : f32
    %406 = vector.broadcast %cst_146 : f32 to vector<1x32xf32>
    %407 = arith.addf %406, %405 : vector<1x32xf32>
    %408 = arith.divf %406, %407 : vector<1x32xf32>
    %409 = vector.extract_strided_slice %141 {offsets = [9, 0], sizes = [1, 32], strides = [1, 1]} : vector<14x32xf32> to vector<1x32xf32>
    %410 = arith.addf %409, %399 : vector<1x32xf32>
    %411 = arith.negf %410 : vector<1x32xf32>
    %412 = math.exp %411 : vector<1x32xf32>
    %cst_147 = arith.constant 1.000000e+00 : f32
    %413 = vector.broadcast %cst_147 : f32 to vector<1x32xf32>
    %414 = arith.addf %413, %412 : vector<1x32xf32>
    %415 = arith.divf %413, %414 : vector<1x32xf32>
    %416 = vector.extract_strided_slice %144 {offsets = [9, 0], sizes = [1, 32], strides = [1, 1]} : vector<14x32xf32> to vector<1x32xf32>
    %417 = arith.mulf %408, %401 : vector<1x32xf32>
    %418 = arith.addf %416, %417 : vector<1x32xf32>
    %419 = math.tanh %418 : vector<1x32xf32>
    %cst_148 = arith.constant 1.000000e+00 : f32
    %420 = vector.broadcast %cst_148 : f32 to vector<1x32xf32>
    %421 = arith.subf %420, %415 : vector<1x32xf32>
    %422 = arith.mulf %421, %419 : vector<1x32xf32>
    %423 = arith.mulf %415, %396 : vector<1x32xf32>
    %424 = arith.addf %422, %423 : vector<1x32xf32>
    %c9 = arith.constant 9 : index
    %c0_149 = arith.constant 0 : index
    %425 = vector.load %arg15[%c9, %c0_149] : memref<14x32xf32, #tpu.memory_space<vmem>>, vector<1x32xf32>
    tpu.vector_store %arg15[%c9, %c0_149], %424 {strides = array<i32>} : memref<14x32xf32, #tpu.memory_space<vmem>>, vector<1x32xf32>,
    %cst_150 = arith.constant dense<0.000000e+00> : vector<1x32xf32>
    %426 = tpu.matmul %424, %19, %cst_150 {dimension_numbers = #tpu.dot_dimension_numbers<[1], [0], [0], [1], [0, 0, 1, 1], [], []>} : vector<1x32xf32>, vector<32x32xf32>, vector<1x32xf32> -> vector<1x32xf32>
    %cst_151 = arith.constant dense<0.000000e+00> : vector<1x32xf32>
    %427 = tpu.matmul %424, %21, %cst_151 {dimension_numbers = #tpu.dot_dimension_numbers<[1], [0], [0], [1], [0, 0, 1, 1], [], []>} : vector<1x32xf32>, vector<32x32xf32>, vector<1x32xf32> -> vector<1x32xf32>
    %cst_152 = arith.constant dense<0.000000e+00> : vector<1x32xf32>
    %428 = tpu.matmul %424, %23, %cst_152 {dimension_numbers = #tpu.dot_dimension_numbers<[1], [0], [0], [1], [0, 0, 1, 1], [], []>} : vector<1x32xf32>, vector<32x32xf32>, vector<1x32xf32> -> vector<1x32xf32>
    %429 = arith.addf %428, %24 : vector<1x32xf32>
    %430 = vector.extract_strided_slice %138 {offsets = [10, 0], sizes = [1, 32], strides = [1, 1]} : vector<14x32xf32> to vector<1x32xf32>
    %431 = arith.addf %430, %426 : vector<1x32xf32>
    %432 = arith.negf %431 : vector<1x32xf32>
    %433 = math.exp %432 : vector<1x32xf32>
    %cst_153 = arith.constant 1.000000e+00 : f32
    %434 = vector.broadcast %cst_153 : f32 to vector<1x32xf32>
    %435 = arith.addf %434, %433 : vector<1x32xf32>
    %436 = arith.divf %434, %435 : vector<1x32xf32>
    %437 = vector.extract_strided_slice %141 {offsets = [10, 0], sizes = [1, 32], strides = [1, 1]} : vector<14x32xf32> to vector<1x32xf32>
    %438 = arith.addf %437, %427 : vector<1x32xf32>
    %439 = arith.negf %438 : vector<1x32xf32>
    %440 = math.exp %439 : vector<1x32xf32>
    %cst_154 = arith.constant 1.000000e+00 : f32
    %441 = vector.broadcast %cst_154 : f32 to vector<1x32xf32>
    %442 = arith.addf %441, %440 : vector<1x32xf32>
    %443 = arith.divf %441, %442 : vector<1x32xf32>
    %444 = vector.extract_strided_slice %144 {offsets = [10, 0], sizes = [1, 32], strides = [1, 1]} : vector<14x32xf32> to vector<1x32xf32>
    %445 = arith.mulf %436, %429 : vector<1x32xf32>
    %446 = arith.addf %444, %445 : vector<1x32xf32>
    %447 = math.tanh %446 : vector<1x32xf32>
    %cst_155 = arith.constant 1.000000e+00 : f32
    %448 = vector.broadcast %cst_155 : f32 to vector<1x32xf32>
    %449 = arith.subf %448, %443 : vector<1x32xf32>
    %450 = arith.mulf %449, %447 : vector<1x32xf32>
    %451 = arith.mulf %443, %424 : vector<1x32xf32>
    %452 = arith.addf %450, %451 : vector<1x32xf32>
    %c10 = arith.constant 10 : index
    %c0_156 = arith.constant 0 : index
    %453 = vector.load %arg15[%c10, %c0_156] : memref<14x32xf32, #tpu.memory_space<vmem>>, vector<1x32xf32>
    tpu.vector_store %arg15[%c10, %c0_156], %452 {strides = array<i32>} : memref<14x32xf32, #tpu.memory_space<vmem>>, vector<1x32xf32>,
    %cst_157 = arith.constant dense<0.000000e+00> : vector<1x32xf32>
    %454 = tpu.matmul %452, %19, %cst_157 {dimension_numbers = #tpu.dot_dimension_numbers<[1], [0], [0], [1], [0, 0, 1, 1], [], []>} : vector<1x32xf32>, vector<32x32xf32>, vector<1x32xf32> -> vector<1x32xf32>
    %cst_158 = arith.constant dense<0.000000e+00> : vector<1x32xf32>
    %455 = tpu.matmul %452, %21, %cst_158 {dimension_numbers = #tpu.dot_dimension_numbers<[1], [0], [0], [1], [0, 0, 1, 1], [], []>} : vector<1x32xf32>, vector<32x32xf32>, vector<1x32xf32> -> vector<1x32xf32>
    %cst_159 = arith.constant dense<0.000000e+00> : vector<1x32xf32>
    %456 = tpu.matmul %452, %23, %cst_159 {dimension_numbers = #tpu.dot_dimension_numbers<[1], [0], [0], [1], [0, 0, 1, 1], [], []>} : vector<1x32xf32>, vector<32x32xf32>, vector<1x32xf32> -> vector<1x32xf32>
    %457 = arith.addf %456, %24 : vector<1x32xf32>
    %458 = vector.extract_strided_slice %138 {offsets = [11, 0], sizes = [1, 32], strides = [1, 1]} : vector<14x32xf32> to vector<1x32xf32>
    %459 = arith.addf %458, %454 : vector<1x32xf32>
    %460 = arith.negf %459 : vector<1x32xf32>
    %461 = math.exp %460 : vector<1x32xf32>
    %cst_160 = arith.constant 1.000000e+00 : f32
    %462 = vector.broadcast %cst_160 : f32 to vector<1x32xf32>
    %463 = arith.addf %462, %461 : vector<1x32xf32>
    %464 = arith.divf %462, %463 : vector<1x32xf32>
    %465 = vector.extract_strided_slice %141 {offsets = [11, 0], sizes = [1, 32], strides = [1, 1]} : vector<14x32xf32> to vector<1x32xf32>
    %466 = arith.addf %465, %455 : vector<1x32xf32>
    %467 = arith.negf %466 : vector<1x32xf32>
    %468 = math.exp %467 : vector<1x32xf32>
    %cst_161 = arith.constant 1.000000e+00 : f32
    %469 = vector.broadcast %cst_161 : f32 to vector<1x32xf32>
    %470 = arith.addf %469, %468 : vector<1x32xf32>
    %471 = arith.divf %469, %470 : vector<1x32xf32>
    %472 = vector.extract_strided_slice %144 {offsets = [11, 0], sizes = [1, 32], strides = [1, 1]} : vector<14x32xf32> to vector<1x32xf32>
    %473 = arith.mulf %464, %457 : vector<1x32xf32>
    %474 = arith.addf %472, %473 : vector<1x32xf32>
    %475 = math.tanh %474 : vector<1x32xf32>
    %cst_162 = arith.constant 1.000000e+00 : f32
    %476 = vector.broadcast %cst_162 : f32 to vector<1x32xf32>
    %477 = arith.subf %476, %471 : vector<1x32xf32>
    %478 = arith.mulf %477, %475 : vector<1x32xf32>
    %479 = arith.mulf %471, %452 : vector<1x32xf32>
    %480 = arith.addf %478, %479 : vector<1x32xf32>
    %c11 = arith.constant 11 : index
    %c0_163 = arith.constant 0 : index
    %481 = vector.load %arg15[%c11, %c0_163] : memref<14x32xf32, #tpu.memory_space<vmem>>, vector<1x32xf32>
    tpu.vector_store %arg15[%c11, %c0_163], %480 {strides = array<i32>} : memref<14x32xf32, #tpu.memory_space<vmem>>, vector<1x32xf32>,
    %cst_164 = arith.constant dense<0.000000e+00> : vector<1x32xf32>
    %482 = tpu.matmul %480, %19, %cst_164 {dimension_numbers = #tpu.dot_dimension_numbers<[1], [0], [0], [1], [0, 0, 1, 1], [], []>} : vector<1x32xf32>, vector<32x32xf32>, vector<1x32xf32> -> vector<1x32xf32>
    %cst_165 = arith.constant dense<0.000000e+00> : vector<1x32xf32>
    %483 = tpu.matmul %480, %21, %cst_165 {dimension_numbers = #tpu.dot_dimension_numbers<[1], [0], [0], [1], [0, 0, 1, 1], [], []>} : vector<1x32xf32>, vector<32x32xf32>, vector<1x32xf32> -> vector<1x32xf32>
    %cst_166 = arith.constant dense<0.000000e+00> : vector<1x32xf32>
    %484 = tpu.matmul %480, %23, %cst_166 {dimension_numbers = #tpu.dot_dimension_numbers<[1], [0], [0], [1], [0, 0, 1, 1], [], []>} : vector<1x32xf32>, vector<32x32xf32>, vector<1x32xf32> -> vector<1x32xf32>
    %485 = arith.addf %484, %24 : vector<1x32xf32>
    %486 = vector.extract_strided_slice %138 {offsets = [12, 0], sizes = [1, 32], strides = [1, 1]} : vector<14x32xf32> to vector<1x32xf32>
    %487 = arith.addf %486, %482 : vector<1x32xf32>
    %488 = arith.negf %487 : vector<1x32xf32>
    %489 = math.exp %488 : vector<1x32xf32>
    %cst_167 = arith.constant 1.000000e+00 : f32
    %490 = vector.broadcast %cst_167 : f32 to vector<1x32xf32>
    %491 = arith.addf %490, %489 : vector<1x32xf32>
    %492 = arith.divf %490, %491 : vector<1x32xf32>
    %493 = vector.extract_strided_slice %141 {offsets = [12, 0], sizes = [1, 32], strides = [1, 1]} : vector<14x32xf32> to vector<1x32xf32>
    %494 = arith.addf %493, %483 : vector<1x32xf32>
    %495 = arith.negf %494 : vector<1x32xf32>
    %496 = math.exp %495 : vector<1x32xf32>
    %cst_168 = arith.constant 1.000000e+00 : f32
    %497 = vector.broadcast %cst_168 : f32 to vector<1x32xf32>
    %498 = arith.addf %497, %496 : vector<1x32xf32>
    %499 = arith.divf %497, %498 : vector<1x32xf32>
    %500 = vector.extract_strided_slice %144 {offsets = [12, 0], sizes = [1, 32], strides = [1, 1]} : vector<14x32xf32> to vector<1x32xf32>
    %501 = arith.mulf %492, %485 : vector<1x32xf32>
    %502 = arith.addf %500, %501 : vector<1x32xf32>
    %503 = math.tanh %502 : vector<1x32xf32>
    %cst_169 = arith.constant 1.000000e+00 : f32
    %504 = vector.broadcast %cst_169 : f32 to vector<1x32xf32>
    %505 = arith.subf %504, %499 : vector<1x32xf32>
    %506 = arith.mulf %505, %503 : vector<1x32xf32>
    %507 = arith.mulf %499, %480 : vector<1x32xf32>
    %508 = arith.addf %506, %507 : vector<1x32xf32>
    %c12 = arith.constant 12 : index
    %c0_170 = arith.constant 0 : index
    %509 = vector.load %arg15[%c12, %c0_170] : memref<14x32xf32, #tpu.memory_space<vmem>>, vector<1x32xf32>
    tpu.vector_store %arg15[%c12, %c0_170], %508 {strides = array<i32>} : memref<14x32xf32, #tpu.memory_space<vmem>>, vector<1x32xf32>,
    %cst_171 = arith.constant dense<0.000000e+00> : vector<1x32xf32>
    %510 = tpu.matmul %508, %19, %cst_171 {dimension_numbers = #tpu.dot_dimension_numbers<[1], [0], [0], [1], [0, 0, 1, 1], [], []>} : vector<1x32xf32>, vector<32x32xf32>, vector<1x32xf32> -> vector<1x32xf32>
    %cst_172 = arith.constant dense<0.000000e+00> : vector<1x32xf32>
    %511 = tpu.matmul %508, %21, %cst_172 {dimension_numbers = #tpu.dot_dimension_numbers<[1], [0], [0], [1], [0, 0, 1, 1], [], []>} : vector<1x32xf32>, vector<32x32xf32>, vector<1x32xf32> -> vector<1x32xf32>
    %cst_173 = arith.constant dense<0.000000e+00> : vector<1x32xf32>
    %512 = tpu.matmul %508, %23, %cst_173 {dimension_numbers = #tpu.dot_dimension_numbers<[1], [0], [0], [1], [0, 0, 1, 1], [], []>} : vector<1x32xf32>, vector<32x32xf32>, vector<1x32xf32> -> vector<1x32xf32>
    %513 = arith.addf %512, %24 : vector<1x32xf32>
    %514 = vector.extract_strided_slice %138 {offsets = [13, 0], sizes = [1, 32], strides = [1, 1]} : vector<14x32xf32> to vector<1x32xf32>
    %515 = arith.addf %514, %510 : vector<1x32xf32>
    %516 = arith.negf %515 : vector<1x32xf32>
    %517 = math.exp %516 : vector<1x32xf32>
    %cst_174 = arith.constant 1.000000e+00 : f32
    %518 = vector.broadcast %cst_174 : f32 to vector<1x32xf32>
    %519 = arith.addf %518, %517 : vector<1x32xf32>
    %520 = arith.divf %518, %519 : vector<1x32xf32>
    %521 = vector.extract_strided_slice %141 {offsets = [13, 0], sizes = [1, 32], strides = [1, 1]} : vector<14x32xf32> to vector<1x32xf32>
    %522 = arith.addf %521, %511 : vector<1x32xf32>
    %523 = arith.negf %522 : vector<1x32xf32>
    %524 = math.exp %523 : vector<1x32xf32>
    %cst_175 = arith.constant 1.000000e+00 : f32
    %525 = vector.broadcast %cst_175 : f32 to vector<1x32xf32>
    %526 = arith.addf %525, %524 : vector<1x32xf32>
    %527 = arith.divf %525, %526 : vector<1x32xf32>
    %528 = vector.extract_strided_slice %144 {offsets = [13, 0], sizes = [1, 32], strides = [1, 1]} : vector<14x32xf32> to vector<1x32xf32>
    %529 = arith.mulf %520, %513 : vector<1x32xf32>
    %530 = arith.addf %528, %529 : vector<1x32xf32>
    %531 = math.tanh %530 : vector<1x32xf32>
    %cst_176 = arith.constant 1.000000e+00 : f32
    %532 = vector.broadcast %cst_176 : f32 to vector<1x32xf32>
    %533 = arith.subf %532, %527 : vector<1x32xf32>
    %534 = arith.mulf %533, %531 : vector<1x32xf32>
    %535 = arith.mulf %527, %508 : vector<1x32xf32>
    %536 = arith.addf %534, %535 : vector<1x32xf32>
    %c13 = arith.constant 13 : index
    %c0_177 = arith.constant 0 : index
    %537 = vector.load %arg15[%c13, %c0_177] : memref<14x32xf32, #tpu.memory_space<vmem>>, vector<1x32xf32>
    tpu.vector_store %arg15[%c13, %c0_177], %536 {strides = array<i32>} : memref<14x32xf32, #tpu.memory_space<vmem>>, vector<1x32xf32>,
    %c0_178 = arith.constant 0 : index
    %c0_179 = arith.constant 0 : index
    %538 = vector.load %arg15[%c0_178, %c0_179] : memref<14x32xf32, #tpu.memory_space<vmem>>, vector<14x32xf32>
    %cst_180 = arith.constant dense<0.000000e+00> : vector<14x16xf32>
    %539 = tpu.matmul %538, %25, %cst_180 {dimension_numbers = #tpu.dot_dimension_numbers<[1], [0], [0], [1], [0, 0, 1, 1], [], []>} : vector<14x32xf32>, vector<32x16xf32>, vector<14x16xf32> -> vector<14x16xf32>
    %540 = vector.broadcast %26 : vector<1x16xf32> to vector<14x16xf32>
    %541 = arith.addf %539, %540 : vector<14x16xf32>
    %c0_181 = arith.constant 0 : index
    %c0_182 = arith.constant 0 : index
    %c0_183 = arith.constant 0 : index
    %542 = vector.load %arg14[%c0_181, %c0_182, %c0_183] : memref<1x14x16xf32, #tpu.memory_space<vmem>>, vector<1x14x16xf32>
    %543 = vector.shape_cast %542 : vector<1x14x16xf32> to vector<14x16xf32>
    %544 = vector.shape_cast %541 : vector<14x16xf32> to vector<1x14x16xf32>
    tpu.vector_store %arg14[%c0_181, %c0_182, %c0_183], %544 {strides = array<i32>} : memref<1x14x16xf32, #tpu.memory_space<vmem>>, vector<1x14x16xf32>,
    return
  }
  func.func @transform_0(%arg0: i32) -> (i32, i32, i32) {
    %c0_i32 = arith.constant 0 : i32
    %c0_i32_0 = arith.constant 0 : i32
    %c0_i32_1 = arith.constant 0 : i32
    return %arg0, %c0_i32, %c0_i32_0 : i32, i32, i32
  }
  func.func @transform_1(%arg0: i32) -> (i32, i32, i32) {
    %c0_i32 = arith.constant 0 : i32
    %c0_i32_0 = arith.constant 0 : i32
    %c0_i32_1 = arith.constant 0 : i32
    %c0_i32_2 = arith.constant 0 : i32
    return %c0_i32, %c0_i32_0, %c0_i32_1 : i32, i32, i32
  }
  func.func @transform_2(%arg0: i32) -> (i32, i32) {
    %c0_i32 = arith.constant 0 : i32
    %c0_i32_0 = arith.constant 0 : i32
    %c0_i32_1 = arith.constant 0 : i32
    return %c0_i32, %c0_i32_0 : i32, i32
  }
  func.func @transform_3(%arg0: i32) -> (i32, i32, i32) {
    %c0_i32 = arith.constant 0 : i32
    %c0_i32_0 = arith.constant 0 : i32
    %c0_i32_1 = arith.constant 0 : i32
    %c0_i32_2 = arith.constant 0 : i32
    return %c0_i32, %c0_i32_0, %c0_i32_1 : i32, i32, i32
  }
  func.func @transform_4(%arg0: i32) -> (i32, i32) {
    %c0_i32 = arith.constant 0 : i32
    %c0_i32_0 = arith.constant 0 : i32
    %c0_i32_1 = arith.constant 0 : i32
    return %c0_i32, %c0_i32_0 : i32, i32
  }
  func.func @transform_5(%arg0: i32) -> (i32, i32, i32) {
    %c0_i32 = arith.constant 0 : i32
    %c0_i32_0 = arith.constant 0 : i32
    %c0_i32_1 = arith.constant 0 : i32
    %c0_i32_2 = arith.constant 0 : i32
    return %c0_i32, %c0_i32_0, %c0_i32_1 : i32, i32, i32
  }
  func.func @transform_6(%arg0: i32) -> (i32, i32) {
    %c0_i32 = arith.constant 0 : i32
    %c0_i32_0 = arith.constant 0 : i32
    %c0_i32_1 = arith.constant 0 : i32
    return %c0_i32, %c0_i32_0 : i32, i32
  }
  func.func @transform_7(%arg0: i32) -> (i32, i32, i32) {
    %c0_i32 = arith.constant 0 : i32
    %c0_i32_0 = arith.constant 0 : i32
    %c0_i32_1 = arith.constant 0 : i32
    %c0_i32_2 = arith.constant 0 : i32
    return %c0_i32, %c0_i32_0, %c0_i32_1 : i32, i32, i32
  }
  func.func @transform_8(%arg0: i32) -> (i32, i32, i32) {
    %c0_i32 = arith.constant 0 : i32
    %c0_i32_0 = arith.constant 0 : i32
    %c0_i32_1 = arith.constant 0 : i32
    %c0_i32_2 = arith.constant 0 : i32
    return %c0_i32, %c0_i32_0, %c0_i32_1 : i32, i32, i32
  }
  func.func @transform_9(%arg0: i32) -> (i32, i32, i32) {
    %c0_i32 = arith.constant 0 : i32
    %c0_i32_0 = arith.constant 0 : i32
    %c0_i32_1 = arith.constant 0 : i32
    %c0_i32_2 = arith.constant 0 : i32
    return %c0_i32, %c0_i32_0, %c0_i32_1 : i32, i32, i32
  }
  func.func @transform_10(%arg0: i32) -> (i32, i32) {
    %c0_i32 = arith.constant 0 : i32
    %c0_i32_0 = arith.constant 0 : i32
    %c0_i32_1 = arith.constant 0 : i32
    return %c0_i32, %c0_i32_0 : i32, i32
  }
  func.func @transform_11(%arg0: i32) -> (i32, i32) {
    %c0_i32 = arith.constant 0 : i32
    %c0_i32_0 = arith.constant 0 : i32
    %c0_i32_1 = arith.constant 0 : i32
    return %c0_i32, %c0_i32_0 : i32, i32
  }
  func.func @transform_12(%arg0: i32) -> (i32, i32) {
    %c0_i32 = arith.constant 0 : i32
    %c0_i32_0 = arith.constant 0 : i32
    %c0_i32_1 = arith.constant 0 : i32
    return %c0_i32, %c0_i32_0 : i32, i32
  }
  func.func @transform_13(%arg0: i32) -> (i32, i32, i32) {
    %c0_i32 = arith.constant 0 : i32
    %c0_i32_0 = arith.constant 0 : i32
    %c0_i32_1 = arith.constant 0 : i32
    return %arg0, %c0_i32, %c0_i32_0 : i32, i32, i32
  }
}

</mosaic_0001>

<bundles_post_ra>
// kernel: cpc_forward_inference.1
= control target key start
LH: loop header
LB: loop body
LE: loop exit
PB: predicated region body
PF: predicated region fallthrough
CT: control target
= control target key end

     0   :  { %s7957_s25 = smov 0   ;;  %s8833_s0 = inlined_call_operand.vmem [shape: f32[2,43,9], index: 0, kind: input, shape index: {}]   ;;  %s8834_s1 = inlined_call_operand.vmem [shape: f32[4,9,16], index: 1, kind: input, shape index: {}]   ;;  %s8835_s2 = inlined_call_operand.vmem [shape: f32[1,16], index: 2, kind: input, shape index: {}]   ;;  %s8836_s3 = inlined_call_operand.vmem [shape: f32[8,16,16], index: 3, kind: input, shape index: {}]   ;;  %s8837_s4 = inlined_call_operand.vmem [shape: f32[1,16], index: 4, kind: input, shape index: {}]   ;;  %s8838_s5 = inlined_call_operand.vmem [shape: f32[4,16,16], index: 5, kind: input, shape index: {}]   ;;  %s8839_s6 = inlined_call_operand.vmem [shape: f32[1,16], index: 6, kind: input, shape index: {}]   ;;  %s8840_s7 = inlined_call_operand.vmem [shape: f32[3,16,32], index: 7, kind: input, shape index: {}]   ;;  %s8841_s8 = inlined_call_operand.vmem [shape: f32[3,1,32], index: 8, kind: input, shape index: {}]   ;;  %s8842_s9 = inlined_call_operand.vmem [shape: f32[3,32,32], index: 9, kind: input, shape index: {}]   ;;  %s8843_s10 = inlined_call_operand.vmem [shape: f32[1,32], index: 10, kind: input, shape index: {}]   ;;  %s8844_s11 = inlined_call_operand.vmem [shape: f32[32,16], index: 11, kind: input, shape index: {}]   ;;  %s8845_s12 = inlined_call_operand.vmem [shape: f32[1,16], index: 12, kind: input, shape index: {}]   ;;  %s8846_s13 = inlined_call_operand.vmem [shape: f32[2,14,16], index: 13, kind: output, shape index: {}]  }
   0x1 LB: > { %s6138_s26 = sadd.s32 4294967295, %s7881_s25   ;;  %p6142_p0 = scmp.ge.s32.totalorder %s7881_s25, 1  ;;  %s7881_s25 = sphi %s7957_s25, %s23_s25  }
   0x2   : > { %p387_p1 = scmp.lt.s32.totalorder %s7881_s25, 3 }
   0x4   : > { %p388_p2 = pnand %p6142_p0, %p387_p1 }
   0x5   : > { %v443_v0 = vld [vmem:[%s8834_s1 + $0x10] sm:$0xff] (!%p388_p2)  ;;  %v444_v1 = vld [vmem:[%s8834_s1 + $0x18] sm:$0x1] (!%p388_p2)  ;;  %vm544_vm0 = vcmask (!%p388_p2), 1040384   ;;  %v7883_v2 = vmov (!%p388_p2), 0.0|0.0   ;;  %vm7884_vm1 = vmmov (!%p388_p2), 1  }
   0x6   : > { %391 = sbr.rel (%p388_p2) target bundleno = 4910 (0x132e), region = 72  ;;  %7375 = vmatprep.subr.bf16.mxu0 (!%p388_p2), %v7883_v2  ;;  %7379 = vmatprep.subr.bf16.mxu1 (!%p388_p2), %v7883_v2  ;;  %v7376_v3 = vpack.c.bf16 (!%p388_p2), %v444_v1, %v443_v0  ;;  %vm7973_vm2 = vmpackc.low (!%p388_p2), %vm544_vm0, %vm7884_vm1  ;;  %v441_v5 = vld [vmem:[%s8834_s1] sm:$0xff] (!%p388_p2)  ;;  %v442_v6 = vld [vmem:[%s8834_s1 + $0x8] sm:$0x1] (!%p388_p2)  ;;  %p431_p3 = scmp.lt.s32.totalorder (!%p388_p2), %s6138_s26, 1  ;;  %vm7885_vm3 = vmmov (!%p388_p2), 0  }
   0x7   : > { %v7380_v7 = vpack.c.bf16 (!%p388_p2), %v442_v6, %v441_v5  ;;  %v7886_v8 = vmov (!%p388_p2), 0.0   ;;  %v447_v9 = vld [vmem:[%s8834_s1 + $0x30] sm:$0xff] (!%p388_p2)  ;;  %v448_v10 = vld [vmem:[%s8834_s1 + $0x38] sm:$0x1] (!%p388_p2)  ;;  %vm533_vm4 = vcmask (!%p388_p2), 72704   ;;  %v445_v12 = vld [vmem:[%s8834_s1 + $0x20] sm:$0xff] (!%p388_p2) }
   0x8   : > { %6639 = vmatprep.mubr.msk.f32.mxu0 (!%p388_p2), %vm7885_vm3, %v7886_v8  ;;  %6658 = vmatprep.mubr.msk.f32.mxu1 (!%p388_p2), %vm7885_vm3, %v7886_v8  ;;  %v7388_v11 = vpack.c.bf16 (!%p388_p2), %v448_v10, %v447_v9  ;;  %v446_v13 = vld [vmem:[%s8834_s1 + $0x28] sm:$0x1] (!%p388_p2)  ;;  %vm521_vm5 = vcmask (!%p388_p2), 1046528   ;;  %vm861_vm6 = vcmask (!%p388_p2), 1044480   ;;  %vm741_vm7 = vcmask (!%p388_p2), 1045504  }
   0x9   : > { %7378 = vmatpush3.bf16.msk.msra.mxu0 (!%p388_p2), %vm7973_vm2, %v7376_v3  ;;  %7382 = vmatpush3.bf16.msk.msra.mxu1 (!%p388_p2), %vm7973_vm2, %v7380_v7  ;;  %v7384_v21 = vpack.c.bf16 (!%p388_p2), %v446_v13, %v445_v12  ;;  %vm1021_vm10 = vcmask (!%p388_p2), 326656   ;;  %vm1200_vm15 = vcmask (!%p388_p2), 130048   ;;  %vm2548_vm0 = vcmask (!%p388_p2), 261120  }
   0xa   : > { %7383 = vmatprep.subr.bf16.mxu0 (!%p388_p2), %v7883_v2  ;;  %7387 = vmatprep.subr.bf16.mxu1 (!%p388_p2), %v7883_v2  ;;  %vm2783_vm1 = vcmask (!%p388_p2), 253952  }
   0xd   : > { %s8850_s26 = smov (!%p431_p3, %s6138_s26), 1 }
   0xe   : > { %s7721_s22 = smul.u32 48, %s8850_s26  ;;  %s6306_s18 = sshll.u32 %s8850_s26, 4 }
   0xf   : > { %s440_s23 = scalar_lea.vmem %s8846_s13, %s6306_s18 }
  0x10   : > { %s8005_s27 = scalar_lea.vmem %s8833_s0, %s7721_s22 }
  0x11   : > { %v509_v14 = vld [vmem:[%s8005_s27] sm:$0xff]  ;;  %v510_v15 = vld [vmem:[%s8005_s27 + $0x8] sm:$0xff]  ;;  %v8016_v16 = vld [vmem:[%s8005_s27 + $0x10] sm:$0xff] }
  0x12   : > { %v522_v17 = vrot.slane %v509_v14, 1  ;;  %v523_v18 = vrot.slane %v510_v15, 1  ;;  %6659 = vmatmul.mubr.msk.f32.vlgmr.msra.gmra.mrb[0].mxu1 %vm533_vm4, %v509_v14  ;;  %v525_v19 = vrot.slane %v8016_v16, 1  ;;  %v8023_v20 = vld [vmem:[%s8005_s27 + $0x18] sm:$0xff]  ;;  %v8040_v25 = vld [vmem:[%s8005_s27 + $0x20] sm:$0xff]  ;;  %v862_v31 = vrot.slane %v509_v14, 3 }
  0x13   : > { %6661 = vmatprep.mubr.msk.f32.mxu1 %vm7885_vm3, %v7886_v8  ;;  %7390 = vmatpush3.bf16.msk.msra.mxu1 %vm7973_vm2, %v7388_v11  ;;  %v527_v24 = vrot.slane %v8023_v20, 1  ;;  %v529_v27 = vrot.slane %v8040_v25, 1  ;;  %v514_v28 = vld [vmem:[%s8005_s27 + $0x28] sm:$0x7]  ;;  %v863_v32 = vrot.slane %v510_v15, 3  ;;  %v742_v34 = vrot.slane %v509_v14, 2 }
  0x14   : > { %v524_v22 = vsel %vm521_vm5, %v522_v17, %v523_v18  ;;  %7397 = vmatprep.subr.bf16.mxu1 %v7883_v2  ;;  %v526_v23 = vsel %vm521_vm5, %v523_v18, %v525_v19  ;;  %v531_v30 = vrot.slane %v514_v28, 1  ;;  %v743_v35 = vrot.slane %v510_v15, 2 }
  0x15   : > { %6640 = vmatmul.mubr.msk.f32.vlgmr.msra.gmra.mrb[0].mxu0 %vm533_vm4, %v524_v22  ;;  %v528_v26 = vsel %vm521_vm5, %v525_v19, %v527_v24  ;;  %v530_v29 = vsel %vm521_vm5, %v527_v24, %v529_v27  ;;  %v864_v36 = vsel %vm861_vm6, %v862_v31, %v863_v32  ;;  %v865_v37 = vrot.slane %v8016_v16, 3 }
  0x16   : > { %6642 = vmatprep.mubr.msk.f32.mxu0 %vm7885_vm3, %v7886_v8  ;;  %6662 = vmatmul.mubr.msk.f32.gmra.mrb[2].mxu1 %vm533_vm4, %v510_v15  ;;  %v532_v33 = vsel %vm521_vm5, %v529_v27, %v531_v30  ;;  %v744_v38 = vsel %vm741_vm7, %v742_v34, %v743_v35  ;;  %v745_v39 = vrot.slane %v8016_v16, 2  ;;  %v867_v41 = vrot.slane %v8023_v20, 3 }
  0x17   : > { %6664 = vmatprep.mubr.msk.f32.mxu1 %vm7885_vm3, %v7886_v8  ;;  %7386 = vmatpush3.bf16.msk.msra.mxu0 %vm7973_vm2, %v7384_v21  ;;  %v866_v40 = vsel %vm861_vm6, %v863_v32, %v865_v37  ;;  %v747_v43 = vrot.slane %v8023_v20, 2  ;;  %v869_v45 = vrot.slane %v8040_v25, 3  ;;  %v749_v47 = vrot.slane %v8040_v25, 2 }
  0x18   : > { %7391 = vmatprep.subr.bf16.mxu0 %v7883_v2  ;;  %v746_v42 = vsel %vm741_vm7, %v743_v35, %v745_v39  ;;  %v868_v44 = vsel %vm861_vm6, %v865_v37, %v867_v41  ;;  %v871_v49 = vrot.slane %v514_v28, 3  ;;  %v751_v51 = vrot.slane %v514_v28, 2 }
  0x19   : > { %6643 = vmatmul.mubr.msk.f32.gmra.mrb[2].mxu0 %vm533_vm4, %v526_v23  ;;  %v748_v46 = vsel %vm741_vm7, %v745_v39, %v747_v43  ;;  %v870_v48 = vsel %vm861_vm6, %v867_v41, %v869_v45  ;;  %v750_v50 = vsel %vm741_vm7, %v747_v43, %v749_v47  ;;  %v997_v31 = vlaneseq }
  0x1a   : > { %6645 = vmatprep.mubr.msk.f32.mxu0 %vm7885_vm3, %v7886_v8  ;;  %6665 = vmatmul.mubr.msk.f32.gmra.mrb[4].mxu1 %vm533_vm4, %v8016_v16  ;;  %v872_v52 = vsel %vm861_vm6, %v869_v45, %v871_v49  ;;  %v752_v53 = vsel %vm741_vm7, %v749_v47, %v751_v51  ;;  %vm3030_vm2 = vcmask 254977  }
  0x1b   : > { %6667 = vmatprep.mubr.msk.f32.mxu1 %vm7885_vm3, %v7886_v8 }
  0x1d   : > { %6646 = vmatmul.mubr.msk.f32.gmra.mrb[4].mxu0 %vm533_vm4, %v528_v26 }
  0x1e   : > { %6648 = vmatprep.mubr.msk.f32.mxu0 %vm7885_vm3, %v7886_v8  ;;  %6668 = vmatmul.mubr.msk.f32.gmra.mrb[6].mxu1 %vm533_vm4, %v8023_v20 }
  0x1f   : > { %6670 = vmatprep.mubr.msk.f32.mxu1 %vm7885_vm3, %v7886_v8 }
  0x21   : > { %6649 = vmatmul.mubr.msk.f32.gmra.mrb[6].mxu0 %vm533_vm4, %v530_v29 }
  0x22   : > { %6651 = vmatprep.mubr.msk.f32.mxu0 %vm7885_vm3, %v7886_v8  ;;  %6671 = vmatmul.mubr.msk.f32.gmra.mrb[8].mxu1 %vm533_vm4, %v8040_v25  ;;  %v6184_v25 = vld [vmem:[%s8835_s2] ss:$0 sm:$0xff] }
  0x23   : > { %6696 = vmatprep.mubr.msk.f32.mxu1 %vm7885_vm3, %v7886_v8 }
  0x25   : > { %6652 = vmatmul.mubr.msk.f32.gmra.mrb[8].mxu0 %vm533_vm4, %v532_v33 }
  0x26   : > { %6677 = vmatprep.mubr.msk.f32.mxu0 %vm7885_vm3, %v7886_v8  ;;  %6697 = vmatmul.mubr.msk.f32.vlgmr.msra.gmra.mrb[10].mxu1 %vm533_vm4, %v864_v36 }
  0x27   : > { %6699 = vmatprep.mubr.msk.f32.mxu1 %vm7885_vm3, %v7886_v8 }
  0x29   : > { %6678 = vmatmul.mubr.msk.f32.vlgmr.msra.gmra.mrb[10].mxu0 %vm533_vm4, %v744_v38 }
  0x2a   : > { %6680 = vmatprep.mubr.msk.f32.mxu0 %vm7885_vm3, %v7886_v8  ;;  %6700 = vmatmul.mubr.msk.f32.gmra.mrb[12].mxu1 %vm533_vm4, %v866_v40  ;;  %v998_v40 = vshrl.u32 %v997_v31, 7 }
  0x2b   : > { %6702 = vmatprep.mubr.msk.f32.mxu1 %vm7885_vm3, %v7886_v8 }
  0x2c   : > { %v999_v51 = vadd.s32 8, %v998_v40 }
  0x2d   : > { %6681 = vmatmul.mubr.msk.f32.gmra.mrb[12].mxu0 %vm533_vm4, %v746_v42 }
  0x2e   : > { %6683 = vmatprep.mubr.msk.f32.mxu0 %vm7885_vm3, %v7886_v8  ;;  %6703 = vmatmul.mubr.msk.f32.gmra.mrb[14].mxu1 %vm533_vm4, %v868_v44 }
  0x2f   : > { %6705 = vmatprep.mubr.msk.f32.mxu1 %vm7885_vm3, %v7886_v8 }
  0x31   : > { %6684 = vmatmul.mubr.msk.f32.gmra.mrb[14].mxu0 %vm533_vm4, %v748_v46 }
  0x32   : > { %6686 = vmatprep.mubr.msk.f32.mxu0 %vm7885_vm3, %v7886_v8  ;;  %6706 = vmatmul.mubr.msk.f32.gmra.mrb[16].mxu1 %vm533_vm4, %v870_v48 }
  0x33   : > { %6708 = vmatprep.mubr.msk.f32.mxu1 %vm7885_vm3, %v7886_v8 }
  0x35   : > { %6687 = vmatmul.mubr.msk.f32.gmra.mrb[16].mxu0 %vm533_vm4, %v750_v50  ;;  %v1003_v50 = vmul.u32 2, %v998_v40 }
  0x36   : > { %6689 = vmatprep.mubr.msk.f32.mxu0 %vm7885_vm3, %v7886_v8  ;;  %6709 = vmatmul.mubr.msk.f32.gmra.mrb[18].mxu1 %vm533_vm4, %v872_v52 }
  0x37   : > { %6740 = vmatprep.mubr.msk.f32.mxu1 %vm7885_vm3, %v7886_v8 }
  0x39   : > { %6690 = vmatmul.mubr.msk.f32.gmra.mrb[18].mxu0 %vm533_vm4, %v752_v53  ;;  %vm3278_vm4 = vcmask 256002  }
  0x3a   : > { %6721 = vmatprep.mubr.msk.f32.mxu0 %vm7885_vm3, %v7886_v8 }
  0xe5   : > { %v717_v54 = vpop.f32.mrb[0].mxu1 }
  0xe6   : > { %v6660_v55 = vpop.f32.mrb[1].mxu1 }
  0xe8   : > { %v614_v56 = vpop.f32.mrb[0].mxu0 }
  0xe9   : > { %v718_v57 = vadd.f32 %v717_v54, %v614_v56  ;;  %v6641_v58 = vpop.f32.mrb[1].mxu0  ;;  %v722_v59 = vpop.f32.mrb[2].mxu1 }
  0xea   : > { %v6663_v60 = vpop.f32.mrb[3].mxu1  ;;  %v1002_v58 = vand.u32 127, %v997_v31 }
  0xeb   : > { %v1004_v60 = vmul.u32 2, %v999_v51  ;;  %v460_v51 = vld [vmem:[%s8836_s3 + $0x50] sm:$0xff] }
  0xec   : > { %v619_v61 = vpop.f32.mrb[2].mxu0  ;;  %vm1006_vm8 = vcmp.eq.s32.totalorder %v1002_v58, %v1003_v50 }
  0xed   : > { %v723_v62 = vadd.f32 %v722_v59, %v619_v61  ;;  %v6644_v63 = vpop.f32.mrb[3].mxu0  ;;  %v727_v0 = vpop.f32.mrb[4].mxu1  ;;  %v1012_v59 = vadd.s32 1, %v1003_v50  ;;  %v1000_v61 = vadd.s32 16, %v998_v40  ;;  %vm1007_vm11 = vcmp.eq.s32.totalorder %v1002_v58, %v1004_v60  ;;  %v459_v50 = vld [vmem:[%s8836_s3 + $0x48] sm:$0xff] }
  0xee   : > { %v6666_v1 = vpop.f32.mrb[5].mxu1 }
  0xef   : > { %vm1015_vm9 = vcmp.eq.s32.totalorder %v1002_v58, %v1012_v59 }
  0xf0   : > { %v624_v3 = vpop.f32.mrb[4].mxu0 }
  0xf1   : > { %v728_v4 = vadd.f32 %v727_v0, %v624_v3  ;;  %v6647_v5 = vpop.f32.mrb[5].mxu0  ;;  %v732_v6 = vpop.f32.mrb[6].mxu1 }
  0xf2   : > { %v6669_v7 = vpop.f32.mrb[7].mxu1  ;;  %v1005_v5 = vmul.u32 2, %v1000_v61 }
  0xf3   : > { %v453_v7 = vld [vmem:[%s8836_s3 + $0x18] sm:$0xff] }
  0xf4   : > { %v629_v9 = vpop.f32.mrb[6].mxu0  ;;  %vm1008_vm13 = vcmp.eq.s32.totalorder %v1002_v58, %v1005_v5 }
  0xf5   : > { %v733_v10 = vadd.f32 %v732_v6, %v629_v9  ;;  %v6650_v11 = vpop.f32.mrb[7].mxu0  ;;  %v737_v12 = vpop.f32.mrb[8].mxu1  ;;  %v452_v6 = vld [vmem:[%s8836_s3 + $0x10] sm:$0xff]  ;;  %v450_v9 = vld [vmem:[%s8836_s3] sm:$0xff] }
  0xf6   : > { %v6672_v13 = vpop.f32.mrb[9].mxu1 }
  0xf7   : > { %v1018_v13 = vsel %vm1015_vm9, 1.0, %v7886_v8  ;;  %vm4518_vm9 = vcmask 261127  }
  0xf8   : > { %v634_v14 = vpop.f32.mrb[8].mxu0 }
  0xf9   : > { %v738_v15 = vadd.f32 %v737_v12, %v634_v14  ;;  %v6653_v16 = vpop.f32.mrb[9].mxu0  ;;  %v952_v17 = vpop.f32.mrb[10].mxu1  ;;  %v1009_v12 = vsel %vm1006_vm8, 1.0, %v7886_v8  ;;  %v1014_v14 = vadd.s32 1, %v1005_v5  ;;  %vm4270_vm8 = vcmask 260102  }
  0xfa   : > { %v6698_v18 = vpop.f32.mrb[11].mxu1 }
  0xfb   : > { %vm1017_vm14 = vcmp.eq.s32.totalorder %v1002_v58, %v1014_v14  ;;  %v463_v14 = vld [vmem:[%s8836_s3 + $0x68] sm:$0xff] }
  0xfc   : > { %v832_v19 = vpop.f32.mrb[10].mxu0 }
  0xfd   : > { %v856_v20 = vadd.f32 %v832_v19, %v718_v57  ;;  %v6679_v21 = vpop.f32.mrb[11].mxu0  ;;  %v957_v22 = vpop.f32.mrb[12].mxu1  ;;  %v1011_v19 = vsel %vm1008_vm13, 1.0, %v7886_v8 }
  0xfe   : > { %v6701_v23 = vpop.f32.mrb[13].mxu1  ;;  %v454_v21 = vld [vmem:[%s8836_s3 + $0x20] sm:$0xff] }
  0xff   : > { %v976_v24 = vadd.f32 %v952_v17, %v856_v20  ;;  %v1010_v17 = vsel %vm1007_vm11, 1.0, %v7886_v8  ;;  %v1020_v20 = vsel %vm1017_vm14, 1.0, %v7886_v8  ;;  %v456_v23 = vld [vmem:[%s8836_s3 + $0x30] sm:$0xff] }
 0x100   : > { %v837_v26 = vpop.f32.mrb[12].mxu0 }
 0x101   : > { %v857_v27 = vadd.f32 %v837_v26, %v723_v62  ;;  %v6682_v28 = vpop.f32.mrb[13].mxu0  ;;  %v962_v29 = vpop.f32.mrb[14].mxu1  ;;  %v987_v32 = vadd.f32 %v6184_v25, %v976_v24  ;;  %v457_v24 = vld [vmem:[%s8836_s3 + $0x38] sm:$0xff] }
 0x102   : > { %v6704_v30 = vpop.f32.mrb[15].mxu1  ;;  %v7413_v26 = vpack.c.bf16 %v457_v24, %v456_v23  ;;  %v468_v23 = vld [vmem:[%s8838_s5 + $0x8] sm:$0xff] }
 0x103   : > { %v977_v33 = vadd.f32 %v957_v22, %v857_v27  ;;  %v992_v41 = vmax.f32 %v987_v32, 0.0  ;;  %v455_v22 = vld [vmem:[%s8836_s3 + $0x28] sm:$0xff] }
 0x104   : > { %v842_v34 = vpop.f32.mrb[14].mxu0 }
 0x105   : > { %v988_v35 = vadd.f32 %v6184_v25, %v977_v33  ;;  %v858_v36 = vadd.f32 %v842_v34, %v728_v4  ;;  %v6685_v37 = vpop.f32.mrb[15].mxu0  ;;  %v967_v38 = vpop.f32.mrb[16].mxu1  ;;  %v1013_v4 = vadd.s32 1, %v1004_v60 }
 0x106   : > { %v6707_v39 = vpop.f32.mrb[17].mxu1 }
 0x107   : > { %v993_v42 = vmax.f32 %v988_v35, 0.0  ;;  %v978_v43 = vadd.f32 %v962_v29, %v858_v36  ;;  %vm1016_vm12 = vcmp.eq.s32.totalorder %v1002_v58, %v1013_v4 }
 0x108   : > { %v847_v44 = vpop.f32.mrb[16].mxu0  ;;  %v1019_v18 = vsel %vm1016_vm12, 1.0, %v7886_v8 }
 0x109   : > { %v7392_v45 = vpack.c.bf16 %v993_v42, %v992_v41  ;;  %v859_v46 = vadd.f32 %v847_v44, %v733_v10  ;;  %v6688_v47 = vpop.f32.mrb[17].mxu0  ;;  %v972_v48 = vpop.f32.mrb[18].mxu1  ;;  %v989_v52 = vadd.f32 %v6184_v25, %v978_v43  ;;  %v451_v10 = vld [vmem:[%s8836_s3 + $0x8] sm:$0xff] }
 0x10a   : > { %v6710_v49 = vpop.f32.mrb[19].mxu1  ;;  %v7407_v16 = vpack.c.bf16 %v451_v10, %v450_v9  ;;  %v458_v47 = vld [vmem:[%s8836_s3 + $0x40] sm:$0xff] }
 0x10b   : > { %v979_v53 = vadd.f32 %v967_v38, %v859_v46  ;;  %7393 = vmatpush3.bf16.msra.mxu0 %v7392_v45  ;;  %7399 = vmatpush3.bf16.msra.mxu1 %v7392_v45  ;;  %v994_v62 = vmax.f32 %v989_v52, 0.0  ;;  %v461_v52 = vld [vmem:[%s8836_s3 + $0x58] sm:$0xff]  ;;  %v7416_v4 = vpack.c.bf16 %v459_v50, %v458_v47 }
 0x10c   : > { %v852_v54 = vpop.f32.mrb[18].mxu0  ;;  %7394 = vmatprep.subr.bf16.mxu0 %v7883_v2  ;;  %7400 = vmatprep.subr.bf16.mxu1 %v7883_v2  ;;  %v7419_v5 = vpack.c.bf16 %v461_v52, %v460_v51 }
 0x10d   : > { %v990_v55 = vadd.f32 %v6184_v25, %v979_v53  ;;  %v860_v56 = vadd.f32 %v852_v54, %v738_v15  ;;  %v6691_v57 = vpop.f32.mrb[19].mxu0  ;;  %v7404_v15 = vpack.c.bf16 %v453_v7, %v452_v6 }
 0x10f   : > { %v995_v63 = vmax.f32 %v990_v55, 0.0  ;;  %v980_v0 = vadd.f32 %v972_v48, %v860_v56 }
 0x111   : > { %v7395_v1 = vpack.c.bf16 %v995_v63, %v994_v62  ;;  %v991_v3 = vadd.f32 %v6184_v25, %v980_v0  ;;  %v7410_v25 = vpack.c.bf16 %v455_v22, %v454_v21  ;;  %v467_v22 = vld [vmem:[%s8838_s5] sm:$0xff] }
 0x112   : > { %v8309_v24 = vpack.c.bf16 %v468_v23, %v467_v22 }
 0x113   : > { %7396 = vmatpush3.bf16.msra.mxu0 %v7395_v1  ;;  %7402 = vmatpush3.bf16.msra.mxu1 %v7395_v1  ;;  %v996_v11 = vmax.f32 %v991_v3, 0.0 }
 0x114   : > { %6719 = vmatprep.subr.mxu0 %v7886_v8  ;;  %6738 = vmatprep.subr.mxu1 %v7886_v8 }
 0x117   : > { %6720 = vmatpush3.msra.mxu0 %v996_v11  ;;  %6739 = vmatpush3.msra.mxu1 %v996_v11 }
 0x118   : > { %6722 = vmatmul.mubr.msk.f32.vlgmr.msra.gmra.mrb[20].mxu0 %vm1021_vm10, %v1009_v12  ;;  %6741 = vmatmul.mubr.msk.f32.vlgmr.msra.gmra.mrb[20].mxu1 %vm1021_vm10, %v1018_v13  ;;  %v462_v13 = vld [vmem:[%s8836_s3 + $0x60] sm:$0xff] }
 0x119   : > { %6724 = vmatprep.mubr.msk.f32.mxu0 %vm7885_vm3, %v7886_v8  ;;  %6743 = vmatprep.mubr.msk.f32.mxu1 %vm7885_vm3, %v7886_v8 }
 0x11a   : > { %7403 = vmatprep.subr.bf16.mxu0 %v7883_v2  ;;  %7406 = vmatprep.subr.bf16.mxu1 %v7883_v2 }
 0x11b   : > { %7405 = vmatpush3.bf16.msra.mxu0 %v7404_v15  ;;  %7408 = vmatpush3.bf16.msra.mxu1 %v7407_v16  ;;  %v464_v15 = vld [vmem:[%s8836_s3 + $0x70] sm:$0xff]  ;;  %v465_v16 = vld [vmem:[%s8836_s3 + $0x78] sm:$0xff] }
 0x11c   : > { %6725 = vmatmul.mubr.msk.f32.gmra.mrb[22].mxu0 %vm1021_vm10, %v1010_v17  ;;  %6744 = vmatmul.mubr.msk.f32.gmra.mrb[22].mxu1 %vm1021_vm10, %v1019_v18  ;;  %v7422_v17 = vpack.c.bf16 %v463_v14, %v462_v13  ;;  %v7425_v18 = vpack.c.bf16 %v465_v16, %v464_v15 }
 0x11d   : > { %6727 = vmatprep.mubr.msk.f32.mxu0 %vm7885_vm3, %v7886_v8  ;;  %6746 = vmatprep.mubr.msk.f32.mxu1 %vm7885_vm3, %v7886_v8 }
 0x11e   : > { %7409 = vmatprep.subr.bf16.mxu0 %v7883_v2  ;;  %7412 = vmatprep.subr.bf16.mxu1 %v7883_v2 }
 0x120   : > { %6728 = vmatmul.mubr.msk.f32.gmra.mrb[24].mxu0 %vm1021_vm10, %v1011_v19  ;;  %6747 = vmatmul.mubr.msk.f32.gmra.mrb[24].mxu1 %vm1021_vm10, %v1020_v20  ;;  %v469_v19 = vld [vmem:[%s8838_s5 + $0x10] sm:$0xff]  ;;  %v470_v20 = vld [vmem:[%s8838_s5 + $0x18] sm:$0xff] }
 0x121   : > { %6753 = vmatprep.mubr.msk.f32.mxu0 %vm7885_vm3, %v7886_v8  ;;  %6766 = vmatprep.mubr.msk.f32.mxu1 %vm7885_vm3, %v7886_v8  ;;  %v7427_v21 = vpack.c.bf16 %v470_v20, %v469_v19  ;;  %v6215_v19 = vld [vmem:[%s8837_s4] ss:$0 sm:$0xff] }
 0x1eb   : > { %v1097_v27 = vpop.f32.mrb[20].mxu0  ;;  %v1186_v28 = vpop.f32.mrb[20].mxu1 }
 0x1ec   : > { %6754 = vmatmul.mubr.msk.f32.vlgmr.msra.gmra.mrb[26].mxu0 %vm1200_vm15, %v1186_v28  ;;  %6767 = vmatmul.mubr.msk.f32.vlgmr.msra.gmra.mrb[26].mxu1 %vm1200_vm15, %v1097_v27  ;;  %v6723_v29 = vpop.f32.mrb[21].mxu0  ;;  %v6742_v30 = vpop.f32.mrb[21].mxu1  ;;  %v1379_v31 = vrot.slane %v1097_v27, 1  ;;  %v1567_v32 = vrot.slane %v1097_v27, 2  ;;  %v1755_v33 = vrot.slane %v1097_v27, 3  ;;  %v1473_v34 = vrot.slane %v1186_v28, 1 }
 0x1ed   : > { %6756 = vmatprep.mubr.msk.f32.mxu0 %vm7885_vm3, %v7886_v8  ;;  %6769 = vmatprep.mubr.msk.f32.mxu1 %vm7885_vm3, %v7886_v8  ;;  %v1661_v43 = vrot.slane %v1186_v28, 2  ;;  %v1849_v44 = vrot.slane %v1186_v28, 3 }
 0x1ee   : > { %7411 = vmatpush3.bf16.msra.mxu0 %v7410_v25  ;;  %7414 = vmatpush3.bf16.msra.mxu1 %v7413_v26 }
 0x1ef   : > { %v1102_v35 = vpop.f32.mrb[22].mxu0  ;;  %v1191_v36 = vpop.f32.mrb[22].mxu1  ;;  %7415 = vmatprep.subr.bf16.mxu0 %v7883_v2  ;;  %7418 = vmatprep.subr.bf16.mxu1 %v7883_v2 }
 0x1f0   : > { %v1380_v37 = vrot.slane %v1102_v35, 1  ;;  %v1568_v38 = vrot.slane %v1102_v35, 2  ;;  %v1756_v39 = vrot.slane %v1102_v35, 3  ;;  %v1474_v40 = vrot.slane %v1191_v36, 1  ;;  %6757 = vmatmul.mubr.msk.f32.gmra.mrb[28].mxu0 %vm1200_vm15, %v1191_v36  ;;  %6770 = vmatmul.mubr.msk.f32.gmra.mrb[28].mxu1 %vm1200_vm15, %v1102_v35  ;;  %v6726_v41 = vpop.f32.mrb[23].mxu0  ;;  %v6745_v42 = vpop.f32.mrb[23].mxu1 }
 0x1f1   : > { %v1662_v45 = vrot.slane %v1191_v36, 2  ;;  %v1850_v46 = vrot.slane %v1191_v36, 3  ;;  %6759 = vmatprep.mubr.msk.f32.mxu0 %vm7885_vm3, %v7886_v8  ;;  %6772 = vmatprep.mubr.msk.f32.mxu1 %vm7885_vm3, %v7886_v8 }
 0x1f2   : > { %v1381_v48 = vsel %vm521_vm5, %v1379_v31, %v1380_v37  ;;  %v1475_v49 = vsel %vm521_vm5, %v1473_v34, %v1474_v40  ;;  %v1569_v53 = vsel %vm741_vm7, %v1567_v32, %v1568_v38  ;;  %v1757_v54 = vsel %vm861_vm6, %v1755_v33, %v1756_v39 }
 0x1f3   : > { %v8207_v55 = vpop.f32.mrb[24].mxu0  ;;  %v8209_v56 = vpop.f32.mrb[24].mxu1  ;;  %v1663_v57 = vsel %vm741_vm7, %v1661_v43, %v1662_v45  ;;  %v1851_v58 = vsel %vm861_vm6, %v1849_v44, %v1850_v46 }
 0x1f4   : > { %v1382_v59 = vrot.slane %v8207_v55, 1  ;;  %v1570_v60 = vrot.slane %v8207_v55, 2  ;;  %v1758_v61 = vrot.slane %v8207_v55, 3  ;;  %v1476_v62 = vrot.slane %v8209_v56, 1  ;;  %6760 = vmatmul.mubr.msk.f32.gmra.mrb[30].mxu0 %vm1200_vm15, %v8209_v56  ;;  %6773 = vmatmul.mubr.msk.f32.gmra.mrb[30].mxu1 %vm1200_vm15, %v8207_v55  ;;  %v6748_v63 = vpop.f32.mrb[25].mxu1  ;;  %v6729_v0 = vpop.f32.mrb[25].mxu0 }
 0x1f5   : > { %v1664_v1 = vrot.slane %v8209_v56, 2  ;;  %v1852_v3 = vrot.slane %v8209_v56, 3  ;;  %6779 = vmatprep.mubr.msk.f32.mxu0 %vm7885_vm3, %v7886_v8  ;;  %6792 = vmatprep.mubr.msk.f32.mxu1 %vm7885_vm3, %v7886_v8 }
 0x1f6   : > { %v1383_v6 = vsel %vm521_vm5, %v1380_v37, %v1382_v59  ;;  %v1477_v7 = vsel %vm521_vm5, %v1474_v40, %v1476_v62  ;;  %v1571_v9 = vsel %vm741_vm7, %v1568_v38, %v1570_v60  ;;  %v1759_v10 = vsel %vm861_vm6, %v1756_v39, %v1758_v61 }
 0x1f7   : > { %v1665_v11 = vsel %vm741_vm7, %v1662_v45, %v1664_v1  ;;  %v1853_v12 = vsel %vm861_vm6, %v1850_v46, %v1852_v3 }
 0x1f8   : > { %6780 = vmatmul.mubr.msk.f32.vlgmr.msra.gmra.mrb[32].mxu0 %vm1200_vm15, %v1381_v48  ;;  %6793 = vmatmul.mubr.msk.f32.vlgmr.msra.gmra.mrb[32].mxu1 %vm1200_vm15, %v1475_v49 }
 0x1f9   : > { %6782 = vmatprep.mubr.msk.f32.mxu0 %vm7885_vm3, %v7886_v8  ;;  %6795 = vmatprep.mubr.msk.f32.mxu1 %vm7885_vm3, %v7886_v8 }
 0x1fa   : > { %7417 = vmatpush3.bf16.msra.mxu0 %v7416_v4  ;;  %7420 = vmatpush3.bf16.msra.mxu1 %v7419_v5 }
 0x1fb   : > { %7421 = vmatprep.subr.bf16.mxu0 %v7883_v2  ;;  %7424 = vmatprep.subr.bf16.mxu1 %v7883_v2 }
 0x1fc   : > { %6783 = vmatmul.mubr.msk.f32.gmra.mrb[34].mxu0 %vm1200_vm15, %v1383_v6  ;;  %6796 = vmatmul.mubr.msk.f32.gmra.mrb[34].mxu1 %vm1200_vm15, %v1477_v7 }
 0x1fd   : > { %6785 = vmatprep.mubr.msk.f32.mxu0 %vm7885_vm3, %v7886_v8  ;;  %6798 = vmatprep.mubr.msk.f32.mxu1 %vm7885_vm3, %v7886_v8 }
 0x200   : > { %6786 = vmatmul.mubr.msk.f32.gmra.mrb[36].mxu0 %vm1200_vm15, %v1382_v59  ;;  %6799 = vmatmul.mubr.msk.f32.gmra.mrb[36].mxu1 %vm1200_vm15, %v1476_v62 }
 0x201   : > { %6805 = vmatprep.mubr.msk.f32.mxu0 %vm7885_vm3, %v7886_v8  ;;  %6818 = vmatprep.mubr.msk.f32.mxu1 %vm7885_vm3, %v7886_v8 }
 0x204   : > { %6806 = vmatmul.mubr.msk.f32.vlgmr.msra.gmra.mrb[38].mxu0 %vm1200_vm15, %v1569_v53  ;;  %6819 = vmatmul.mubr.msk.f32.vlgmr.msra.gmra.mrb[38].mxu1 %vm1200_vm15, %v1663_v57 }
 0x205   : > { %6808 = vmatprep.mubr.msk.f32.mxu0 %vm7885_vm3, %v7886_v8  ;;  %6821 = vmatprep.mubr.msk.f32.mxu1 %vm7885_vm3, %v7886_v8 }
 0x206   : > { %7423 = vmatpush3.bf16.msra.mxu0 %v7422_v17  ;;  %7426 = vmatpush3.bf16.msra.mxu1 %v7425_v18 }
 0x207   : > { %7428 = vmatprep.subr.bf16.mxu0 %v7427_v21 }
 0x208   : > { %6809 = vmatmul.mubr.msk.f32.gmra.mrb[40].mxu0 %vm1200_vm15, %v1571_v9  ;;  %6822 = vmatmul.mubr.msk.f32.gmra.mrb[40].mxu1 %vm1200_vm15, %v1665_v11 }
 0x209   : > { %6811 = vmatprep.mubr.msk.f32.mxu0 %vm7885_vm3, %v7886_v8  ;;  %6824 = vmatprep.mubr.msk.f32.mxu1 %vm7885_vm3, %v7886_v8 }
 0x20c   : > { %6812 = vmatmul.mubr.msk.f32.gmra.mrb[42].mxu0 %vm1200_vm15, %v1570_v60  ;;  %6825 = vmatmul.mubr.msk.f32.gmra.mrb[42].mxu1 %vm1200_vm15, %v1664_v1 }
 0x20d   : > { %6831 = vmatprep.mubr.msk.f32.mxu0 %vm7885_vm3, %v7886_v8  ;;  %6844 = vmatprep.mubr.msk.f32.mxu1 %vm7885_vm3, %v7886_v8 }
 0x210   : > { %6832 = vmatmul.mubr.msk.f32.vlgmr.msra.gmra.mrb[44].mxu0 %vm1200_vm15, %v1757_v54  ;;  %6845 = vmatmul.mubr.msk.f32.vlgmr.msra.gmra.mrb[44].mxu1 %vm1200_vm15, %v1851_v58 }
 0x211   : > { %6834 = vmatprep.mubr.msk.f32.mxu0 %vm7885_vm3, %v7886_v8  ;;  %6847 = vmatprep.mubr.msk.f32.mxu1 %vm7885_vm3, %v7886_v8 }
 0x212   : > { %7430 = vmatpush3.bf16.msra.mxu0 %v7427_v21 }
 0x213   : > { %7432 = vmatprep.subr.bf16.mxu0 %v8309_v24 }
 0x214   : > { %6835 = vmatmul.mubr.msk.f32.gmra.mrb[46].mxu0 %vm1200_vm15, %v1759_v10  ;;  %6848 = vmatmul.mubr.msk.f32.gmra.mrb[46].mxu1 %vm1200_vm15, %v1853_v12 }
 0x215   : > { %6837 = vmatprep.mubr.msk.f32.mxu0 %vm7885_vm3, %v7886_v8  ;;  %6850 = vmatprep.mubr.msk.f32.mxu1 %vm7885_vm3, %v7886_v8 }
 0x218   : > { %6838 = vmatmul.mubr.msk.f32.gmra.mrb[48].mxu0 %vm1200_vm15, %v1758_v61  ;;  %6851 = vmatmul.mubr.msk.f32.gmra.mrb[48].mxu1 %vm1200_vm15, %v1852_v3 }
 0x2bf   : > { %v1276_v25 = vpop.f32.mrb[26].mxu0  ;;  %v1365_v26 = vpop.f32.mrb[26].mxu1 }
 0x2c0   : > { %v1366_v27 = vadd.f32 %v1365_v26, %v1276_v25  ;;  %v6755_v28 = vpop.f32.mrb[27].mxu0  ;;  %v6768_v29 = vpop.f32.mrb[27].mxu1 }
 0x2c3   : > { %v1281_v30 = vpop.f32.mrb[28].mxu0  ;;  %v1370_v31 = vpop.f32.mrb[28].mxu1 }
 0x2c4   : > { %v1371_v32 = vadd.f32 %v1370_v31, %v1281_v30  ;;  %v6758_v33 = vpop.f32.mrb[29].mxu0  ;;  %v6771_v34 = vpop.f32.mrb[29].mxu1 }
 0x2c7   : > { %v1286_v35 = vpop.f32.mrb[30].mxu0  ;;  %v1375_v36 = vpop.f32.mrb[30].mxu1 }
 0x2c8   : > { %v1376_v37 = vadd.f32 %v1375_v36, %v1286_v35  ;;  %v6761_v38 = vpop.f32.mrb[31].mxu0  ;;  %v6774_v39 = vpop.f32.mrb[31].mxu1 }
 0x2c9   : > { %v471_v38 = vld [vmem:[%s8838_s5 + $0x20] sm:$0xff]  ;;  %v472_v39 = vld [vmem:[%s8838_s5 + $0x28] sm:$0xff] }
 0x2cb   : > { %v1456_v40 = vpop.f32.mrb[32].mxu0  ;;  %v1550_v41 = vpop.f32.mrb[32].mxu1 }
 0x2cc   : > { %v1470_v42 = vadd.f32 %v1456_v40, %v1366_v27  ;;  %v6781_v43 = vpop.f32.mrb[33].mxu0  ;;  %v6794_v44 = vpop.f32.mrb[33].mxu1 }
 0x2ce   : > { %v1564_v45 = vadd.f32 %v1550_v41, %v1470_v42 }
 0x2cf   : > { %v1461_v46 = vpop.f32.mrb[34].mxu0  ;;  %v1555_v47 = vpop.f32.mrb[34].mxu1 }
 0x2d0   : > { %v1471_v48 = vadd.f32 %v1461_v46, %v1371_v32  ;;  %v6784_v49 = vpop.f32.mrb[35].mxu0  ;;  %v6797_v50 = vpop.f32.mrb[35].mxu1 }
 0x2d2   : > { %v1565_v51 = vadd.f32 %v1555_v47, %v1471_v48  ;;  %v7435_v47 = vpack.c.bf16 %v472_v39, %v471_v38  ;;  %v6231_v39 = vld [vmem:[%s8841_s8 + $0x2] ss:$0 sm:$0xff] }
 0x2d3   : > { %v1466_v52 = vpop.f32.mrb[36].mxu0  ;;  %v1560_v53 = vpop.f32.mrb[36].mxu1 }
 0x2d4   : > { %v1472_v54 = vadd.f32 %v1466_v52, %v1376_v37  ;;  %v6787_v55 = vpop.f32.mrb[37].mxu0  ;;  %v6800_v56 = vpop.f32.mrb[37].mxu1 }
 0x2d5   : > { %v474_v55 = vld [vmem:[%s8838_s5 + $0x38] sm:$0xff] }
 0x2d6   : > { %v1566_v57 = vadd.f32 %v1560_v53, %v1472_v54  ;;  %v473_v54 = vld [vmem:[%s8838_s5 + $0x30] sm:$0xff] }
 0x2d7   : > { %v1644_v58 = vpop.f32.mrb[38].mxu0  ;;  %v1738_v59 = vpop.f32.mrb[38].mxu1  ;;  %v7439_v56 = vpack.c.bf16 %v474_v55, %v473_v54 }
 0x2d8   : > { %v1658_v60 = vadd.f32 %v1644_v58, %v1564_v45  ;;  %v6807_v61 = vpop.f32.mrb[39].mxu0  ;;  %v6820_v62 = vpop.f32.mrb[39].mxu1 }
 0x2d9   : > { %v6152_v62 = vld [vmem:[%s8842_s9 + $0x20] sm:$0xff] }
 0x2da   : > { %v1752_v63 = vadd.f32 %v1738_v59, %v1658_v60  ;;  %v6146_v59 = vld [vmem:[%s8840_s7 + $0x10] sm:$0xff]  ;;  %v6147_v60 = vld [vmem:[%s8840_s7 + $0x18] sm:$0xff] }
 0x2db   : > { %v1649_v0 = vpop.f32.mrb[40].mxu0  ;;  %v1743_v1 = vpop.f32.mrb[40].mxu1  ;;  %v7447_v61 = vpack.c.bf16 %v6147_v60, %v6146_v59 }
 0x2dc   : > { %v1659_v3 = vadd.f32 %v1649_v0, %v1565_v51  ;;  %v6810_v4 = vpop.f32.mrb[41].mxu0  ;;  %v6823_v5 = vpop.f32.mrb[41].mxu1 }
 0x2dd   : > { %v489_v5 = vld [vmem:[%s8842_s9] sm:$0xff] }
 0x2de   : > { %v1753_v6 = vadd.f32 %v1743_v1, %v1659_v3  ;;  %v6154_v1 = vld [vmem:[%s8842_s9 + $0x30] sm:$0xff]  ;;  %v6155_v3 = vld [vmem:[%s8842_s9 + $0x38] sm:$0xff] }
 0x2df   : > { %v1654_v7 = vpop.f32.mrb[42].mxu0  ;;  %v1748_v9 = vpop.f32.mrb[42].mxu1  ;;  %v8371_v4 = vpack.c.bf16 %v6155_v3, %v6154_v1 }
 0x2e0   : > { %v1660_v10 = vadd.f32 %v1654_v7, %v1566_v57  ;;  %v6813_v11 = vpop.f32.mrb[43].mxu0  ;;  %v6826_v12 = vpop.f32.mrb[43].mxu1  ;;  %v477_v57 = vld [vmem:[%s8840_s7 + $0x8] sm:$0xff] }
 0x2e1   : > { %v6224_v12 = vld [vmem:[%s8839_s6] ss:$0 sm:$0xff] }
 0x2e2   : > { %v1754_v13 = vadd.f32 %v1748_v9, %v1660_v10  ;;  %v491_v9 = vld [vmem:[%s8842_s9 + $0x10] sm:$0xff]  ;;  %v492_v10 = vld [vmem:[%s8842_s9 + $0x18] sm:$0xff] }
 0x2e3   : > { %v1832_v14 = vpop.f32.mrb[44].mxu0  ;;  %v1926_v15 = vpop.f32.mrb[44].mxu1  ;;  %v8394_v11 = vpack.c.bf16 %v492_v10, %v491_v9 }
 0x2e4   : > { %v1846_v16 = vadd.f32 %v1832_v14, %v1752_v63  ;;  %v6833_v17 = vpop.f32.mrb[45].mxu0  ;;  %v6846_v18 = vpop.f32.mrb[45].mxu1  ;;  %v6153_v63 = vld [vmem:[%s8842_s9 + $0x28] sm:$0xff] }
 0x2e5   : > { %v8361_v0 = vpack.c.bf16 %v6153_v63, %v6152_v62  ;;  %v6148_v17 = vld [vmem:[%s8840_s7 + $0x20] sm:$0xff]  ;;  %v6149_v18 = vld [vmem:[%s8840_s7 + $0x28] sm:$0xff] }
 0x2e6   : > { %v1940_v20 = vadd.f32 %v1926_v15, %v1846_v16 }
 0x2e7   : > { %v1837_v21 = vpop.f32.mrb[46].mxu0  ;;  %v1931_v22 = vpop.f32.mrb[46].mxu1 }
 0x2e8   : > { %v1949_v23 = vadd.f32 %v6215_v19, %v1940_v20  ;;  %v1847_v25 = vadd.f32 %v1837_v21, %v1753_v6  ;;  %v6836_v26 = vpop.f32.mrb[47].mxu0  ;;  %v6849_v27 = vpop.f32.mrb[47].mxu1  ;;  %v490_v6 = vld [vmem:[%s8842_s9 + $0x8] sm:$0xff]  ;;  %v7451_v21 = vpack.c.bf16 %v6149_v18, %v6148_v17 }
 0x2e9   : > { %v8381_v7 = vpack.c.bf16 %v490_v6, %v489_v5  ;;  %v6158_v26 = vld [vmem:[%s8842_s9 + $0x50] sm:$0xff]  ;;  %v6159_v27 = vld [vmem:[%s8842_s9 + $0x58] sm:$0xff] }
 0x2ea   : > { %v1941_v28 = vadd.f32 %v1931_v22, %v1847_v25  ;;  %v1952_v29 = vmax.f32 %v1949_v23, 0.0  ;;  %v6156_v22 = vld [vmem:[%s8842_s9 + $0x40] sm:$0xff]  ;;  %v6157_v23 = vld [vmem:[%s8842_s9 + $0x48] sm:$0xff] }
 0x2eb   : > { %v1842_v30 = vpop.f32.mrb[48].mxu0  ;;  %v1936_v31 = vpop.f32.mrb[48].mxu1  ;;  %v8425_v25 = vpack.c.bf16 %v6157_v23, %v6156_v22 }
 0x2ec   : > { %v1950_v32 = vadd.f32 %v6215_v19, %v1941_v28  ;;  %v1848_v33 = vadd.f32 %v1842_v30, %v1754_v13  ;;  %v6839_v34 = vpop.f32.mrb[49].mxu0  ;;  %v6852_v35 = vpop.f32.mrb[49].mxu1  ;;  %v1957_v40 = vrot.slane %v1952_v29, 1  ;;  %v2118_v41 = vrot.slane %v1952_v29, 2 }
 0x2ed   : > { %v2203_v42 = vrot.slane %v1952_v29, 3  ;;  %v8436_v28 = vpack.c.bf16 %v6159_v27, %v6158_v26  ;;  %v6228_v35 = vld [vmem:[%s8841_s8 + $0x1] ss:$0 sm:$0xff] }
 0x2ee   : > { %v1953_v36 = vmax.f32 %v1950_v32, 0.0  ;;  %v1942_v37 = vadd.f32 %v1936_v31, %v1848_v33  ;;  %v6225_v31 = vld [vmem:[%s8841_s8] ss:$0 sm:$0xff] }
 0x2f0   : > { %v1951_v43 = vadd.f32 %v6215_v19, %v1942_v37  ;;  %v1958_v44 = vrot.slane %v1953_v36, 1  ;;  %v2119_v45 = vrot.slane %v1953_v36, 2  ;;  %v2204_v46 = vrot.slane %v1953_v36, 3 }
 0x2f2   : > { %v1954_v48 = vmax.f32 %v1951_v43, 0.0  ;;  %v1959_v49 = vsel %vm521_vm5, %v1957_v40, %v1958_v44  ;;  %v2120_v50 = vsel %vm741_vm7, %v2118_v41, %v2119_v45  ;;  %v2205_v51 = vsel %vm861_vm6, %v2203_v42, %v2204_v46 }
 0x2f3   : > { %6857 = vmatprep.mubr.msk.f32.mxu0 %vm1200_vm15, %v1959_v49  ;;  %vm3526_vm5 = vcmask 257027   ;;  %vm4022_vm7 = vcmask 259077  }
 0x2f4   : > { %v2206_v52 = vrot.slane %v1954_v48, 3  ;;  %6858 = vmatmul.mubr.msk.f32.vlgmr.msra.gmra.mrb[50].mxu0 %vm1200_vm15, %v1958_v44 }
 0x2f5   : > { %6864 = vmatprep.mubr.msk.f32.mxu0 %vm1200_vm15, %v1952_v29  ;;  %7434 = vmatpush3.bf16.msra.mxu0 %v8309_v24  ;;  %v476_v24 = vld [vmem:[%s8840_s7] sm:$0xff] }
 0x2f6   : > { %7436 = vmatprep.subr.bf16.mxu0 %v7435_v47  ;;  %v2207_v53 = vsel %vm861_vm6, %v2204_v46, %v2206_v52  ;;  %v7443_v58 = vpack.c.bf16 %v477_v57, %v476_v24  ;;  %vm3774_vm6 = vcmask 258052  }
 0x2f8   : > { %7444 = vmatprep.subr.bf16.mxu1 %v7443_v58 }
 0x2f9   : > { %7446 = vmatpush3.bf16.msra.mxu1 %v7443_v58 }
 0x2fa   : > { %7448 = vmatprep.subr.bf16.mxu1 %v7447_v61 }
 0x2fc   : > { %6865 = vmatmul.mubr.msk.f32.vlgmr.msra.gmra.mrb[50].mxu0 %vm1200_vm15, %v1953_v36 }
 0x2fd   : > { %6871 = vmatprep.mubr.msk.f32.mxu0 %vm1200_vm15, %v2120_v50  ;;  %7438 = vmatpush3.bf16.msra.mxu0 %v7435_v47 }
 0x2fe   : > { %7440 = vmatprep.subr.bf16.mxu0 %v7439_v56 }
 0x304   : > { %6872 = vmatmul.mubr.msk.f32.vlgmr.msra.gmra.mrb[50].mxu0 %vm1200_vm15, %v2119_v45 }
 0x305   : > { %6878 = vmatprep.mubr.msk.f32.mxu0 %vm1200_vm15, %v2205_v51  ;;  %7442 = vmatpush3.bf16.msra.mxu0 %v7439_v56  ;;  %v8474_v56 = vld [vmem:[%s8843_s10] sm:$0x1] }
 0x306   : > { %7461 = vmatprep.subr.bf16.mxu0 %v7883_v2 }
 0x30c   : > { %6879 = vmatmul.mubr.msk.f32.vlgmr.msra.gmra.mrb[50].mxu0 %vm1200_vm15, %v2207_v53 }
 0x30d   : > { %6921 = vmatprep.mubr.msk.f32.mxu0 %vm7885_vm3, %v7886_v8  ;;  %7463 = vmatpush3.bf16.msra.mxu0 %v8361_v0 }
 0x30e   : > { %7464 = vmatprep.subr.bf16.mxu0 %v7883_v2 }
 0x311   : > { %7466 = vmatpush3.bf16.msra.mxu0 %v8371_v4 }
 0x312   : > { %7473 = vmatprep.subr.bf16.mxu0 %v7883_v2 }
 0x314   : > { %6922 = vmatmul.mubr.f32.vlgmr.msra.gmra.mrb[52].mxu0 %v7886_v8 }
 0x315   : > { %7475 = vmatpush3.bf16.msra.mxu0 %v8381_v7  ;;  %6943 = vmatprep.mubr.msk.f32.mxu0 %vm7885_vm3, %v7886_v8 }
 0x316   : > { %7476 = vmatprep.subr.bf16.mxu0 %v7883_v2 }
 0x319   : > { %7478 = vmatpush3.bf16.msra.mxu0 %v8394_v11 }
 0x31a   : > { %7485 = vmatprep.subr.bf16.mxu0 %v7883_v2 }
 0x3df   : > { %v6880_v13 = vpop.f32.mrb[50].mxu0 }
 0x3e0   : > { %v2296_v14 = vadd.f32 %v6880_v13, %v6224_v12  ;;  %v2278_v15 = vpop.f32.mrb[51].mxu0 }
 0x3e1   : > { %v2295_v16 = vadd.f32 %v6224_v12, %v2278_v15 }
 0x3e2   : > { %v2298_v20 = vmax.f32 %v2296_v14, 0.0 }
 0x3e3   : > { %v2297_v19 = vmax.f32 %v2295_v16, 0.0 }
 0x3e5   : > { %6885 = vmatprep.mubr.msk.f32.mxu1 %vm1200_vm15, %v2297_v19 }
 0x3e6   : > { %6886 = vmatmul.mubr.msk.f32.vlgmr.msra.gmra.mrb[50].mxu1 %vm1200_vm15, %v2298_v20 }
 0x3e7   : > { %7450 = vmatpush3.bf16.msra.mxu1 %v7447_v61  ;;  %6892 = vmatprep.mubr.msk.f32.mxu1 %vm1200_vm15, %v2297_v19  ;;  %v2688_v29 = vpop.f32.mrb[52].mxu0 }
 0x3e8   : > { %7452 = vmatprep.subr.bf16.mxu1 %v7451_v21  ;;  %v6923_v30 = vpop.f32.mrb[53].mxu0 }
 0x3ea   : > { %6893 = vmatmul.mubr.msk.f32.vlgmr.msra.gmra.mrb[52].mxu1 %vm1200_vm15, %v2298_v20 }
 0x3eb   : > { %7454 = vmatpush3.bf16.msra.mxu1 %v7451_v21  ;;  %6899 = vmatprep.mubr.msk.f32.mxu1 %vm1200_vm15, %v2297_v19 }
 0x3ec   : > { %7455 = vmatprep.subr.bf16.mxu1 %v7883_v2 }
 0x3ee   : > { %6900 = vmatmul.mubr.msk.f32.vlgmr.msra.gmra.mrb[54].mxu1 %vm1200_vm15, %v2298_v20 }
 0x3ef   : > { %7457 = vmatpush3.bf16.msra.mxu1 %v8381_v7  ;;  %6910 = vmatprep.mubr.msk.f32.mxu1 %vm7885_vm3, %v7886_v8 }
 0x3f0   : > { %7458 = vmatprep.subr.bf16.mxu1 %v7883_v2 }
 0x3f3   : > { %7460 = vmatpush3.bf16.msra.mxu1 %v8394_v11 }
 0x3f4   : > { %7467 = vmatprep.subr.bf16.mxu1 %v7883_v2 }
 0x3f6   : > { %6911 = vmatmul.mubr.f32.vlgmr.msra.gmra.mrb[56].mxu1 %v7886_v8 }
 0x3f7   : > { %7469 = vmatpush3.bf16.msra.mxu1 %v8425_v25  ;;  %6932 = vmatprep.mubr.msk.f32.mxu1 %vm7885_vm3, %v7886_v8 }
 0x3f8   : > { %7470 = vmatprep.subr.bf16.mxu1 %v7883_v2 }
 0x3fb   : > { %7472 = vmatpush3.bf16.msra.mxu1 %v8436_v28 }
 0x3fc   : > { %7479 = vmatprep.subr.bf16.mxu1 %v7883_v2 }
 0x3fe   : > { %6933 = vmatmul.mubr.f32.vlgmr.msra.gmra.mrb[58].mxu1 %v7886_v8 }
 0x3ff   : > { %7481 = vmatpush3.bf16.msra.mxu1 %v8361_v0  ;;  %6954 = vmatprep.mubr.msk.f32.mxu1 %vm7885_vm3, %v7886_v8 }
 0x400   : > { %7482 = vmatprep.subr.bf16.mxu1 %v7883_v2 }
 0x403   : > { %7484 = vmatpush3.bf16.msra.mxu1 %v8371_v4 }
 0x404   : > { %7491 = vmatprep.subr.bf16.mxu1 %v7883_v2 }
 0x4b9   : > { %v6887_v32 = vpop.f32.mrb[50].mxu1 }
 0x4ba   : > { %v8453_v33 = vadd.f32 %v6887_v32, %v6225_v31  ;;  %v2377_v34 = vpop.f32.mrb[51].mxu1 }
 0x4bb   : > { %v8465_v43 = vadd.f32 %v6225_v31, %v2377_v34 }
 0x4bd   : > { %v6894_v36 = vpop.f32.mrb[52].mxu1 }
 0x4be   : > { %v8458_v37 = vadd.f32 %v6894_v36, %v6228_v35  ;;  %v2458_v38 = vpop.f32.mrb[53].mxu1 }
 0x4bf   : > { %v8467_v44 = vadd.f32 %v6228_v35, %v2458_v38 }
 0x4c1   : > { %v6901_v40 = vpop.f32.mrb[54].mxu1  ;;  %v2769_v49 = vadd.f32 %v2688_v29, %v8467_v44 }
 0x4c2   : > { %v8463_v41 = vadd.f32 %v6901_v40, %v6231_v39  ;;  %v2539_v42 = vpop.f32.mrb[55].mxu1 }
 0x4c3   : > { %v6235_v50 = vmul.f32 -1.442695, %v2769_v49  ;;  %v8477_v59 = vadd.f32 %v6231_v39, %v2539_v42 }
 0x4c9   : > { %v2618_v45 = vpop.f32.mrb[56].mxu1 }
 0x4ca   : > { %v2762_v46 = vadd.f32 %v2618_v45, %v8465_v43  ;;  %v6912_v47 = vpop.f32.mrb[57].mxu1 }
 0x4cc   : > { %v6234_v48 = vmul.f32 -1.442695, %v2762_v46 }
 0x4ce   : > { %7734 = vpow2.f32 %v6234_v48 }
 0x4cf   : > { %7736 = vpow2.f32 %v6235_v50 }
 0x4d1   : > { %v2758_v51 = vpop.f32.mrb[58].mxu1 }
 0x4d2   : > { %v6934_v52 = vpop.f32.mrb[59].mxu1  ;;  %v2759_v57 = vadd.f32 %v2758_v51, %v8474_v56 }
 0x4d8   : > { %v7735_v53 = vpop.eup %7734 }
 0x4d9   : > { %v2766_v54 = vadd.f32 1.0, %v7735_v53  ;;  %v7737_v55 = vpop.eup %7736 }
 0x4da   : > { %v2773_v24 = vadd.f32 1.0, %v7737_v55 }
 0x4db   : > { %7738 = vrcp.f32 %v2766_v54 }
 0x4dc   : > { %7740 = vrcp.f32 %v2773_v24 }
 0x4e5   : > { %v7739_v58 = vpop.eup %7738 }
 0x4e6   : > { %v2776_v60 = vmul.f32 %v7739_v58, %v2759_v57  ;;  %v7741_v62 = vpop.eup %7740 }
 0x4e7   : > { %v2779_v63 = vsub.f32 1.0, %v7741_v62  ;;  %v2781_v5 = vmul.f32 0.0, %v7741_v62 }
 0x4e8   : > { %v2777_v61 = vadd.f32 %v2776_v60, %v8477_v59 }
 0x4ea   : > { %7742 = vtanh.f32 %v2777_v61 }
 0x4f4   : > { %v7743_v1 = vpop.eup %7742 }
 0x4f5   : > { %v2780_v3 = vmul.f32 %v7743_v1, %v2779_v63 }
 0x4f7   : > { %v2782_v6 = vadd.f32 %v2781_v5, %v2780_v3 }
 0x4f9   : > { %2784 = vst.msk [vmem:[#allocation2] sm:$0x1] %vm2783_vm1, %v2782_v6  ;;  %6944 = vmatmul.mubr.msk.f32.vlgmr.msra.gmra.mrb[54].mxu0 %vm2548_vm0, %v2782_v6  ;;  %6955 = vmatmul.mubr.msk.f32.vlgmr.msra.gmra.mrb[60].mxu1 %vm2548_vm0, %v2782_v6  ;;  %v3026_v32 = vrot.slane %v2782_v6, 7 }
 0x4fa   : > { %7487 = vmatpush3.bf16.msra.mxu0 %v8425_v25  ;;  %6965 = vmatprep.mubr.msk.f32.mxu0 %vm7885_vm3, %v7886_v8 }
 0x4fb   : > { %7488 = vmatprep.subr.bf16.mxu0 %v7883_v2  ;;  %7493 = vmatpush3.bf16.msra.mxu1 %v8381_v7 }
 0x4fc   : > { %7494 = vmatprep.subr.bf16.mxu1 %v7883_v2  ;;  %6976 = vmatprep.mubr.msk.f32.mxu1 %vm7885_vm3, %v7886_v8 }
 0x4fe   : > { %7490 = vmatpush3.bf16.msra.mxu0 %v8436_v28 }
 0x4ff   : > { %7497 = vmatprep.subr.bf16.mxu0 %v7883_v2  ;;  %7496 = vmatpush3.bf16.msra.mxu1 %v8394_v11 }
 0x500   : > { %7503 = vmatprep.subr.bf16.mxu1 %v7883_v2 }
 0x501   : > { %6966 = vmatmul.mubr.msk.f32.vlgmr.msra.gmra.mrb[56].mxu0 %vm2548_vm0, %v2782_v6 }
 0x502   : > { %7499 = vmatpush3.bf16.msra.mxu0 %v8361_v0  ;;  %6987 = vmatprep.mubr.msk.f32.mxu0 %vm7885_vm3, %v7886_v8 }
 0x503   : > { %7500 = vmatprep.subr.bf16.mxu0 %v7883_v2 }
 0x506   : > { %7502 = vmatpush3.bf16.msra.mxu0 %v8371_v4 }
 0x507   : > { %7509 = vmatprep.subr.bf16.mxu0 %v7883_v2 }
 0x5cc   : > { %v2854_v9 = vpop.f32.mrb[54].mxu0  ;;  %v2924_v10 = vpop.f32.mrb[60].mxu1 }
 0x5cd   : > { %v2999_v12 = vrot.slane %v2854_v9, 7  ;;  %v3009_v13 = vrot.slane %v2924_v10, 7  ;;  %v6945_v14 = vpop.f32.mrb[55].mxu0  ;;  %v6956_v15 = vpop.f32.mrb[61].mxu1 }
 0x5cf   : > { %v3001_v16 = vadd.f32 %v2999_v12, %v8465_v43  ;;  %v3011_v17 = vadd.f32 %v3009_v13, %v8467_v44 }
 0x5d1   : > { %v6239_v18 = vmul.f32 -1.442695, %v3001_v16  ;;  %v6240_v19 = vmul.f32 -1.442695, %v3011_v17 }
 0x5d3   : > { %7744 = vpow2.f32 %v6239_v18 }
 0x5d4   : > { %7746 = vpow2.f32 %v6240_v19  ;;  %v2994_v20 = vpop.f32.mrb[56].mxu0 }
 0x5d5   : > { %v6967_v21 = vpop.f32.mrb[57].mxu0  ;;  %v2995_v29 = vadd.f32 %v2994_v20, %v8474_v56 }
 0x5d7   : > { %v3019_v30 = vrot.slane %v2995_v29, 7 }
 0x5dd   : > { %v7745_v22 = vpop.eup %7744 }
 0x5de   : > { %v7747_v23 = vpop.eup %7746  ;;  %v3005_v26 = vadd.f32 1.0, %v7745_v22 }
 0x5df   : > { %v3015_v27 = vadd.f32 1.0, %v7747_v23 }
 0x5e0   : > { %7748 = vrcp.f32 %v3005_v26 }
 0x5e1   : > { %7750 = vrcp.f32 %v3015_v27 }
 0x5ea   : > { %v7749_v31 = vpop.eup %7748 }
 0x5eb   : > { %v7751_v34 = vpop.eup %7750  ;;  %v3021_v35 = vmul.f32 %v7749_v31, %v3019_v30 }
 0x5ec   : > { %v3028_v36 = vmul.f32 %v7751_v34, %v3026_v32  ;;  %v3024_v39 = vsub.f32 1.0, %v7751_v34 }
 0x5ed   : > { %v3022_v38 = vadd.f32 %v3021_v35, %v8477_v59 }
 0x5ef   : > { %7752 = vtanh.f32 %v3022_v38 }
 0x5f9   : > { %v7753_v40 = vpop.eup %7752 }
 0x5fa   : > { %v3025_v42 = vmul.f32 %v7753_v40, %v3024_v39 }
 0x5fc   : > { %v3029_v45 = vadd.f32 %v3028_v36, %v3025_v42 }
 0x5fe   : > { %3031 = vst.msk [vmem:[#allocation2] sm:$0x2] %vm3030_vm2, %v3029_v45  ;;  %v3033_v46 = vrot.slane %v3029_v45, 1  ;;  %v3274_v6 = vrot.slane %v3029_v45, 7 }
 0x600   : > { %6977 = vmatmul.mubr.msk.f32.vlgmr.msra.gmra.mrb[62].mxu1 %vm2548_vm0, %v3033_v46  ;;  %6988 = vmatmul.mubr.msk.f32.vlgmr.msra.gmra.mrb[58].mxu0 %vm2548_vm0, %v3033_v46 }
 0x601   : > { %7505 = vmatpush3.bf16.msra.mxu1 %v8425_v25  ;;  %6998 = vmatprep.mubr.msk.f32.mxu1 %vm7885_vm3, %v7886_v8 }
 0x602   : > { %7506 = vmatprep.subr.bf16.mxu1 %v7883_v2  ;;  %7511 = vmatpush3.bf16.msra.mxu0 %v8381_v7 }
 0x603   : > { %7512 = vmatprep.subr.bf16.mxu0 %v7883_v2  ;;  %7009 = vmatprep.mubr.msk.f32.mxu0 %vm7885_vm3, %v7886_v8 }
 0x605   : > { %7508 = vmatpush3.bf16.msra.mxu1 %v8436_v28 }
 0x606   : > { %7515 = vmatprep.subr.bf16.mxu1 %v7883_v2  ;;  %7514 = vmatpush3.bf16.msra.mxu0 %v8394_v11 }
 0x607   : > { %7521 = vmatprep.subr.bf16.mxu0 %v7883_v2 }
 0x608   : > { %6999 = vmatmul.mubr.msk.f32.vlgmr.msra.gmra.mrb[64].mxu1 %vm2548_vm0, %v3033_v46 }
 0x609   : > { %7517 = vmatpush3.bf16.msra.mxu1 %v8361_v0  ;;  %7020 = vmatprep.mubr.msk.f32.mxu1 %vm7885_vm3, %v7886_v8 }
 0x60a   : > { %7518 = vmatprep.subr.bf16.mxu1 %v7883_v2 }
 0x60d   : > { %7520 = vmatpush3.bf16.msra.mxu1 %v8371_v4 }
 0x60e   : > { %7527 = vmatprep.subr.bf16.mxu1 %v7883_v2 }
 0x6d3   : > { %v3102_v47 = vpop.f32.mrb[62].mxu1  ;;  %v3172_v48 = vpop.f32.mrb[58].mxu0 }
 0x6d4   : > { %v3247_v49 = vrot.slane %v3102_v47, 6  ;;  %v3257_v50 = vrot.slane %v3172_v48, 6  ;;  %v6978_v51 = vpop.f32.mrb[63].mxu1  ;;  %v6989_v52 = vpop.f32.mrb[59].mxu0 }
 0x6d6   : > { %v3249_v53 = vadd.f32 %v3247_v49, %v8465_v43  ;;  %v3259_v54 = vadd.f32 %v3257_v50, %v8467_v44 }
 0x6d8   : > { %v6244_v55 = vmul.f32 -1.442695, %v3249_v53  ;;  %v6245_v24 = vmul.f32 -1.442695, %v3259_v54 }
 0x6da   : > { %7754 = vpow2.f32 %v6244_v55 }
 0x6db   : > { %7756 = vpow2.f32 %v6245_v24  ;;  %v3242_v57 = vpop.f32.mrb[64].mxu1 }
 0x6dc   : > { %v7000_v58 = vpop.f32.mrb[65].mxu1  ;;  %v3243_v1 = vadd.f32 %v3242_v57, %v8474_v56 }
 0x6de   : > { %v3267_v3 = vrot.slane %v3243_v1, 6 }
 0x6e4   : > { %v7755_v60 = vpop.eup %7754 }
 0x6e5   : > { %v7757_v61 = vpop.eup %7756  ;;  %v3253_v62 = vadd.f32 1.0, %v7755_v60 }
 0x6e6   : > { %v3263_v63 = vadd.f32 1.0, %v7757_v61 }
 0x6e7   : > { %7758 = vrcp.f32 %v3253_v62 }
 0x6e8   : > { %7760 = vrcp.f32 %v3263_v63 }
 0x6f1   : > { %v7759_v5 = vpop.eup %7758 }
 0x6f2   : > { %v7761_v9 = vpop.eup %7760  ;;  %v3269_v10 = vmul.f32 %v7759_v5, %v3267_v3 }
 0x6f3   : > { %v3276_v12 = vmul.f32 %v7761_v9, %v3274_v6  ;;  %v3272_v14 = vsub.f32 1.0, %v7761_v9 }
 0x6f4   : > { %v3270_v13 = vadd.f32 %v3269_v10, %v8477_v59 }
 0x6f6   : > { %7762 = vtanh.f32 %v3270_v13 }
 0x700   : > { %v7763_v15 = vpop.eup %7762 }
 0x701   : > { %v3273_v16 = vmul.f32 %v7763_v15, %v3272_v14 }
 0x703   : > { %v3277_v17 = vadd.f32 %v3276_v12, %v3273_v16 }
 0x705   : > { %3279 = vst.msk [vmem:[#allocation2] sm:$0x4] %vm3278_vm4, %v3277_v17  ;;  %v3281_v18 = vrot.slane %v3277_v17, 2  ;;  %v3522_v46 = vrot.slane %v3277_v17, 7 }
 0x707   : > { %7010 = vmatmul.mubr.msk.f32.vlgmr.msra.gmra.mrb[60].mxu0 %vm2548_vm0, %v3281_v18  ;;  %7021 = vmatmul.mubr.msk.f32.vlgmr.msra.gmra.mrb[66].mxu1 %vm2548_vm0, %v3281_v18 }
 0x708   : > { %7523 = vmatpush3.bf16.msra.mxu0 %v8425_v25  ;;  %7031 = vmatprep.mubr.msk.f32.mxu0 %vm7885_vm3, %v7886_v8 }
 0x709   : > { %7524 = vmatprep.subr.bf16.mxu0 %v7883_v2  ;;  %7529 = vmatpush3.bf16.msra.mxu1 %v8381_v7 }
 0x70a   : > { %7530 = vmatprep.subr.bf16.mxu1 %v7883_v2  ;;  %7042 = vmatprep.mubr.msk.f32.mxu1 %vm7885_vm3, %v7886_v8 }
 0x70c   : > { %7526 = vmatpush3.bf16.msra.mxu0 %v8436_v28 }
 0x70d   : > { %7533 = vmatprep.subr.bf16.mxu0 %v7883_v2  ;;  %7532 = vmatpush3.bf16.msra.mxu1 %v8394_v11 }
 0x70e   : > { %7539 = vmatprep.subr.bf16.mxu1 %v7883_v2 }
 0x70f   : > { %7032 = vmatmul.mubr.msk.f32.vlgmr.msra.gmra.mrb[62].mxu0 %vm2548_vm0, %v3281_v18 }
 0x710   : > { %7535 = vmatpush3.bf16.msra.mxu0 %v8361_v0  ;;  %7053 = vmatprep.mubr.msk.f32.mxu0 %vm7885_vm3, %v7886_v8 }
 0x711   : > { %7536 = vmatprep.subr.bf16.mxu0 %v7883_v2 }
 0x714   : > { %7538 = vmatpush3.bf16.msra.mxu0 %v8371_v4 }
 0x715   : > { %7545 = vmatprep.subr.bf16.mxu0 %v7883_v2 }
 0x7da   : > { %v3350_v19 = vpop.f32.mrb[60].mxu0  ;;  %v3420_v20 = vpop.f32.mrb[66].mxu1 }
 0x7db   : > { %v3495_v21 = vrot.slane %v3350_v19, 5  ;;  %v3505_v22 = vrot.slane %v3420_v20, 5  ;;  %v7011_v23 = vpop.f32.mrb[61].mxu0  ;;  %v7022_v26 = vpop.f32.mrb[67].mxu1 }
 0x7dd   : > { %v3497_v27 = vadd.f32 %v3495_v21, %v8465_v43  ;;  %v3507_v29 = vadd.f32 %v3505_v22, %v8467_v44 }
 0x7df   : > { %v6249_v30 = vmul.f32 -1.442695, %v3497_v27  ;;  %v6250_v31 = vmul.f32 -1.442695, %v3507_v29 }
 0x7e1   : > { %7764 = vpow2.f32 %v6249_v30 }
 0x7e2   : > { %7766 = vpow2.f32 %v6250_v31  ;;  %v3490_v32 = vpop.f32.mrb[62].mxu0 }
 0x7e3   : > { %v7033_v34 = vpop.f32.mrb[63].mxu0  ;;  %v3491_v40 = vadd.f32 %v3490_v32, %v8474_v56 }
 0x7e5   : > { %v3515_v42 = vrot.slane %v3491_v40, 5 }
 0x7eb   : > { %v7765_v35 = vpop.eup %7764 }
 0x7ec   : > { %v7767_v36 = vpop.eup %7766  ;;  %v3501_v38 = vadd.f32 1.0, %v7765_v35 }
 0x7ed   : > { %v3511_v39 = vadd.f32 1.0, %v7767_v36 }
 0x7ee   : > { %7768 = vrcp.f32 %v3501_v38 }
 0x7ef   : > { %7770 = vrcp.f32 %v3511_v39 }
 0x7f8   : > { %v7769_v45 = vpop.eup %7768 }
 0x7f9   : > { %v7771_v47 = vpop.eup %7770  ;;  %v3517_v48 = vmul.f32 %v7769_v45, %v3515_v42 }
 0x7fa   : > { %v3524_v49 = vmul.f32 %v7771_v47, %v3522_v46  ;;  %v3520_v51 = vsub.f32 1.0, %v7771_v47 }
 0x7fb   : > { %v3518_v50 = vadd.f32 %v3517_v48, %v8477_v59 }
 0x7fd   : > { %7772 = vtanh.f32 %v3518_v50 }
 0x807   : > { %v7773_v52 = vpop.eup %7772 }
 0x808   : > { %v3521_v53 = vmul.f32 %v7773_v52, %v3520_v51 }
 0x80a   : > { %v3525_v54 = vadd.f32 %v3524_v49, %v3521_v53 }
 0x80c   : > { %3527 = vst.msk [vmem:[#allocation2] sm:$0x8] %vm3526_vm5, %v3525_v54  ;;  %v3529_v55 = vrot.slane %v3525_v54, 3  ;;  %v3770_v18 = vrot.slane %v3525_v54, 7 }
 0x80e   : > { %7043 = vmatmul.mubr.msk.f32.vlgmr.msra.gmra.mrb[68].mxu1 %vm2548_vm0, %v3529_v55  ;;  %7054 = vmatmul.mubr.msk.f32.vlgmr.msra.gmra.mrb[64].mxu0 %vm2548_vm0, %v3529_v55 }
 0x80f   : > { %7541 = vmatpush3.bf16.msra.mxu1 %v8425_v25  ;;  %7064 = vmatprep.mubr.msk.f32.mxu1 %vm7885_vm3, %v7886_v8 }
 0x810   : > { %7542 = vmatprep.subr.bf16.mxu1 %v7883_v2  ;;  %7547 = vmatpush3.bf16.msra.mxu0 %v8381_v7 }
 0x811   : > { %7548 = vmatprep.subr.bf16.mxu0 %v7883_v2  ;;  %7075 = vmatprep.mubr.msk.f32.mxu0 %vm7885_vm3, %v7886_v8 }
 0x813   : > { %7544 = vmatpush3.bf16.msra.mxu1 %v8436_v28 }
 0x814   : > { %7551 = vmatprep.subr.bf16.mxu1 %v7883_v2  ;;  %7550 = vmatpush3.bf16.msra.mxu0 %v8394_v11 }
 0x815   : > { %7557 = vmatprep.subr.bf16.mxu0 %v7883_v2 }
 0x816   : > { %7065 = vmatmul.mubr.msk.f32.vlgmr.msra.gmra.mrb[70].mxu1 %vm2548_vm0, %v3529_v55 }
 0x817   : > { %7553 = vmatpush3.bf16.msra.mxu1 %v8361_v0  ;;  %7086 = vmatprep.mubr.msk.f32.mxu1 %vm7885_vm3, %v7886_v8 }
 0x818   : > { %7554 = vmatprep.subr.bf16.mxu1 %v7883_v2 }
 0x81b   : > { %7556 = vmatpush3.bf16.msra.mxu1 %v8371_v4 }
 0x81c   : > { %7563 = vmatprep.subr.bf16.mxu1 %v7883_v2 }
 0x8e1   : > { %v3598_v24 = vpop.f32.mrb[68].mxu1  ;;  %v3668_v57 = vpop.f32.mrb[64].mxu0 }
 0x8e2   : > { %v3743_v58 = vrot.slane %v3598_v24, 4  ;;  %v3753_v60 = vrot.slane %v3668_v57, 4  ;;  %v7044_v61 = vpop.f32.mrb[69].mxu1  ;;  %v7055_v62 = vpop.f32.mrb[65].mxu0 }
 0x8e4   : > { %v3745_v63 = vadd.f32 %v3743_v58, %v8465_v43  ;;  %v3755_v1 = vadd.f32 %v3753_v60, %v8467_v44 }
 0x8e6   : > { %v6254_v3 = vmul.f32 -1.442695, %v3745_v63  ;;  %v6255_v5 = vmul.f32 -1.442695, %v3755_v1 }
 0x8e8   : > { %7774 = vpow2.f32 %v6254_v3 }
 0x8e9   : > { %7776 = vpow2.f32 %v6255_v5  ;;  %v3738_v6 = vpop.f32.mrb[70].mxu1 }
 0x8ea   : > { %v7066_v9 = vpop.f32.mrb[71].mxu1  ;;  %v3739_v15 = vadd.f32 %v3738_v6, %v8474_v56 }
 0x8ec   : > { %v3763_v16 = vrot.slane %v3739_v15, 4 }
 0x8f2   : > { %v7775_v10 = vpop.eup %7774 }
 0x8f3   : > { %v7777_v12 = vpop.eup %7776  ;;  %v3749_v13 = vadd.f32 1.0, %v7775_v10 }
 0x8f4   : > { %v3759_v14 = vadd.f32 1.0, %v7777_v12 }
 0x8f5   : > { %7778 = vrcp.f32 %v3749_v13 }
 0x8f6   : > { %7780 = vrcp.f32 %v3759_v14 }
 0x8ff   : > { %v7779_v17 = vpop.eup %7778 }
 0x900   : > { %v7781_v19 = vpop.eup %7780  ;;  %v3765_v20 = vmul.f32 %v7779_v17, %v3763_v16 }
 0x901   : > { %v3772_v21 = vmul.f32 %v7781_v19, %v3770_v18  ;;  %v3768_v23 = vsub.f32 1.0, %v7781_v19 }
 0x902   : > { %v3766_v22 = vadd.f32 %v3765_v20, %v8477_v59 }
 0x904   : > { %7782 = vtanh.f32 %v3766_v22 }
 0x90e   : > { %v7783_v26 = vpop.eup %7782 }
 0x90f   : > { %v3769_v27 = vmul.f32 %v7783_v26, %v3768_v23 }
 0x911   : > { %v3773_v29 = vadd.f32 %v3772_v21, %v3769_v27 }
 0x913   : > { %3775 = vst.msk [vmem:[#allocation2] sm:$0x10] %vm3774_vm6, %v3773_v29  ;;  %v3777_v30 = vrot.slane %v3773_v29, 4  ;;  %v4018_v55 = vrot.slane %v3773_v29, 7 }
 0x915   : > { %7076 = vmatmul.mubr.msk.f32.vlgmr.msra.gmra.mrb[66].mxu0 %vm2548_vm0, %v3777_v30  ;;  %7087 = vmatmul.mubr.msk.f32.vlgmr.msra.gmra.mrb[72].mxu1 %vm2548_vm0, %v3777_v30 }
 0x916   : > { %7559 = vmatpush3.bf16.msra.mxu0 %v8425_v25  ;;  %7097 = vmatprep.mubr.msk.f32.mxu0 %vm7885_vm3, %v7886_v8 }
 0x917   : > { %7560 = vmatprep.subr.bf16.mxu0 %v7883_v2  ;;  %7565 = vmatpush3.bf16.msra.mxu1 %v8381_v7 }
 0x918   : > { %7566 = vmatprep.subr.bf16.mxu1 %v7883_v2  ;;  %7108 = vmatprep.mubr.msk.f32.mxu1 %vm7885_vm3, %v7886_v8 }
 0x91a   : > { %7562 = vmatpush3.bf16.msra.mxu0 %v8436_v28 }
 0x91b   : > { %7569 = vmatprep.subr.bf16.mxu0 %v7883_v2  ;;  %7568 = vmatpush3.bf16.msra.mxu1 %v8394_v11 }
 0x91c   : > { %7575 = vmatprep.subr.bf16.mxu1 %v7883_v2 }
 0x91d   : > { %7098 = vmatmul.mubr.msk.f32.vlgmr.msra.gmra.mrb[68].mxu0 %vm2548_vm0, %v3777_v30 }
 0x91e   : > { %7571 = vmatpush3.bf16.msra.mxu0 %v8361_v0  ;;  %7119 = vmatprep.mubr.msk.f32.mxu0 %vm7885_vm3, %v7886_v8 }
 0x91f   : > { %7572 = vmatprep.subr.bf16.mxu0 %v7883_v2 }
 0x922   : > { %7574 = vmatpush3.bf16.msra.mxu0 %v8371_v4 }
 0x923   : > { %7581 = vmatprep.subr.bf16.mxu0 %v7883_v2 }
 0x9e8   : > { %v3846_v31 = vpop.f32.mrb[66].mxu0  ;;  %v3916_v32 = vpop.f32.mrb[72].mxu1 }
 0x9e9   : > { %v3991_v34 = vrot.slane %v3846_v31, 3  ;;  %v4001_v35 = vrot.slane %v3916_v32, 3  ;;  %v7077_v36 = vpop.f32.mrb[67].mxu0  ;;  %v7088_v38 = vpop.f32.mrb[73].mxu1 }
 0x9eb   : > { %v3993_v39 = vadd.f32 %v3991_v34, %v8465_v43  ;;  %v4003_v40 = vadd.f32 %v4001_v35, %v8467_v44 }
 0x9ed   : > { %v6259_v42 = vmul.f32 -1.442695, %v3993_v39  ;;  %v6260_v45 = vmul.f32 -1.442695, %v4003_v40 }
 0x9ef   : > { %7784 = vpow2.f32 %v6259_v42 }
 0x9f0   : > { %7786 = vpow2.f32 %v6260_v45  ;;  %v3986_v46 = vpop.f32.mrb[68].mxu0 }
 0x9f1   : > { %v7099_v47 = vpop.f32.mrb[69].mxu0  ;;  %v3987_v52 = vadd.f32 %v3986_v46, %v8474_v56 }
 0x9f3   : > { %v4011_v53 = vrot.slane %v3987_v52, 3 }
 0x9f9   : > { %v7785_v48 = vpop.eup %7784 }
 0x9fa   : > { %v7787_v49 = vpop.eup %7786  ;;  %v3997_v50 = vadd.f32 1.0, %v7785_v48 }
 0x9fb   : > { %v4007_v51 = vadd.f32 1.0, %v7787_v49 }
 0x9fc   : > { %7788 = vrcp.f32 %v3997_v50 }
 0x9fd   : > { %7790 = vrcp.f32 %v4007_v51 }
 0xa06   : > { %v7789_v54 = vpop.eup %7788 }
 0xa07   : > { %v7791_v24 = vpop.eup %7790  ;;  %v4013_v57 = vmul.f32 %v7789_v54, %v4011_v53 }
 0xa08   : > { %v4020_v58 = vmul.f32 %v7791_v24, %v4018_v55  ;;  %v4016_v61 = vsub.f32 1.0, %v7791_v24 }
 0xa09   : > { %v4014_v60 = vadd.f32 %v4013_v57, %v8477_v59 }
 0xa0b   : > { %7792 = vtanh.f32 %v4014_v60 }
 0xa15   : > { %v7793_v62 = vpop.eup %7792 }
 0xa16   : > { %v4017_v63 = vmul.f32 %v7793_v62, %v4016_v61 }
 0xa18   : > { %v4021_v1 = vadd.f32 %v4020_v58, %v4017_v63 }
 0xa1a   : > { %4023 = vst.msk [vmem:[#allocation2] sm:$0x20] %vm4022_vm7, %v4021_v1  ;;  %v4025_v3 = vrot.slane %v4021_v1, 5  ;;  %v4266_v30 = vrot.slane %v4021_v1, 7 }
 0xa1c   : > { %7109 = vmatmul.mubr.msk.f32.vlgmr.msra.gmra.mrb[74].mxu1 %vm2548_vm0, %v4025_v3  ;;  %7120 = vmatmul.mubr.msk.f32.vlgmr.msra.gmra.mrb[70].mxu0 %vm2548_vm0, %v4025_v3 }
 0xa1d   : > { %7577 = vmatpush3.bf16.msra.mxu1 %v8425_v25  ;;  %7130 = vmatprep.mubr.msk.f32.mxu1 %vm7885_vm3, %v7886_v8 }
 0xa1e   : > { %7578 = vmatprep.subr.bf16.mxu1 %v7883_v2  ;;  %7583 = vmatpush3.bf16.msra.mxu0 %v8381_v7 }
 0xa1f   : > { %7584 = vmatprep.subr.bf16.mxu0 %v7883_v2  ;;  %7141 = vmatprep.mubr.msk.f32.mxu0 %vm7885_vm3, %v7886_v8 }
 0xa21   : > { %7580 = vmatpush3.bf16.msra.mxu1 %v8436_v28 }
 0xa22   : > { %7587 = vmatprep.subr.bf16.mxu1 %v7883_v2  ;;  %7586 = vmatpush3.bf16.msra.mxu0 %v8394_v11 }
 0xa23   : > { %7593 = vmatprep.subr.bf16.mxu0 %v7883_v2 }
 0xa24   : > { %7131 = vmatmul.mubr.msk.f32.vlgmr.msra.gmra.mrb[76].mxu1 %vm2548_vm0, %v4025_v3 }
 0xa25   : > { %7589 = vmatpush3.bf16.msra.mxu1 %v8361_v0  ;;  %7152 = vmatprep.mubr.msk.f32.mxu1 %vm7885_vm3, %v7886_v8 }
 0xa26   : > { %7590 = vmatprep.subr.bf16.mxu1 %v7883_v2 }
 0xa29   : > { %7592 = vmatpush3.bf16.msra.mxu1 %v8371_v4 }
 0xa2a   : > { %7599 = vmatprep.subr.bf16.mxu1 %v7883_v2 }
 0xaef   : > { %v4094_v5 = vpop.f32.mrb[74].mxu1  ;;  %v4164_v6 = vpop.f32.mrb[70].mxu0 }
 0xaf0   : > { %v4239_v9 = vrot.slane %v4094_v5, 2  ;;  %v4249_v10 = vrot.slane %v4164_v6, 2  ;;  %v7110_v12 = vpop.f32.mrb[75].mxu1  ;;  %v7121_v13 = vpop.f32.mrb[71].mxu0 }
 0xaf2   : > { %v4241_v14 = vadd.f32 %v4239_v9, %v8465_v43  ;;  %v4251_v15 = vadd.f32 %v4249_v10, %v8467_v44 }
 0xaf4   : > { %v6264_v16 = vmul.f32 -1.442695, %v4241_v14  ;;  %v6265_v17 = vmul.f32 -1.442695, %v4251_v15 }
 0xaf6   : > { %7794 = vpow2.f32 %v6264_v16 }
 0xaf7   : > { %7796 = vpow2.f32 %v6265_v17  ;;  %v4234_v18 = vpop.f32.mrb[76].mxu1 }
 0xaf8   : > { %v7132_v19 = vpop.f32.mrb[77].mxu1  ;;  %v4235_v26 = vadd.f32 %v4234_v18, %v8474_v56 }
 0xafa   : > { %v4259_v27 = vrot.slane %v4235_v26, 2 }
 0xb00   : > { %v7795_v20 = vpop.eup %7794 }
 0xb01   : > { %v7797_v21 = vpop.eup %7796  ;;  %v4245_v22 = vadd.f32 1.0, %v7795_v20 }
 0xb02   : > { %v4255_v23 = vadd.f32 1.0, %v7797_v21 }
 0xb03   : > { %7798 = vrcp.f32 %v4245_v22 }
 0xb04   : > { %7800 = vrcp.f32 %v4255_v23 }
 0xb0d   : > { %v7799_v29 = vpop.eup %7798 }
 0xb0e   : > { %v7801_v31 = vpop.eup %7800  ;;  %v4261_v32 = vmul.f32 %v7799_v29, %v4259_v27 }
 0xb0f   : > { %v4268_v34 = vmul.f32 %v7801_v31, %v4266_v30  ;;  %v4264_v36 = vsub.f32 1.0, %v7801_v31 }
 0xb10   : > { %v4262_v35 = vadd.f32 %v4261_v32, %v8477_v59 }
 0xb12   : > { %7802 = vtanh.f32 %v4262_v35 }
 0xb1c   : > { %v7803_v38 = vpop.eup %7802 }
 0xb1d   : > { %v4265_v39 = vmul.f32 %v7803_v38, %v4264_v36 }
 0xb1f   : > { %v4269_v40 = vadd.f32 %v4268_v34, %v4265_v39 }
 0xb21   : > { %4271 = vst.msk [vmem:[#allocation2] sm:$0x40] %vm4270_vm8, %v4269_v40  ;;  %v4273_v42 = vrot.slane %v4269_v40, 6  ;;  %v4514_v3 = vrot.slane %v4269_v40, 7 }
 0xb23   : > { %7142 = vmatmul.mubr.msk.f32.vlgmr.msra.gmra.mrb[72].mxu0 %vm2548_vm0, %v4273_v42  ;;  %7153 = vmatmul.mubr.msk.f32.vlgmr.msra.gmra.mrb[78].mxu1 %vm2548_vm0, %v4273_v42 }
 0xb24   : > { %7595 = vmatpush3.bf16.msra.mxu0 %v8425_v25  ;;  %7163 = vmatprep.mubr.msk.f32.mxu0 %vm7885_vm3, %v7886_v8 }
 0xb25   : > { %7596 = vmatprep.subr.bf16.mxu0 %v7883_v2  ;;  %7601 = vmatpush3.bf16.msra.mxu1 %v8381_v7 }
 0xb26   : > { %7602 = vmatprep.subr.bf16.mxu1 %v7883_v2  ;;  %7174 = vmatprep.mubr.msk.f32.mxu1 %vm7885_vm3, %v7886_v8 }
 0xb28   : > { %7598 = vmatpush3.bf16.msra.mxu0 %v8436_v28 }
 0xb29   : > { %7605 = vmatprep.subr.bf16.mxu0 %v7883_v2  ;;  %7604 = vmatpush3.bf16.msra.mxu1 %v8394_v11 }
 0xb2a   : > { %7611 = vmatprep.subr.bf16.mxu1 %v7883_v2 }
 0xb2b   : > { %7164 = vmatmul.mubr.msk.f32.vlgmr.msra.gmra.mrb[74].mxu0 %vm2548_vm0, %v4273_v42 }
 0xb2c   : > { %7607 = vmatpush3.bf16.msra.mxu0 %v8361_v0  ;;  %7185 = vmatprep.mubr.msk.f32.mxu0 %vm7885_vm3, %v7886_v8 }
 0xb2d   : > { %7608 = vmatprep.subr.bf16.mxu0 %v7883_v2 }
 0xb30   : > { %7610 = vmatpush3.bf16.msra.mxu0 %v8371_v4 }
 0xb31   : > { %7617 = vmatprep.subr.bf16.mxu0 %v7883_v2 }
 0xbf6   : > { %v4342_v45 = vpop.f32.mrb[72].mxu0  ;;  %v4412_v46 = vpop.f32.mrb[78].mxu1 }
 0xbf7   : > { %v4487_v47 = vrot.slane %v4342_v45, 1  ;;  %v4497_v48 = vrot.slane %v4412_v46, 1  ;;  %v7143_v49 = vpop.f32.mrb[73].mxu0  ;;  %v7154_v50 = vpop.f32.mrb[79].mxu1 }
 0xbf9   : > { %v4489_v51 = vadd.f32 %v4487_v47, %v8465_v43  ;;  %v4499_v52 = vadd.f32 %v4497_v48, %v8467_v44 }
 0xbfb   : > { %v6269_v53 = vmul.f32 -1.442695, %v4489_v51  ;;  %v6270_v54 = vmul.f32 -1.442695, %v4499_v52 }
 0xbfd   : > { %7804 = vpow2.f32 %v6269_v53 }
 0xbfe   : > { %7806 = vpow2.f32 %v6270_v54  ;;  %v4482_v55 = vpop.f32.mrb[74].mxu0 }
 0xbff   : > { %v7165_v24 = vpop.f32.mrb[75].mxu0  ;;  %v4483_v62 = vadd.f32 %v4482_v55, %v8474_v56 }
 0xc01   : > { %v4507_v63 = vrot.slane %v4483_v62, 1 }
 0xc07   : > { %v7805_v57 = vpop.eup %7804 }
 0xc08   : > { %v7807_v58 = vpop.eup %7806  ;;  %v4493_v60 = vadd.f32 1.0, %v7805_v57 }
 0xc09   : > { %v4503_v61 = vadd.f32 1.0, %v7807_v58 }
 0xc0a   : > { %7808 = vrcp.f32 %v4493_v60 }
 0xc0b   : > { %7810 = vrcp.f32 %v4503_v61 }
 0xc14   : > { %v7809_v1 = vpop.eup %7808 }
 0xc15   : > { %v7811_v43 = vpop.eup %7810  ;;  %v4509_v5 = vmul.f32 %v7809_v1, %v4507_v63 }
 0xc16   : > { %v4516_v44 = vmul.f32 %v7811_v43, %v4514_v3  ;;  %v4512_v9 = vsub.f32 1.0, %v7811_v43 }
 0xc17   : > { %v4510_v6 = vadd.f32 %v4509_v5, %v8477_v59 }
 0xc19   : > { %7812 = vtanh.f32 %v4510_v6 }
 0xc23   : > { %v7813_v10 = vpop.eup %7812 }
 0xc24   : > { %v4513_v12 = vmul.f32 %v7813_v10, %v4512_v9 }
 0xc26   : > { %v4517_v13 = vadd.f32 %v4516_v44, %v4513_v12 }
 0xc28   : > { %4519 = vst.msk [vmem:[#allocation2] sm:$0x80] %vm4518_vm9, %v4517_v13  ;;  %v4521_v14 = vrot.slane %v4517_v13, 7 }
 0xc2a   : > { %7175 = vmatmul.mubr.msk.f32.vlgmr.msra.gmra.mrb[80].mxu1 %vm2548_vm0, %v4521_v14  ;;  %7186 = vmatmul.mubr.msk.f32.vlgmr.msra.gmra.mrb[76].mxu0 %vm2548_vm0, %v4521_v14 }
 0xc2b   : > { %7613 = vmatpush3.bf16.msra.mxu1 %v8425_v25  ;;  %7196 = vmatprep.mubr.msk.f32.mxu1 %vm7885_vm3, %v7886_v8 }
 0xc2c   : > { %7614 = vmatprep.subr.bf16.mxu1 %v7883_v2  ;;  %7619 = vmatpush3.bf16.msra.mxu0 %v8381_v7 }
 0xc2d   : > { %7620 = vmatprep.subr.bf16.mxu0 %v7883_v2  ;;  %7207 = vmatprep.mubr.msk.f32.mxu0 %vm7885_vm3, %v7886_v8 }
 0xc2f   : > { %7616 = vmatpush3.bf16.msra.mxu1 %v8436_v28 }
 0xc30   : > { %7623 = vmatprep.subr.bf16.mxu1 %v7883_v2  ;;  %7622 = vmatpush3.bf16.msra.mxu0 %v8394_v11 }
 0xc31   : > { %7629 = vmatprep.subr.bf16.mxu0 %v7883_v2 }
 0xc32   : > { %7197 = vmatmul.mubr.msk.f32.vlgmr.msra.gmra.mrb[82].mxu1 %vm2548_vm0, %v4521_v14 }
 0xc33   : > { %7625 = vmatpush3.bf16.msra.mxu1 %v8361_v0  ;;  %7218 = vmatprep.mubr.msk.f32.mxu1 %vm7885_vm3, %v7886_v8 }
 0xc34   : > { %7626 = vmatprep.subr.bf16.mxu1 %v7883_v2 }
 0xc37   : > { %7628 = vmatpush3.bf16.msra.mxu1 %v8371_v4 }
 0xc38   : > { %7635 = vmatprep.subr.bf16.mxu1 %v7883_v2 }
 0xcfd   : > { %v4590_v59 = vpop.f32.mrb[80].mxu1  ;;  %v4660_v15 = vpop.f32.mrb[76].mxu0 }
 0xcfe   : > { %v4734_v16 = vadd.f32 %v4590_v59, %v8453_v33  ;;  %v7176_v17 = vpop.f32.mrb[81].mxu1  ;;  %v7187_v18 = vpop.f32.mrb[77].mxu0  ;;  %v4741_v20 = vadd.f32 %v4660_v15, %v8458_v37 }
 0xd00   : > { %v6274_v19 = vmul.f32 -1.442695, %v4734_v16  ;;  %v6275_v21 = vmul.f32 -1.442695, %v4741_v20 }
 0xd02   : > { %7814 = vpow2.f32 %v6274_v19 }
 0xd03   : > { %7816 = vpow2.f32 %v6275_v21 }
 0xd05   : > { %v4730_v22 = vpop.f32.mrb[82].mxu1 }
 0xd06   : > { %v7198_v23 = vpop.f32.mrb[83].mxu1  ;;  %v4731_v31 = vadd.f32 %v4730_v22, %v8474_v56 }
 0xd0c   : > { %v7815_v26 = vpop.eup %7814 }
 0xd0d   : > { %v4738_v27 = vadd.f32 1.0, %v7815_v26  ;;  %v7817_v29 = vpop.eup %7816 }
 0xd0e   : > { %v4745_v30 = vadd.f32 1.0, %v7817_v29 }
 0xd0f   : > { %7818 = vrcp.f32 %v4738_v27 }
 0xd10   : > { %7820 = vrcp.f32 %v4745_v30 }
 0xd19   : > { %v7819_v32 = vpop.eup %7818 }
 0xd1a   : > { %v4748_v34 = vmul.f32 %v7819_v32, %v4731_v31  ;;  %v7821_v36 = vpop.eup %7820 }
 0xd1b   : > { %v4751_v38 = vsub.f32 1.0, %v7821_v36  ;;  %v4754_v42 = vmul.f32 %v7821_v36, %v4521_v14 }
 0xd1c   : > { %v4749_v35 = vadd.f32 %v4748_v34, %v8463_v41  ;;  %v8739_v34 = vld [vmem:[%s8843_s10] sm:$0x1] }
 0xd1e   : > { %7822 = vtanh.f32 %v4749_v35 }
 0xd28   : > { %v7823_v39 = vpop.eup %7822 }
 0xd29   : > { %v4752_v40 = vmul.f32 %v7823_v39, %v4751_v38 }
 0xd2b   : > { %v4755_v45 = vadd.f32 %v4754_v42, %v4752_v40 }
 0xd2d   : > { %4756 = vst.msk [vmem:[#allocation2 + $0x8] sm:$0x1] %vm2783_vm1, %v4755_v45  ;;  %7208 = vmatmul.mubr.msk.f32.vlgmr.msra.gmra.mrb[78].mxu0 %vm2548_vm0, %v4755_v45  ;;  %7219 = vmatmul.mubr.msk.f32.vlgmr.msra.gmra.mrb[84].mxu1 %vm2548_vm0, %v4755_v45  ;;  %v4998_v43 = vrot.slane %v4755_v45, 7 }
 0xd2e   : > { %7631 = vmatpush3.bf16.msra.mxu0 %v8425_v25  ;;  %7229 = vmatprep.mubr.msk.f32.mxu0 %vm7885_vm3, %v7886_v8 }
 0xd2f   : > { %7632 = vmatprep.subr.bf16.mxu0 %v7883_v2  ;;  %7637 = vmatpush3.bf16.msra.mxu1 %v8381_v7 }
 0xd30   : > { %7638 = vmatprep.subr.bf16.mxu1 %v7883_v2  ;;  %7240 = vmatprep.mubr.msk.f32.mxu1 %vm7885_vm3, %v7886_v8 }
 0xd32   : > { %7634 = vmatpush3.bf16.msra.mxu0 %v8436_v28 }
 0xd33   : > { %7641 = vmatprep.subr.bf16.mxu0 %v7883_v2  ;;  %7640 = vmatpush3.bf16.msra.mxu1 %v8394_v11 }
 0xd34   : > { %7647 = vmatprep.subr.bf16.mxu1 %v7883_v2 }
 0xd35   : > { %7230 = vmatmul.mubr.msk.f32.vlgmr.msra.gmra.mrb[80].mxu0 %vm2548_vm0, %v4755_v45 }
 0xd36   : > { %7643 = vmatpush3.bf16.msra.mxu0 %v8361_v0  ;;  %7251 = vmatprep.mubr.msk.f32.mxu0 %vm7885_vm3, %v7886_v8 }
 0xd37   : > { %7644 = vmatprep.subr.bf16.mxu0 %v7883_v2 }
 0xd3a   : > { %7646 = vmatpush3.bf16.msra.mxu0 %v8371_v4 }
 0xd3b   : > { %7653 = vmatprep.subr.bf16.mxu0 %v7883_v2 }
 0xe00   : > { %v4826_v46 = vpop.f32.mrb[78].mxu0  ;;  %v4896_v47 = vpop.f32.mrb[84].mxu1 }
 0xe01   : > { %v4971_v48 = vrot.slane %v4826_v46, 7  ;;  %v4981_v49 = vrot.slane %v4896_v47, 7  ;;  %v7209_v50 = vpop.f32.mrb[79].mxu0  ;;  %v7220_v51 = vpop.f32.mrb[85].mxu1 }
 0xe03   : > { %v4973_v52 = vadd.f32 %v4971_v48, %v8453_v33  ;;  %v4983_v53 = vadd.f32 %v4981_v49, %v8458_v37 }
 0xe05   : > { %v6279_v54 = vmul.f32 -1.442695, %v4973_v52  ;;  %v6280_v55 = vmul.f32 -1.442695, %v4983_v53 }
 0xe07   : > { %7824 = vpow2.f32 %v6279_v54 }
 0xe08   : > { %7826 = vpow2.f32 %v6280_v55  ;;  %v4966_v24 = vpop.f32.mrb[80].mxu0 }
 0xe09   : > { %v7231_v57 = vpop.f32.mrb[81].mxu0  ;;  %v4967_v63 = vadd.f32 %v4966_v24, %v8474_v56 }
 0xe0b   : > { %v4991_v1 = vrot.slane %v4967_v63, 7 }
 0xe11   : > { %v7825_v58 = vpop.eup %7824 }
 0xe12   : > { %v7827_v60 = vpop.eup %7826  ;;  %v4977_v61 = vadd.f32 1.0, %v7825_v58 }
 0xe13   : > { %v4987_v62 = vadd.f32 1.0, %v7827_v60 }
 0xe14   : > { %7828 = vrcp.f32 %v4977_v61 }
 0xe15   : > { %7830 = vrcp.f32 %v4987_v62 }
 0xe1e   : > { %v7829_v3 = vpop.eup %7828 }
 0xe1f   : > { %v7831_v5 = vpop.eup %7830  ;;  %v4993_v44 = vmul.f32 %v7829_v3, %v4991_v1 }
 0xe20   : > { %v5000_v6 = vmul.f32 %v7831_v5, %v4998_v43  ;;  %v4996_v10 = vsub.f32 1.0, %v7831_v5 }
 0xe21   : > { %v4994_v9 = vadd.f32 %v4993_v44, %v8463_v41 }
 0xe23   : > { %7832 = vtanh.f32 %v4994_v9 }
 0xe2d   : > { %v7833_v12 = vpop.eup %7832 }
 0xe2e   : > { %v4997_v13 = vmul.f32 %v7833_v12, %v4996_v10 }
 0xe30   : > { %v5001_v14 = vadd.f32 %v5000_v6, %v4997_v13 }
 0xe32   : > { %5002 = vst.msk [vmem:[#allocation2 + $0x8] sm:$0x2] %vm3030_vm2, %v5001_v14  ;;  %v5004_v59 = vrot.slane %v5001_v14, 1  ;;  %v5245_v39 = vrot.slane %v5001_v14, 7 }
 0xe34   : > { %7241 = vmatmul.mubr.msk.f32.vlgmr.msra.gmra.mrb[86].mxu1 %vm2548_vm0, %v5004_v59  ;;  %7252 = vmatmul.mubr.msk.f32.vlgmr.msra.gmra.mrb[82].mxu0 %vm2548_vm0, %v5004_v59 }
 0xe35   : > { %7649 = vmatpush3.bf16.msra.mxu1 %v8425_v25  ;;  %7262 = vmatprep.mubr.msk.f32.mxu1 %vm7885_vm3, %v7886_v8 }
 0xe36   : > { %7650 = vmatprep.subr.bf16.mxu1 %v7883_v2  ;;  %7655 = vmatpush3.bf16.msra.mxu0 %v8381_v7 }
 0xe37   : > { %7656 = vmatprep.subr.bf16.mxu0 %v7883_v2  ;;  %7273 = vmatprep.mubr.msk.f32.mxu0 %vm7885_vm3, %v7886_v8 }
 0xe39   : > { %7652 = vmatpush3.bf16.msra.mxu1 %v8436_v28 }
 0xe3a   : > { %7659 = vmatprep.subr.bf16.mxu1 %v7883_v2  ;;  %7658 = vmatpush3.bf16.msra.mxu0 %v8394_v11 }
 0xe3b   : > { %7665 = vmatprep.subr.bf16.mxu0 %v7883_v2 }
 0xe3c   : > { %7263 = vmatmul.mubr.msk.f32.vlgmr.msra.gmra.mrb[88].mxu1 %vm2548_vm0, %v5004_v59 }
 0xe3d   : > { %7661 = vmatpush3.bf16.msra.mxu1 %v8361_v0  ;;  %7284 = vmatprep.mubr.msk.f32.mxu1 %vm7885_vm3, %v7886_v8 }
 0xe3e   : > { %7662 = vmatprep.subr.bf16.mxu1 %v7883_v2 }
 0xe41   : > { %7664 = vmatpush3.bf16.msra.mxu1 %v8371_v4 }
 0xe42   : > { %7671 = vmatprep.subr.bf16.mxu1 %v7883_v2 }
 0xf07   : > { %v5073_v56 = vpop.f32.mrb[86].mxu1  ;;  %v5143_v15 = vpop.f32.mrb[82].mxu0 }
 0xf08   : > { %v5218_v16 = vrot.slane %v5073_v56, 6  ;;  %v5228_v17 = vrot.slane %v5143_v15, 6  ;;  %v7242_v18 = vpop.f32.mrb[87].mxu1  ;;  %v7253_v19 = vpop.f32.mrb[83].mxu0 }
 0xf0a   : > { %v5220_v20 = vadd.f32 %v5218_v16, %v8453_v33  ;;  %v5230_v21 = vadd.f32 %v5228_v17, %v8458_v37 }
 0xf0c   : > { %v6284_v22 = vmul.f32 -1.442695, %v5220_v20  ;;  %v6285_v23 = vmul.f32 -1.442695, %v5230_v21 }
 0xf0e   : > { %7834 = vpow2.f32 %v6284_v22 }
 0xf0f   : > { %7836 = vpow2.f32 %v6285_v23  ;;  %v5213_v26 = vpop.f32.mrb[88].mxu1 }
 0xf10   : > { %v7264_v27 = vpop.f32.mrb[89].mxu1  ;;  %v5214_v35 = vadd.f32 %v8739_v34, %v5213_v26 }
 0xf12   : > { %v5238_v36 = vrot.slane %v5214_v35, 6 }
 0xf18   : > { %v7835_v29 = vpop.eup %7834 }
 0xf19   : > { %v7837_v30 = vpop.eup %7836  ;;  %v5224_v31 = vadd.f32 1.0, %v7835_v29 }
 0xf1a   : > { %v5234_v32 = vadd.f32 1.0, %v7837_v30 }
 0xf1b   : > { %7838 = vrcp.f32 %v5224_v31 }
 0xf1c   : > { %7840 = vrcp.f32 %v5234_v32 }
 0xf25   : > { %v7839_v38 = vpop.eup %7838 }
 0xf26   : > { %v7841_v40 = vpop.eup %7840  ;;  %v5240_v42 = vmul.f32 %v7839_v38, %v5238_v36 }
 0xf27   : > { %v5247_v45 = vmul.f32 %v7841_v40, %v5245_v39  ;;  %v5243_v47 = vsub.f32 1.0, %v7841_v40 }
 0xf28   : > { %v5241_v46 = vadd.f32 %v5240_v42, %v8463_v41 }
 0xf2a   : > { %7842 = vtanh.f32 %v5241_v46 }
 0xf34   : > { %v7843_v48 = vpop.eup %7842 }
 0xf35   : > { %v5244_v49 = vmul.f32 %v7843_v48, %v5243_v47 }
 0xf37   : > { %v5248_v50 = vadd.f32 %v5247_v45, %v5244_v49 }
 0xf39   : > { %5249 = vst.msk [vmem:[#allocation2 + $0x8] sm:$0x4] %vm3278_vm4, %v5248_v50  ;;  %v5251_v51 = vrot.slane %v5248_v50, 2  ;;  %v5492_v12 = vrot.slane %v5248_v50, 7 }
 0xf3b   : > { %7274 = vmatmul.mubr.msk.f32.vlgmr.msra.gmra.mrb[84].mxu0 %vm2548_vm0, %v5251_v51  ;;  %7285 = vmatmul.mubr.msk.f32.vlgmr.msra.gmra.mrb[90].mxu1 %vm2548_vm0, %v5251_v51 }
 0xf3c   : > { %7667 = vmatpush3.bf16.msra.mxu0 %v8425_v25  ;;  %7295 = vmatprep.mubr.msk.f32.mxu0 %vm7885_vm3, %v7886_v8 }
 0xf3d   : > { %7668 = vmatprep.subr.bf16.mxu0 %v7883_v2  ;;  %7673 = vmatpush3.bf16.msra.mxu1 %v8381_v7 }
 0xf3e   : > { %7674 = vmatprep.subr.bf16.mxu1 %v7883_v2  ;;  %7306 = vmatprep.mubr.msk.f32.mxu1 %vm7885_vm3, %v7886_v8 }
 0xf40   : > { %7670 = vmatpush3.bf16.msra.mxu0 %v8436_v28 }
 0xf41   : > { %7677 = vmatprep.subr.bf16.mxu0 %v7883_v2  ;;  %7676 = vmatpush3.bf16.msra.mxu1 %v8394_v11 }
 0xf42   : > { %7683 = vmatprep.subr.bf16.mxu1 %v7883_v2 }
 0xf43   : > { %7296 = vmatmul.mubr.msk.f32.vlgmr.msra.gmra.mrb[86].mxu0 %vm2548_vm0, %v5251_v51 }
 0xf44   : > { %7679 = vmatpush3.bf16.msra.mxu0 %v8361_v0  ;;  %7317 = vmatprep.mubr.msk.f32.mxu0 %vm7885_vm3, %v7886_v8 }
 0xf45   : > { %7680 = vmatprep.subr.bf16.mxu0 %v7883_v2 }
 0xf48   : > { %7682 = vmatpush3.bf16.msra.mxu0 %v8371_v4 }
 0xf49   : > { %7689 = vmatprep.subr.bf16.mxu0 %v7883_v2 }
0x100e   : > { %v5320_v52 = vpop.f32.mrb[84].mxu0  ;;  %v5390_v53 = vpop.f32.mrb[90].mxu1 }
0x100f   : > { %v5465_v54 = vrot.slane %v5320_v52, 5  ;;  %v5475_v55 = vrot.slane %v5390_v53, 5  ;;  %v7275_v24 = vpop.f32.mrb[85].mxu0  ;;  %v7286_v57 = vpop.f32.mrb[91].mxu1 }
0x1010   : > { %v505_v24 = vld [vmem:[%s8844_s11 + $0x8] sm:$0xff] }
0x1011   : > { %v5467_v58 = vadd.f32 %v5465_v54, %v8453_v33  ;;  %v5477_v60 = vadd.f32 %v5475_v55, %v8458_v37  ;;  %v5991_v54 = vld [vmem:[#allocation2] sm:$0xff] }
0x1012   : > { %v504_v55 = vld [vmem:[%s8844_s11] sm:$0xff] }
0x1013   : > { %v6289_v61 = vmul.f32 -1.442695, %v5467_v58  ;;  %v6290_v62 = vmul.f32 -1.442695, %v5477_v60 }
0x1015   : > { %7844 = vpow2.f32 %v6289_v61 }
0x1016   : > { %7846 = vpow2.f32 %v6290_v62  ;;  %v5460_v63 = vpop.f32.mrb[86].mxu0 }
0x1017   : > { %v7297_v1 = vpop.f32.mrb[87].mxu0  ;;  %v5461_v6 = vadd.f32 %v8739_v34, %v5460_v63 }
0x1019   : > { %v5485_v9 = vrot.slane %v5461_v6, 5 }
0x101f   : > { %v7845_v3 = vpop.eup %7844 }
0x1020   : > { %v7847_v43 = vpop.eup %7846  ;;  %v5471_v5 = vadd.f32 1.0, %v7845_v3 }
0x1021   : > { %v5481_v44 = vadd.f32 1.0, %v7847_v43 }
0x1022   : > { %7848 = vrcp.f32 %v5471_v5 }
0x1023   : > { %7850 = vrcp.f32 %v5481_v44 }
0x102c   : > { %v7849_v10 = vpop.eup %7848 }
0x102d   : > { %v7851_v13 = vpop.eup %7850  ;;  %v5487_v14 = vmul.f32 %v7849_v10, %v5485_v9 }
0x102e   : > { %v5494_v59 = vmul.f32 %v7851_v13, %v5492_v12  ;;  %v5490_v15 = vsub.f32 1.0, %v7851_v13 }
0x102f   : > { %v5488_v56 = vadd.f32 %v5487_v14, %v8463_v41 }
0x1031   : > { %7852 = vtanh.f32 %v5488_v56 }
0x103b   : > { %v7853_v16 = vpop.eup %7852 }
0x103c   : > { %v5491_v17 = vmul.f32 %v7853_v16, %v5490_v15 }
0x103e   : > { %v5495_v18 = vadd.f32 %v5494_v59, %v5491_v17 }
0x1040   : > { %5496 = vst.msk [vmem:[#allocation2 + $0x8] sm:$0x8] %vm3526_vm5, %v5495_v18  ;;  %v5498_v19 = vrot.slane %v5495_v18, 3  ;;  %v5739_v42 = vrot.slane %v5495_v18, 7 }
0x1042   : > { %7307 = vmatmul.mubr.msk.f32.vlgmr.msra.gmra.mrb[92].mxu1 %vm2548_vm0, %v5498_v19  ;;  %7318 = vmatmul.mubr.msk.f32.vlgmr.msra.gmra.mrb[88].mxu0 %vm2548_vm0, %v5498_v19 }
0x1043   : > { %7685 = vmatpush3.bf16.msra.mxu1 %v8425_v25  ;;  %7328 = vmatprep.mubr.msk.f32.mxu1 %vm7885_vm3, %v7886_v8 }
0x1044   : > { %7686 = vmatprep.subr.bf16.mxu1 %v7883_v2  ;;  %7691 = vmatpush3.bf16.msra.mxu0 %v8381_v7 }
0x1045   : > { %7692 = vmatprep.subr.bf16.mxu0 %v7883_v2  ;;  %7339 = vmatprep.mubr.msk.f32.mxu0 %vm7885_vm3, %v7886_v8 }
0x1047   : > { %7688 = vmatpush3.bf16.msra.mxu1 %v8436_v28 }
0x1048   : > { %7695 = vmatprep.subr.bf16.mxu1 %v7883_v2  ;;  %7694 = vmatpush3.bf16.msra.mxu0 %v8394_v11 }
0x1049   : > { %7701 = vmatprep.subr.bf16.mxu0 %v7883_v2 }
0x104a   : > { %7329 = vmatmul.mubr.msk.f32.vlgmr.msra.gmra.mrb[94].mxu1 %vm2548_vm0, %v5498_v19 }
0x104b   : > { %7697 = vmatpush3.bf16.msra.mxu1 %v8361_v0  ;;  %7350 = vmatprep.mubr.msk.f32.mxu1 %vm7885_vm3, %v7886_v8 }
0x104c   : > { %7698 = vmatprep.subr.bf16.mxu1 %v7883_v2 }
0x104f   : > { %7700 = vmatpush3.bf16.msra.mxu1 %v8371_v4 }
0x1115   : > { %v5567_v7 = vpop.f32.mrb[92].mxu1  ;;  %v5637_v20 = vpop.f32.mrb[88].mxu0 }
0x1116   : > { %v5712_v21 = vrot.slane %v5567_v7, 4  ;;  %v5722_v22 = vrot.slane %v5637_v20, 4  ;;  %v7308_v23 = vpop.f32.mrb[93].mxu1  ;;  %v7319_v26 = vpop.f32.mrb[89].mxu0 }
0x1118   : > { %v5714_v11 = vadd.f32 %v5712_v21, %v8453_v33  ;;  %v5724_v27 = vadd.f32 %v5722_v22, %v8458_v37 }
0x111a   : > { %v6294_v29 = vmul.f32 -1.442695, %v5714_v11  ;;  %v6295_v30 = vmul.f32 -1.442695, %v5724_v27 }
0x111c   : > { %7854 = vpow2.f32 %v6294_v29 }
0x111d   : > { %7856 = vpow2.f32 %v6295_v30  ;;  %v5707_v0 = vpop.f32.mrb[94].mxu1 }
0x111e   : > { %v7330_v31 = vpop.f32.mrb[95].mxu1  ;;  %v5708_v38 = vadd.f32 %v8739_v34, %v5707_v0 }
0x1120   : > { %v5732_v39 = vrot.slane %v5708_v38, 4 }
0x1126   : > { %v7855_v32 = vpop.eup %7854 }
0x1127   : > { %v7857_v35 = vpop.eup %7856  ;;  %v5718_v36 = vadd.f32 1.0, %v7855_v32 }
0x1128   : > { %v5728_v4 = vadd.f32 1.0, %v7857_v35 }
0x1129   : > { %7858 = vrcp.f32 %v5718_v36 }
0x112a   : > { %7860 = vrcp.f32 %v5728_v4 }
0x1133   : > { %v7859_v40 = vpop.eup %7858 }
0x1134   : > { %v7861_v45 = vpop.eup %7860  ;;  %v5734_v46 = vmul.f32 %v7859_v40, %v5732_v39 }
0x1135   : > { %v5741_v47 = vmul.f32 %v7861_v45, %v5739_v42  ;;  %v5737_v49 = vsub.f32 1.0, %v7861_v45 }
0x1136   : > { %v5735_v48 = vadd.f32 %v5734_v46, %v8463_v41 }
0x1138   : > { %7862 = vtanh.f32 %v5735_v48 }
0x1142   : > { %v7863_v50 = vpop.eup %7862 }
0x1143   : > { %v5738_v51 = vmul.f32 %v7863_v50, %v5737_v49 }
0x1145   : > { %v5742_v52 = vadd.f32 %v5741_v47, %v5738_v51 }
0x1147   : > { %5743 = vst.msk [vmem:[#allocation2 + $0x8] sm:$0x10] %vm3774_vm6, %v5742_v52  ;;  %v5745_v53 = vrot.slane %v5742_v52, 4 }
0x1149   : > { %7340 = vmatmul.mubr.msk.f32.vlgmr.msra.gmra.mrb[90].mxu0 %vm2548_vm0, %v5745_v53  ;;  %7351 = vmatmul.mubr.msk.f32.vlgmr.msra.gmra.mrb[96].mxu1 %vm2548_vm0, %v5745_v53 }
0x114a   : > { %7703 = vmatpush3.bf16.msra.mxu0 %v8425_v25  ;;  %7372 = vmatprep.mubr.msk.f32.mxu1 %vm2548_vm0, %v5991_v54  ;;  %v7707_v25 = vpack.c.bf16 %v505_v24, %v504_v55 }
0x114b   : > { %7704 = vmatprep.subr.bf16.mxu0 %v7883_v2  ;;  %7361 = vmatprep.mubr.msk.f32.mxu0 %vm7885_vm3, %v7886_v8  ;;  %v506_v2 = vld [vmem:[%s8844_s11 + $0x10] sm:$0xff]  ;;  %v507_v8 = vld [vmem:[%s8844_s11 + $0x18] sm:$0xff]  ;;  %vm6081_vm3 = vcmask 128000  }
0x114c   : > { %7708 = vmatprep.subr.bf16.mxu1 %v7707_v25 }
0x114d   : > { %7710 = vmatpush3.bf16.msra.mxu1 %v7707_v25 }
0x114e   : > { %7706 = vmatpush3.bf16.msra.mxu0 %v8436_v28  ;;  %v7711_v28 = vpack.c.bf16 %v507_v8, %v506_v2 }
0x1150   : > { %7712 = vmatprep.subr.bf16.mxu1 %v7711_v28 }
0x1151   : > { %7362 = vmatmul.mubr.msk.f32.vlgmr.msra.gmra.mrb[92].mxu0 %vm2548_vm0, %v5745_v53  ;;  %7714 = vmatpush3.bf16.msra.mxu1 %v7711_v28 }
0x121c   : > { %v5814_v57 = vpop.f32.mrb[90].mxu0  ;;  %v5884_v58 = vpop.f32.mrb[96].mxu1 }
0x121d   : > { %v5959_v60 = vrot.slane %v5814_v57, 3  ;;  %v5969_v61 = vrot.slane %v5884_v58, 3  ;;  %v7341_v62 = vpop.f32.mrb[91].mxu0  ;;  %v7352_v63 = vpop.f32.mrb[97].mxu1 }
0x121f   : > { %v5961_v1 = vadd.f32 %v5959_v60, %v8453_v33  ;;  %v5971_v3 = vadd.f32 %v5969_v61, %v8458_v37  ;;  %v5986_v33 = vrot.slane %v5742_v52, 7 }
0x1221   : > { %v6299_v43 = vmul.f32 -1.442695, %v5961_v1  ;;  %v6300_v5 = vmul.f32 -1.442695, %v5971_v3 }
0x1223   : > { %7864 = vpow2.f32 %v6299_v43 }
0x1224   : > { %7866 = vpow2.f32 %v6300_v5  ;;  %v5954_v44 = vpop.f32.mrb[92].mxu0 }
0x1225   : > { %v7363_v6 = vpop.f32.mrb[93].mxu0  ;;  %v5955_v14 = vadd.f32 %v8739_v34, %v5954_v44  ;;  %v6301_v34 = vld [vmem:[%s8845_s12] ss:$0 sm:$0xff] }
0x1227   : > { %v5979_v59 = vrot.slane %v5955_v14, 3 }
0x122d   : > { %v7865_v9 = vpop.eup %7864 }
0x122e   : > { %v7867_v10 = vpop.eup %7866  ;;  %v5965_v12 = vadd.f32 1.0, %v7865_v9 }
0x122f   : > { %v5975_v13 = vadd.f32 1.0, %v7867_v10 }
0x1230   : > { %7868 = vrcp.f32 %v5965_v12 }
0x1231   : > { %7870 = vrcp.f32 %v5975_v13 }
0x123a   : > { %v7869_v56 = vpop.eup %7868 }
0x123b   : > { %v7871_v15 = vpop.eup %7870  ;;  %v5981_v37 = vmul.f32 %v7869_v56, %v5979_v59 }
0x123c   : > { %v5988_v16 = vmul.f32 %v7871_v15, %v5986_v33  ;;  %v5984_v18 = vsub.f32 1.0, %v7871_v15 }
0x123d   : > { %v5982_v17 = vadd.f32 %v5981_v37, %v8463_v41 }
0x123f   : > { %7872 = vtanh.f32 %v5982_v17 }
0x1249   : > { %v7873_v19 = vpop.eup %7872 }
0x124a   : > { %v5985_v7 = vmul.f32 %v7873_v19, %v5984_v18 }
0x124c   : > { %v5989_v20 = vadd.f32 %v5988_v16, %v5985_v7 }
0x124e   : > { %5990 = vst.msk [vmem:[#allocation2 + $0x8] sm:$0x20] %vm4022_vm7, %v5989_v20 }
0x1255   : > { %v5992_v21 = vld [vmem:[#allocation2 + $0x8] sm:$0x3f] }
0x1256   : > { %7373 = vmatmul.mubr.msk.f32.vlgmr.msra.gmra.mrb[98].mxu1 %vm2548_vm0, %v5992_v21 }
0x1329   : > { %v7374_v41 = vpop.f32.mrb[98].mxu1 }
0x132a   : > { %v6077_v22 = vadd.f32 %v7374_v41, %v6301_v34  ;;  %v6071_v23 = vpop.f32.mrb[99].mxu1 }
0x132b   : > { %v6072_v26 = vadd.f32 %v6301_v34, %v6071_v23 }
0x132c   : > { %6082 = vst.msk [vmem:[%s440_s23 + $0x8] sm:$0x3f] %vm6081_vm3, %v6077_v22 }
0x132d   : > { %6080 = vst.msk [vmem:[%s440_s23] sm:$0xff] %vm1200_vm15, %v6072_v26 }
0x132e PF: > { %s23_s25 = sadd.s32 1, %s7881_s25  }
0x132f   : > { %p20_p4 = scmp.ge.s32.totalorder %s23_s25, 4  }
0x1331   :  { %22 = sbr.rel (!%p20_p4) target bundleno = 1 (0x1), region = 108 }

</bundles_post_ra>
